<compile_context>
chip_gen: v7x
topology: tpu7x:2x2x1
jax: 0.10.0
libtpu: 0.0.40
codegen_flags: <defaults>
</compile_context>

<pallas_src>
import jax
import jax.numpy as jnp
from jax.experimental import pallas as pl
from jax.experimental.pallas import tpu as pltpu


def _round_up(x, m):
    return (x + m - 1) // m * m


# ----------------------------------------------------------------------------
# Layer configuration mirroring the nn.Module __init__
# ----------------------------------------------------------------------------
CAUSAL_CFG = [
    dict(cin=1,  cout=32, k=3, dil=1, pad=1, bn=False, ops=("bias", "relu")),
    dict(cin=32, cout=64, k=3, dil=1, pad=1, bn=True,  ops=("bias", "bn", "relu")),
    dict(cin=64, cout=64, k=3, dil=1, pad=1, bn=True,  ops=("bias", "relu", "bn")),
    dict(cin=64, cout=64, k=3, dil=2, pad=3, bn=False, ops=("bias", "relu")),
]
FINAL_CFG = [
    dict(cin=64, cout=64, k=3, dil=1, pad=1, bn=True,  ops=("bias", "bn", "relu")),
    dict(cin=64, cout=64, k=3, dil=1, pad=1, bn=True,  ops=("bias", "bn", "relu")),
    dict(cin=64, cout=64, k=3, dil=1, pad=1, bn=True,  ops=("bias", "bn", "relu")),
    dict(cin=64, cout=1,  k=5, dil=1, pad=2, bn=False, ops=("bias", "tanh")),
]


# ----------------------------------------------------------------------------
# Deterministic parameter init (shapes match the nn.Module __init__)
# ----------------------------------------------------------------------------
def _conv_init(key, cin, cout, k):
    kw, kb = jax.random.split(key)
    w = jax.random.normal(kw, (k, cin, cout), jnp.float32) / jnp.sqrt(cin * k)
    b = 0.05 * jax.random.normal(kb, (cout,), jnp.float32)
    return w, b


def _bn_init(key, c, eps=1e-5):
    k1, k2, k3, k4 = jax.random.split(key, 4)
    gamma = 1.0 + 0.1 * jax.random.normal(k1, (c,), jnp.float32)
    beta = 0.1 * jax.random.normal(k2, (c,), jnp.float32)
    mean = 0.1 * jax.random.normal(k3, (c,), jnp.float32)
    var = 1.0 + 0.1 * jax.random.uniform(k4, (c,), jnp.float32)
    scale = gamma / jnp.sqrt(var + eps)
    shift = beta - mean * scale
    return scale, shift


def init_params(key):
    params = {"causal": [], "final": []}
    for section, cfgs in (("causal", CAUSAL_CFG), ("final", FINAL_CFG)):
        for cfg in cfgs:
            key, kc, kn = jax.random.split(key, 3)
            w, b = _conv_init(kc, cfg["cin"], cfg["cout"], cfg["k"])
            if cfg["bn"]:
                s, t = _bn_init(kn, cfg["cout"])
            else:
                s = jnp.ones((cfg["cout"],), jnp.float32)
                t = jnp.zeros((cfg["cout"],), jnp.float32)
            params[section].append(dict(w=w, b=b, s=s, t=t, cfg=cfg))
    key, ku = jax.random.split(key)
    kuw, kub = jax.random.split(ku)
    # ConvTranspose1d(64, 64, 8): PyTorch weight layout (Cin, Cout, K)
    params["up_w"] = jax.random.normal(kuw, (64, 64, 8), jnp.float32) / jnp.sqrt(64 * 8)
    params["up_b"] = 0.05 * jax.random.normal(kub, (64,), jnp.float32)
    return params


# ----------------------------------------------------------------------------
# Fused Pallas kernel: one grid step = one sample, activations stay in VMEM
# ----------------------------------------------------------------------------
def _build_kernel(plan, n_w, GP, RC):
    """plan: static per-layer descriptors (Python); fully unrolled in the body."""

    def kernel(*refs):
        x_ref = refs[0]                       # (1, RT, 8) input slab of this sample
        w_refs = refs[1:1 + n_w]              # packed per-layer weight matrices
        aff_ref = refs[1 + n_w]               # (n_layers, 4, 128) affine params
        o_ref = refs[2 + n_w]                 # (1, RC, 128) phase-split output
        buf = refs[3 + n_w]                   # (RT, 128) VMEM activation buffer
        f32 = jnp.float32

        # Zero the buffer once per sample: margins stay zero for the kernel's
        # lifetime, which implements every layer's zero-padding exactly.
        buf[...] = jnp.zeros(buf.shape, f32)

        rows = jax.lax.broadcasted_iota(jnp.int32, (RC, 1), 0)
        masks = {}

        def mask_for(n):                      # one compare per distinct length
            if n not in masks:
                masks[n] = (rows < n).astype(f32)
            return masks[n]

        x0 = x_ref[0]                         # (RT, 8)

        for li, spec in enumerate(plan):
            cin = spec["cin"]
            if li == 0:                       # first layer reads the staged input
                taps = [x0[GP + o: GP + o + RC, 0:cin] for o in spec["offsets"]]
            else:                             # later layers read the VMEM buffer
                taps = [buf[GP + o: GP + o + RC, 0:cin] for o in spec["offsets"]]
            xin = jnp.concatenate(taps, axis=-1) if len(taps) > 1 else taps[0]

            # one merged-tap MXU matmul per layer, 128 output lanes
            y = jnp.dot(xin, w_refs[li][...], preferred_element_type=f32)

            # fused bias / eval-BatchNorm / activation in nn.Sequential order
            y = y * aff_ref[li, 0:1, :] + aff_ref[li, 1:2, :]
            y = jnp.tanh(y) if spec["act"] == "tanh" else jnp.maximum(y, 0.0)
            if spec["post"]:
                y = y * aff_ref[li, 2:3, :] + aff_ref[li, 3:4, :]

            y = y * mask_for(spec["len_out"])  # keep rows beyond this layer zero

            if spec["last"]:
                o_ref[0, :, :] = y             # lane-dense 128-wide store
            else:
                buf[GP:GP + RC, :] = y         # aligned, full-lane VMEM store

    return kernel


# ----------------------------------------------------------------------------
# Forward pass (single fused Pallas kernel, grid over batch)
# ----------------------------------------------------------------------------
def simple_upsampler_forward(x_ncl, params):
    """PyTorch-style NCL input (N, 1, L) -> (N, 1, 2L)."""
    N, cin0, L0 = x_ncl.shape
    assert cin0 == 1
    f32 = jnp.float32
    L_mid = L0 + 2                 # after Conv1d(64,64,3,dilation=2,padding=3)
    GP, TAIL = 8, 8                # leading / trailing zero margins (tap reach)
    RC = _round_up(L_mid, 8)       # center rows = matmul M dimension per sample
    RT = GP + RC + TAIL

    # ---- packing helpers -----------------------------------------------------
    def pack_std(w, cin_p):
        K, Cin, Cout = w.shape
        wp = jnp.pad(w.astype(f32), ((0, 0), (0, cin_p - Cin), (0, 128 - Cout)))
        return wp.reshape(K * cin_p, 128)

    def pack_affine(ops, b, s, t, tile2=False):
        one, zero = jnp.ones_like(b), jnp.zeros_like(b)
        if ops == ("bias", "bn", "relu"):
            rows = [s, b * s + t, one, zero]          # bias folded into BN shift
        elif ops == ("bias", "relu", "bn"):
            rows = [one, b, s, t]                     # BN applied after ReLU
        else:                                         # ("bias","relu") / ("bias","tanh")
            rows = [one, b, one, zero]
        rows = jnp.stack(rows).astype(f32)            # (4, C)
        if tile2:                                     # same params for both phases
            rows = jnp.tile(rows, (1, 2))
        pad = 128 - rows.shape[1]
        fill = jnp.stack([jnp.ones((pad,), f32), jnp.zeros((pad,), f32),
                          jnp.ones((pad,), f32), jnp.zeros((pad,), f32)])
        return jnp.concatenate([rows, fill], axis=1)  # (4, 128)

    plan, w_list, aff_rows = [], [], []

    # ---- causal convs (base-rate rows, <=64 channels) -------------------------
    causal_cin_p = [8, 32, 64, 64]
    causal_len = [L0, L0, L0, L_mid]
    for i, layer in enumerate(params["causal"]):
        cfg = layer["cfg"]
        offs = tuple(-cfg["pad"] + k * cfg["dil"] for k in range(cfg["k"]))
        w_list.append(pack_std(layer["w"], causal_cin_p[i]))
        aff_rows.append(pack_affine(tuple(cfg["ops"]), layer["b"], layer["s"], layer["t"]))
        plan.append(dict(cin=causal_cin_p[i], offsets=offs, act="relu",
                         post=(tuple(cfg["ops"]) == ("bias", "relu", "bn")),
                         len_out=causal_len[i], last=False))

    # ---- ConvTranspose1d(64,64,8,stride=2,pad=5): polyphase, phases merged -----
    # half-rate row m holds [even=y[2m] | odd=y[2m+1]] in lanes 0:64 / 64:128
    uw = params["up_w"].astype(f32)                   # (Cin=64, Cout=64, K=8)
    Z = jnp.zeros((64, 64), f32)
    up_blocks = [
        jnp.concatenate([uw[:, :, 7], Z],           axis=1),   # tap -1
        jnp.concatenate([uw[:, :, 5], uw[:, :, 6]], axis=1),   # tap  0
        jnp.concatenate([uw[:, :, 3], uw[:, :, 4]], axis=1),   # tap +1
        jnp.concatenate([uw[:, :, 1], uw[:, :, 2]], axis=1),   # tap +2
        jnp.concatenate([Z,           uw[:, :, 0]], axis=1),   # tap +3
    ]
    w_list.append(jnp.concatenate(up_blocks, axis=0))          # (320, 128)
    aff_rows.append(pack_affine(("bias", "relu"), params["up_b"].astype(f32),
                                jnp.ones((64,), f32), jnp.zeros((64,), f32),
                                tile2=True))
    plan.append(dict(cin=64, offsets=(-1, 0, 1, 2, 3), act="relu",
                     post=False, len_out=L0, last=False))

    # ---- final convs, phase-split (half-rate) polyphase form -------------------
    def pack_poly_k3(w):                               # (3, 64, 64) -> (384, 128)
        W0, W1, W2 = w[0].astype(f32), w[1].astype(f32), w[2].astype(f32)
        Zb = jnp.zeros_like(W0)
        tm1 = jnp.concatenate([jnp.concatenate([Zb, Zb], 1),
                               jnp.concatenate([W0, Zb], 1)], 0)
        t0 = jnp.concatenate([jnp.concatenate([W1, W0], 1),
                              jnp.concatenate([W2, W1], 1)], 0)
        tp1 = jnp.concatenate([jnp.concatenate([Zb, W2], 1),
                               jnp.concatenate([Zb, Zb], 1)], 0)
        return jnp.concatenate([tm1, t0, tp1], axis=0)

    def pack_poly_k5_out1(w):                          # (5, 64, 1) -> (384, 128)
        W = [w[i].astype(f32) for i in range(5)]
        Zc = jnp.zeros_like(W[0])
        tm1 = jnp.concatenate([jnp.concatenate([W[0], Zc],   1),
                               jnp.concatenate([W[1], W[0]], 1)], 0)
        t0 = jnp.concatenate([jnp.concatenate([W[2], W[1]], 1),
                              jnp.concatenate([W[3], W[2]], 1)], 0)
        tp1 = jnp.concatenate([jnp.concatenate([W[4], W[3]], 1),
                               jnp.concatenate([Zc,   W[4]], 1)], 0)
        wk = jnp.concatenate([tm1, t0, tp1], axis=0)   # (384, 2)
        return jnp.pad(wk, ((0, 0), (0, 126)))         # lane-dense output columns

    for i, layer in enumerate(params["final"]):
        cfg = layer["cfg"]
        last = (i == len(params["final"]) - 1)
        w_list.append(pack_poly_k5_out1(layer["w"]) if last else pack_poly_k3(layer["w"]))
        aff_rows.append(pack_affine(tuple(cfg["ops"]), layer["b"], layer["s"],
                                    layer["t"], tile2=True))
        plan.append(dict(cin=128, offsets=(-1, 0, 1),
                         act="tanh" if last else "relu",
                         post=False, len_out=L0, last=last))

    aff = jnp.stack(aff_rows)                          # (9, 4, 128)

    # margin feasibility: tie GP / TAIL / RC to the layer plan's tap reach
    max_back = max(-min(s["offsets"]) for s in plan)
    max_fwd = max(max(s["offsets"]) for s in plan)
    assert GP >= max_back and TAIL >= max_fwd
    assert RC >= max(s["len_out"] for s in plan)

    # ---- stage the input (two pads, no per-sample scatter) ---------------------
    x_flat = x_ncl[:, 0, :].astype(f32)                # (N, L0)
    x_slab = jnp.pad(x_flat, ((0, 0), (GP, RT - GP - L0)))[..., None]
    x_slab = jnp.pad(x_slab, ((0, 0), (0, 0), (0, 7)))  # (N, RT, 8)

    # ---- pallas_call: grid over batch ("parallel"), weights resident ----------
    kernel = _build_kernel(plan, len(w_list), GP, RC)
    in_specs = [pl.BlockSpec((1, RT, 8), lambda n: (n, 0, 0))]
    in_specs += [pl.BlockSpec(w.shape, lambda n: (0, 0)) for w in w_list]
    in_specs += [pl.BlockSpec(aff.shape, lambda n: (0, 0, 0))]

    out = pl.pallas_call(
        kernel,
        out_shape=jax.ShapeDtypeStruct((N, RC, 128), f32),
        grid=(N,),
        in_specs=in_specs,
        out_specs=pl.BlockSpec((1, RC, 128), lambda n: (n, 0, 0)),
        scratch_shapes=[pltpu.VMEM((RT, 128), f32)],
        compiler_params=pltpu.CompilerParams(
            dimension_semantics=("parallel",),
            vmem_limit_bytes=32 * 1024 * 1024),
    )(x_slab, *w_list, aff)

    # phase-split (even col 0, odd col 1) -> interleaved NCL output (glue)
    y = out[:, :L0, 0:2].reshape(N, 2 * L0)
    return y[:, None, :]


# ----------------------------------------------------------------------------
# Pure-JAX reference (spec-faithful, used for verification)
# ----------------------------------------------------------------------------
def _ref_conv1d(x, w, b, s, t, dilation, padding, ops):
    y = jax.lax.conv_general_dilated(
        x, w, window_strides=(1,), padding=[(padding, padding)],
        rhs_dilation=(dilation,), dimension_numbers=("NWC", "WIO", "NWC"))
    for op in ops:
        if op == "bias":
            y = y + b
        elif op == "bn":
            y = y * s + t
        elif op == "relu":
            y = jnp.maximum(y, 0.0)
        elif op == "tanh":
            y = jnp.tanh(y)
    return y


def simple_upsampler_reference(x_ncl, params):
    x = jnp.transpose(x_ncl, (0, 2, 1)).astype(jnp.float32)
    for layer in params["causal"]:
        cfg = layer["cfg"]
        x = _ref_conv1d(x, layer["w"], layer["b"], layer["s"], layer["t"],
                        cfg["dil"], cfg["pad"], cfg["ops"])
    # ConvTranspose1d(64, 64, 8, stride=2, padding=5) via zero-stuff + conv
    N, L, Cin = x.shape
    x_up = jnp.zeros((N, (L - 1) * 2 + 1, Cin), x.dtype).at[:, ::2, :].set(x)
    w_eq = jnp.transpose(params["up_w"][:, :, ::-1], (2, 0, 1))
    x = _ref_conv1d(x_up, w_eq, params["up_b"],
                    jnp.ones((64,)), jnp.zeros((64,)), 1, 2, ("bias", "relu"))
    for layer in params["final"]:
        cfg = layer["cfg"]
        x = _ref_conv1d(x, layer["w"], layer["b"], layer["s"], layer["t"],
                        cfg["dil"], cfg["pad"], cfg["ops"])
    return jnp.transpose(x, (0, 2, 1))


# ----------------------------------------------------------------------------
if __name__ == "__main__":
    root = jax.random.PRNGKey(0)
    k_params, k_x = jax.random.split(root)
    params = init_params(k_params)

    # PyTorch-style input: NCL with 1 channel -> (2, 1, 16)
    x = jax.random.normal(k_x, (2, 1, 16), jnp.float32)

    out = jax.block_until_ready(simple_upsampler_forward(x, params))
    assert out.shape == (2, 1, 32), out.shape

    ref = jax.block_until_ready(simple_upsampler_reference(x, params))
    max_err = float(jnp.max(jnp.abs(out - ref)))
    assert max_err < 1e-3, f"mismatch vs reference: {max_err}"

    print("KERNEL_OK")
</pallas_src>

<mosaic_0001>
module attributes {stable_mosaic.version = 11 : i64} {
  func.func @kernel(%arg0: i32, %arg1: memref<1x40x8xf32, #tpu.memory_space<vmem>>, %arg2: memref<24x128xf32, #tpu.memory_space<vmem>>, %arg3: memref<96x128xf32, #tpu.memory_space<vmem>>, %arg4: memref<192x128xf32, #tpu.memory_space<vmem>>, %arg5: memref<192x128xf32, #tpu.memory_space<vmem>>, %arg6: memref<320x128xf32, #tpu.memory_space<vmem>>, %arg7: memref<384x128xf32, #tpu.memory_space<vmem>>, %arg8: memref<384x128xf32, #tpu.memory_space<vmem>>, %arg9: memref<384x128xf32, #tpu.memory_space<vmem>>, %arg10: memref<384x128xf32, #tpu.memory_space<vmem>>, %arg11: memref<9x4x128xf32, #tpu.memory_space<vmem>>, %arg12: memref<1x24x128xf32, #tpu.memory_space<vmem>>, %arg13: memref<40x128xf32, #tpu.memory_space<vmem>>) attributes {dimension_semantics = [#tpu.dimension_semantics<parallel>], iteration_bounds = array<i64: 2>, scalar_prefetch = 0 : i64, scratch_operands = 1 : i64, tpu.core_type = #tpu.core_type<tc>, window_params = [{transform_indices = @transform_0, window_bounds = array<i64: 1, 40, 8>}, {pipeline_mode = #tpu.pipeline_mode<synchronous>, transform_indices = @transform_1, window_bounds = array<i64: 24, 128>}, {pipeline_mode = #tpu.pipeline_mode<synchronous>, transform_indices = @transform_2, window_bounds = array<i64: 96, 128>}, {pipeline_mode = #tpu.pipeline_mode<synchronous>, transform_indices = @transform_3, window_bounds = array<i64: 192, 128>}, {pipeline_mode = #tpu.pipeline_mode<synchronous>, transform_indices = @transform_4, window_bounds = array<i64: 192, 128>}, {pipeline_mode = #tpu.pipeline_mode<synchronous>, transform_indices = @transform_5, window_bounds = array<i64: 320, 128>}, {pipeline_mode = #tpu.pipeline_mode<synchronous>, transform_indices = @transform_6, window_bounds = array<i64: 384, 128>}, {pipeline_mode = #tpu.pipeline_mode<synchronous>, transform_indices = @transform_7, window_bounds = array<i64: 384, 128>}, {pipeline_mode = #tpu.pipeline_mode<synchronous>, transform_indices = @transform_8, window_bounds = array<i64: 384, 128>}, {pipeline_mode = #tpu.pipeline_mode<synchronous>, transform_indices = @transform_9, window_bounds = array<i64: 384, 128>}, {pipeline_mode = #tpu.pipeline_mode<synchronous>, transform_indices = @transform_10, window_bounds = array<i64: 9, 4, 128>}, {transform_indices = @transform_11, window_bounds = array<i64: 1, 24, 128>}]} {
    %cst = arith.constant 0.000000e+00 : f32
    %0 = vector.broadcast %cst : f32 to vector<40x128xf32>
    %c0 = arith.constant 0 : index
    %c0_0 = arith.constant 0 : index
    %1 = vector.load %arg13[%c0, %c0_0] : memref<40x128xf32, #tpu.memory_space<vmem>>, vector<40x128xf32>
    tpu.vector_store %arg13[%c0, %c0_0], %0 {strides = array<i32>} : memref<40x128xf32, #tpu.memory_space<vmem>>, vector<40x128xf32>,
    %2 = tpu.iota {dimensions = array<i32: 0>} : vector<24x1xi32>
    %c0_1 = arith.constant 0 : index
    %c0_2 = arith.constant 0 : index
    %c0_3 = arith.constant 0 : index
    %3 = vector.load %arg1[%c0_1, %c0_2, %c0_3] : memref<1x40x8xf32, #tpu.memory_space<vmem>>, vector<1x40x8xf32>
    %4 = vector.shape_cast %3 : vector<1x40x8xf32> to vector<40x8xf32>
    %5 = vector.extract_strided_slice %4 {offsets = [7, 0], sizes = [24, 8], strides = [1, 1]} : vector<40x8xf32> to vector<24x8xf32>
    %6 = vector.extract_strided_slice %4 {offsets = [8, 0], sizes = [24, 8], strides = [1, 1]} : vector<40x8xf32> to vector<24x8xf32>
    %7 = vector.extract_strided_slice %4 {offsets = [9, 0], sizes = [24, 8], strides = [1, 1]} : vector<40x8xf32> to vector<24x8xf32>
    %8 = tpu.concatenate %5, %6, %7 in 1 : vector<24x8xf32>, vector<24x8xf32>, vector<24x8xf32> -> vector<24x24xf32>
    %c0_4 = arith.constant 0 : index
    %c0_5 = arith.constant 0 : index
    %9 = vector.load %arg2[%c0_4, %c0_5] : memref<24x128xf32, #tpu.memory_space<vmem>>, vector<24x128xf32>
    %cst_6 = arith.constant dense<0.000000e+00> : vector<24x128xf32>
    %10 = tpu.matmul %8, %9, %cst_6 {dimension_numbers = #tpu.dot_dimension_numbers<[1], [0], [0], [1], [0, 0, 1, 1], [], []>} : vector<24x24xf32>, vector<24x128xf32>, vector<24x128xf32> -> vector<24x128xf32>
    %c0_7 = arith.constant 0 : index
    %c0_8 = arith.constant 0 : index
    %c0_9 = arith.constant 0 : index
    %11 = vector.load %arg11[%c0_7, %c0_8, %c0_9] : memref<9x4x128xf32, #tpu.memory_space<vmem>>, vector<1x1x128xf32>
    %12 = vector.shape_cast %11 : vector<1x1x128xf32> to vector<1x128xf32>
    %13 = vector.broadcast %12 : vector<1x128xf32> to vector<24x128xf32>
    %14 = arith.mulf %10, %13 : vector<24x128xf32>
    %c0_10 = arith.constant 0 : index
    %c1 = arith.constant 1 : index
    %c0_11 = arith.constant 0 : index
    %15 = vector.load %arg11[%c0_10, %c1, %c0_11] : memref<9x4x128xf32, #tpu.memory_space<vmem>>, vector<1x1x128xf32>
    %16 = vector.shape_cast %15 : vector<1x1x128xf32> to vector<1x128xf32>
    %17 = vector.broadcast %16 : vector<1x128xf32> to vector<24x128xf32>
    %18 = arith.addf %14, %17 : vector<24x128xf32>
    %cst_12 = arith.constant 0.000000e+00 : f32
    %19 = vector.broadcast %cst_12 : f32 to vector<24x128xf32>
    %20 = arith.maximumf %18, %19 : vector<24x128xf32>
    %c16_i32 = arith.constant 16 : i32
    %21 = vector.broadcast %c16_i32 : i32 to vector<24x1xi32>
    %22 = arith.cmpi slt, %2, %21 : vector<24x1xi32>
    %23 = arith.extui %22 : vector<24x1xi1> to vector<24x1xi32>
    %24 = arith.sitofp %23 : vector<24x1xi32> to vector<24x1xf32>
    %25 = vector.broadcast %24 : vector<24x1xf32> to vector<24x128xf32>
    %26 = arith.mulf %20, %25 : vector<24x128xf32>
    %c8 = arith.constant 8 : index
    %c0_13 = arith.constant 0 : index
    %27 = vector.load %arg13[%c8, %c0_13] : memref<40x128xf32, #tpu.memory_space<vmem>>, vector<24x128xf32>
    tpu.vector_store %arg13[%c8, %c0_13], %26 {strides = array<i32>} : memref<40x128xf32, #tpu.memory_space<vmem>>, vector<24x128xf32>,
    %c7 = arith.constant 7 : index
    %c0_14 = arith.constant 0 : index
    %28 = vector.load %arg13[%c7, %c0_14] : memref<40x128xf32, #tpu.memory_space<vmem>>, vector<24x32xf32>
    %c8_15 = arith.constant 8 : index
    %c0_16 = arith.constant 0 : index
    %29 = vector.load %arg13[%c8_15, %c0_16] : memref<40x128xf32, #tpu.memory_space<vmem>>, vector<24x32xf32>
    %c9 = arith.constant 9 : index
    %c0_17 = arith.constant 0 : index
    %30 = vector.load %arg13[%c9, %c0_17] : memref<40x128xf32, #tpu.memory_space<vmem>>, vector<24x32xf32>
    %31 = tpu.concatenate %28, %29, %30 in 1 : vector<24x32xf32>, vector<24x32xf32>, vector<24x32xf32> -> vector<24x96xf32>
    %c0_18 = arith.constant 0 : index
    %c0_19 = arith.constant 0 : index
    %32 = vector.load %arg3[%c0_18, %c0_19] : memref<96x128xf32, #tpu.memory_space<vmem>>, vector<96x128xf32>
    %cst_20 = arith.constant dense<0.000000e+00> : vector<24x128xf32>
    %33 = tpu.matmul %31, %32, %cst_20 {dimension_numbers = #tpu.dot_dimension_numbers<[1], [0], [0], [1], [0, 0, 1, 1], [], []>} : vector<24x96xf32>, vector<96x128xf32>, vector<24x128xf32> -> vector<24x128xf32>
    %c1_21 = arith.constant 1 : index
    %c0_22 = arith.constant 0 : index
    %c0_23 = arith.constant 0 : index
    %34 = vector.load %arg11[%c1_21, %c0_22, %c0_23] : memref<9x4x128xf32, #tpu.memory_space<vmem>>, vector<1x1x128xf32>
    %35 = vector.shape_cast %34 : vector<1x1x128xf32> to vector<1x128xf32>
    %36 = vector.broadcast %35 : vector<1x128xf32> to vector<24x128xf32>
    %37 = arith.mulf %33, %36 : vector<24x128xf32>
    %c1_24 = arith.constant 1 : index
    %c1_25 = arith.constant 1 : index
    %c0_26 = arith.constant 0 : index
    %38 = vector.load %arg11[%c1_24, %c1_25, %c0_26] : memref<9x4x128xf32, #tpu.memory_space<vmem>>, vector<1x1x128xf32>
    %39 = vector.shape_cast %38 : vector<1x1x128xf32> to vector<1x128xf32>
    %40 = vector.broadcast %39 : vector<1x128xf32> to vector<24x128xf32>
    %41 = arith.addf %37, %40 : vector<24x128xf32>
    %cst_27 = arith.constant 0.000000e+00 : f32
    %42 = vector.broadcast %cst_27 : f32 to vector<24x128xf32>
    %43 = arith.maximumf %41, %42 : vector<24x128xf32>
    %44 = vector.broadcast %24 : vector<24x1xf32> to vector<24x128xf32>
    %45 = arith.mulf %43, %44 : vector<24x128xf32>
    %c8_28 = arith.constant 8 : index
    %c0_29 = arith.constant 0 : index
    %46 = vector.load %arg13[%c8_28, %c0_29] : memref<40x128xf32, #tpu.memory_space<vmem>>, vector<24x128xf32>
    tpu.vector_store %arg13[%c8_28, %c0_29], %45 {strides = array<i32>} : memref<40x128xf32, #tpu.memory_space<vmem>>, vector<24x128xf32>,
    %c7_30 = arith.constant 7 : index
    %c0_31 = arith.constant 0 : index
    %47 = vector.load %arg13[%c7_30, %c0_31] : memref<40x128xf32, #tpu.memory_space<vmem>>, vector<24x64xf32>
    %c8_32 = arith.constant 8 : index
    %c0_33 = arith.constant 0 : index
    %48 = vector.load %arg13[%c8_32, %c0_33] : memref<40x128xf32, #tpu.memory_space<vmem>>, vector<24x64xf32>
    %c9_34 = arith.constant 9 : index
    %c0_35 = arith.constant 0 : index
    %49 = vector.load %arg13[%c9_34, %c0_35] : memref<40x128xf32, #tpu.memory_space<vmem>>, vector<24x64xf32>
    %50 = tpu.concatenate %47, %48, %49 in 1 : vector<24x64xf32>, vector<24x64xf32>, vector<24x64xf32> -> vector<24x192xf32>
    %c0_36 = arith.constant 0 : index
    %c0_37 = arith.constant 0 : index
    %51 = vector.load %arg4[%c0_36, %c0_37] : memref<192x128xf32, #tpu.memory_space<vmem>>, vector<192x128xf32>
    %cst_38 = arith.constant dense<0.000000e+00> : vector<24x128xf32>
    %52 = tpu.matmul %50, %51, %cst_38 {dimension_numbers = #tpu.dot_dimension_numbers<[1], [0], [0], [1], [0, 0, 1, 1], [], []>} : vector<24x192xf32>, vector<192x128xf32>, vector<24x128xf32> -> vector<24x128xf32>
    %c2 = arith.constant 2 : index
    %c0_39 = arith.constant 0 : index
    %c0_40 = arith.constant 0 : index
    %53 = vector.load %arg11[%c2, %c0_39, %c0_40] : memref<9x4x128xf32, #tpu.memory_space<vmem>>, vector<1x1x128xf32>
    %54 = vector.shape_cast %53 : vector<1x1x128xf32> to vector<1x128xf32>
    %55 = vector.broadcast %54 : vector<1x128xf32> to vector<24x128xf32>
    %56 = arith.mulf %52, %55 : vector<24x128xf32>
    %c2_41 = arith.constant 2 : index
    %c1_42 = arith.constant 1 : index
    %c0_43 = arith.constant 0 : index
    %57 = vector.load %arg11[%c2_41, %c1_42, %c0_43] : memref<9x4x128xf32, #tpu.memory_space<vmem>>, vector<1x1x128xf32>
    %58 = vector.shape_cast %57 : vector<1x1x128xf32> to vector<1x128xf32>
    %59 = vector.broadcast %58 : vector<1x128xf32> to vector<24x128xf32>
    %60 = arith.addf %56, %59 : vector<24x128xf32>
    %cst_44 = arith.constant 0.000000e+00 : f32
    %61 = vector.broadcast %cst_44 : f32 to vector<24x128xf32>
    %62 = arith.maximumf %60, %61 : vector<24x128xf32>
    %c2_45 = arith.constant 2 : index
    %c2_46 = arith.constant 2 : index
    %c0_47 = arith.constant 0 : index
    %63 = vector.load %arg11[%c2_45, %c2_46, %c0_47] : memref<9x4x128xf32, #tpu.memory_space<vmem>>, vector<1x1x128xf32>
    %64 = vector.shape_cast %63 : vector<1x1x128xf32> to vector<1x128xf32>
    %65 = vector.broadcast %64 : vector<1x128xf32> to vector<24x128xf32>
    %66 = arith.mulf %62, %65 : vector<24x128xf32>
    %c2_48 = arith.constant 2 : index
    %c3 = arith.constant 3 : index
    %c0_49 = arith.constant 0 : index
    %67 = vector.load %arg11[%c2_48, %c3, %c0_49] : memref<9x4x128xf32, #tpu.memory_space<vmem>>, vector<1x1x128xf32>
    %68 = vector.shape_cast %67 : vector<1x1x128xf32> to vector<1x128xf32>
    %69 = vector.broadcast %68 : vector<1x128xf32> to vector<24x128xf32>
    %70 = arith.addf %66, %69 : vector<24x128xf32>
    %71 = vector.broadcast %24 : vector<24x1xf32> to vector<24x128xf32>
    %72 = arith.mulf %70, %71 : vector<24x128xf32>
    %c8_50 = arith.constant 8 : index
    %c0_51 = arith.constant 0 : index
    %73 = vector.load %arg13[%c8_50, %c0_51] : memref<40x128xf32, #tpu.memory_space<vmem>>, vector<24x128xf32>
    tpu.vector_store %arg13[%c8_50, %c0_51], %72 {strides = array<i32>} : memref<40x128xf32, #tpu.memory_space<vmem>>, vector<24x128xf32>,
    %c5 = arith.constant 5 : index
    %c0_52 = arith.constant 0 : index
    %74 = vector.load %arg13[%c5, %c0_52] : memref<40x128xf32, #tpu.memory_space<vmem>>, vector<24x64xf32>
    %c7_53 = arith.constant 7 : index
    %c0_54 = arith.constant 0 : index
    %75 = vector.load %arg13[%c7_53, %c0_54] : memref<40x128xf32, #tpu.memory_space<vmem>>, vector<24x64xf32>
    %c9_55 = arith.constant 9 : index
    %c0_56 = arith.constant 0 : index
    %76 = vector.load %arg13[%c9_55, %c0_56] : memref<40x128xf32, #tpu.memory_space<vmem>>, vector<24x64xf32>
    %77 = tpu.concatenate %74, %75, %76 in 1 : vector<24x64xf32>, vector<24x64xf32>, vector<24x64xf32> -> vector<24x192xf32>
    %c0_57 = arith.constant 0 : index
    %c0_58 = arith.constant 0 : index
    %78 = vector.load %arg5[%c0_57, %c0_58] : memref<192x128xf32, #tpu.memory_space<vmem>>, vector<192x128xf32>
    %cst_59 = arith.constant dense<0.000000e+00> : vector<24x128xf32>
    %79 = tpu.matmul %77, %78, %cst_59 {dimension_numbers = #tpu.dot_dimension_numbers<[1], [0], [0], [1], [0, 0, 1, 1], [], []>} : vector<24x192xf32>, vector<192x128xf32>, vector<24x128xf32> -> vector<24x128xf32>
    %c3_60 = arith.constant 3 : index
    %c0_61 = arith.constant 0 : index
    %c0_62 = arith.constant 0 : index
    %80 = vector.load %arg11[%c3_60, %c0_61, %c0_62] : memref<9x4x128xf32, #tpu.memory_space<vmem>>, vector<1x1x128xf32>
    %81 = vector.shape_cast %80 : vector<1x1x128xf32> to vector<1x128xf32>
    %82 = vector.broadcast %81 : vector<1x128xf32> to vector<24x128xf32>
    %83 = arith.mulf %79, %82 : vector<24x128xf32>
    %c3_63 = arith.constant 3 : index
    %c1_64 = arith.constant 1 : index
    %c0_65 = arith.constant 0 : index
    %84 = vector.load %arg11[%c3_63, %c1_64, %c0_65] : memref<9x4x128xf32, #tpu.memory_space<vmem>>, vector<1x1x128xf32>
    %85 = vector.shape_cast %84 : vector<1x1x128xf32> to vector<1x128xf32>
    %86 = vector.broadcast %85 : vector<1x128xf32> to vector<24x128xf32>
    %87 = arith.addf %83, %86 : vector<24x128xf32>
    %cst_66 = arith.constant 0.000000e+00 : f32
    %88 = vector.broadcast %cst_66 : f32 to vector<24x128xf32>
    %89 = arith.maximumf %87, %88 : vector<24x128xf32>
    %c18_i32 = arith.constant 18 : i32
    %90 = vector.broadcast %c18_i32 : i32 to vector<24x1xi32>
    %91 = arith.cmpi slt, %2, %90 : vector<24x1xi32>
    %92 = arith.extui %91 : vector<24x1xi1> to vector<24x1xi32>
    %93 = arith.sitofp %92 : vector<24x1xi32> to vector<24x1xf32>
    %94 = vector.broadcast %93 : vector<24x1xf32> to vector<24x128xf32>
    %95 = arith.mulf %89, %94 : vector<24x128xf32>
    %c8_67 = arith.constant 8 : index
    %c0_68 = arith.constant 0 : index
    %96 = vector.load %arg13[%c8_67, %c0_68] : memref<40x128xf32, #tpu.memory_space<vmem>>, vector<24x128xf32>
    tpu.vector_store %arg13[%c8_67, %c0_68], %95 {strides = array<i32>} : memref<40x128xf32, #tpu.memory_space<vmem>>, vector<24x128xf32>,
    %c7_69 = arith.constant 7 : index
    %c0_70 = arith.constant 0 : index
    %97 = vector.load %arg13[%c7_69, %c0_70] : memref<40x128xf32, #tpu.memory_space<vmem>>, vector<24x64xf32>
    %c8_71 = arith.constant 8 : index
    %c0_72 = arith.constant 0 : index
    %98 = vector.load %arg13[%c8_71, %c0_72] : memref<40x128xf32, #tpu.memory_space<vmem>>, vector<24x64xf32>
    %c9_73 = arith.constant 9 : index
    %c0_74 = arith.constant 0 : index
    %99 = vector.load %arg13[%c9_73, %c0_74] : memref<40x128xf32, #tpu.memory_space<vmem>>, vector<24x64xf32>
    %c10 = arith.constant 10 : index
    %c0_75 = arith.constant 0 : index
    %100 = vector.load %arg13[%c10, %c0_75] : memref<40x128xf32, #tpu.memory_space<vmem>>, vector<24x64xf32>
    %c11 = arith.constant 11 : index
    %c0_76 = arith.constant 0 : index
    %101 = vector.load %arg13[%c11, %c0_76] : memref<40x128xf32, #tpu.memory_space<vmem>>, vector<24x64xf32>
    %102 = tpu.concatenate %97, %98, %99, %100, %101 in 1 : vector<24x64xf32>, vector<24x64xf32>, vector<24x64xf32>, vector<24x64xf32>, vector<24x64xf32> -> vector<24x320xf32>
    %c0_77 = arith.constant 0 : index
    %c0_78 = arith.constant 0 : index
    %103 = vector.load %arg6[%c0_77, %c0_78] : memref<320x128xf32, #tpu.memory_space<vmem>>, vector<320x128xf32>
    %cst_79 = arith.constant dense<0.000000e+00> : vector<24x128xf32>
    %104 = tpu.matmul %102, %103, %cst_79 {dimension_numbers = #tpu.dot_dimension_numbers<[1], [0], [0], [1], [0, 0, 1, 1], [], []>} : vector<24x320xf32>, vector<320x128xf32>, vector<24x128xf32> -> vector<24x128xf32>
    %c4 = arith.constant 4 : index
    %c0_80 = arith.constant 0 : index
    %c0_81 = arith.constant 0 : index
    %105 = vector.load %arg11[%c4, %c0_80, %c0_81] : memref<9x4x128xf32, #tpu.memory_space<vmem>>, vector<1x1x128xf32>
    %106 = vector.shape_cast %105 : vector<1x1x128xf32> to vector<1x128xf32>
    %107 = vector.broadcast %106 : vector<1x128xf32> to vector<24x128xf32>
    %108 = arith.mulf %104, %107 : vector<24x128xf32>
    %c4_82 = arith.constant 4 : index
    %c1_83 = arith.constant 1 : index
    %c0_84 = arith.constant 0 : index
    %109 = vector.load %arg11[%c4_82, %c1_83, %c0_84] : memref<9x4x128xf32, #tpu.memory_space<vmem>>, vector<1x1x128xf32>
    %110 = vector.shape_cast %109 : vector<1x1x128xf32> to vector<1x128xf32>
    %111 = vector.broadcast %110 : vector<1x128xf32> to vector<24x128xf32>
    %112 = arith.addf %108, %111 : vector<24x128xf32>
    %cst_85 = arith.constant 0.000000e+00 : f32
    %113 = vector.broadcast %cst_85 : f32 to vector<24x128xf32>
    %114 = arith.maximumf %112, %113 : vector<24x128xf32>
    %115 = vector.broadcast %24 : vector<24x1xf32> to vector<24x128xf32>
    %116 = arith.mulf %114, %115 : vector<24x128xf32>
    %c8_86 = arith.constant 8 : index
    %c0_87 = arith.constant 0 : index
    %117 = vector.load %arg13[%c8_86, %c0_87] : memref<40x128xf32, #tpu.memory_space<vmem>>, vector<24x128xf32>
    tpu.vector_store %arg13[%c8_86, %c0_87], %116 {strides = array<i32>} : memref<40x128xf32, #tpu.memory_space<vmem>>, vector<24x128xf32>,
    %c7_88 = arith.constant 7 : index
    %c0_89 = arith.constant 0 : index
    %118 = vector.load %arg13[%c7_88, %c0_89] : memref<40x128xf32, #tpu.memory_space<vmem>>, vector<24x128xf32>
    %c8_90 = arith.constant 8 : index
    %c0_91 = arith.constant 0 : index
    %119 = vector.load %arg13[%c8_90, %c0_91] : memref<40x128xf32, #tpu.memory_space<vmem>>, vector<24x128xf32>
    %c9_92 = arith.constant 9 : index
    %c0_93 = arith.constant 0 : index
    %120 = vector.load %arg13[%c9_92, %c0_93] : memref<40x128xf32, #tpu.memory_space<vmem>>, vector<24x128xf32>
    %121 = tpu.concatenate %118, %119, %120 in 1 : vector<24x128xf32>, vector<24x128xf32>, vector<24x128xf32> -> vector<24x384xf32>
    %c0_94 = arith.constant 0 : index
    %c0_95 = arith.constant 0 : index
    %122 = vector.load %arg7[%c0_94, %c0_95] : memref<384x128xf32, #tpu.memory_space<vmem>>, vector<384x128xf32>
    %cst_96 = arith.constant dense<0.000000e+00> : vector<24x128xf32>
    %123 = tpu.matmul %121, %122, %cst_96 {dimension_numbers = #tpu.dot_dimension_numbers<[1], [0], [0], [1], [0, 0, 1, 1], [], []>} : vector<24x384xf32>, vector<384x128xf32>, vector<24x128xf32> -> vector<24x128xf32>
    %c5_97 = arith.constant 5 : index
    %c0_98 = arith.constant 0 : index
    %c0_99 = arith.constant 0 : index
    %124 = vector.load %arg11[%c5_97, %c0_98, %c0_99] : memref<9x4x128xf32, #tpu.memory_space<vmem>>, vector<1x1x128xf32>
    %125 = vector.shape_cast %124 : vector<1x1x128xf32> to vector<1x128xf32>
    %126 = vector.broadcast %125 : vector<1x128xf32> to vector<24x128xf32>
    %127 = arith.mulf %123, %126 : vector<24x128xf32>
    %c5_100 = arith.constant 5 : index
    %c1_101 = arith.constant 1 : index
    %c0_102 = arith.constant 0 : index
    %128 = vector.load %arg11[%c5_100, %c1_101, %c0_102] : memref<9x4x128xf32, #tpu.memory_space<vmem>>, vector<1x1x128xf32>
    %129 = vector.shape_cast %128 : vector<1x1x128xf32> to vector<1x128xf32>
    %130 = vector.broadcast %129 : vector<1x128xf32> to vector<24x128xf32>
    %131 = arith.addf %127, %130 : vector<24x128xf32>
    %cst_103 = arith.constant 0.000000e+00 : f32
    %132 = vector.broadcast %cst_103 : f32 to vector<24x128xf32>
    %133 = arith.maximumf %131, %132 : vector<24x128xf32>
    %134 = vector.broadcast %24 : vector<24x1xf32> to vector<24x128xf32>
    %135 = arith.mulf %133, %134 : vector<24x128xf32>
    %c8_104 = arith.constant 8 : index
    %c0_105 = arith.constant 0 : index
    %136 = vector.load %arg13[%c8_104, %c0_105] : memref<40x128xf32, #tpu.memory_space<vmem>>, vector<24x128xf32>
    tpu.vector_store %arg13[%c8_104, %c0_105], %135 {strides = array<i32>} : memref<40x128xf32, #tpu.memory_space<vmem>>, vector<24x128xf32>,
    %c7_106 = arith.constant 7 : index
    %c0_107 = arith.constant 0 : index
    %137 = vector.load %arg13[%c7_106, %c0_107] : memref<40x128xf32, #tpu.memory_space<vmem>>, vector<24x128xf32>
    %c8_108 = arith.constant 8 : index
    %c0_109 = arith.constant 0 : index
    %138 = vector.load %arg13[%c8_108, %c0_109] : memref<40x128xf32, #tpu.memory_space<vmem>>, vector<24x128xf32>
    %c9_110 = arith.constant 9 : index
    %c0_111 = arith.constant 0 : index
    %139 = vector.load %arg13[%c9_110, %c0_111] : memref<40x128xf32, #tpu.memory_space<vmem>>, vector<24x128xf32>
    %140 = tpu.concatenate %137, %138, %139 in 1 : vector<24x128xf32>, vector<24x128xf32>, vector<24x128xf32> -> vector<24x384xf32>
    %c0_112 = arith.constant 0 : index
    %c0_113 = arith.constant 0 : index
    %141 = vector.load %arg8[%c0_112, %c0_113] : memref<384x128xf32, #tpu.memory_space<vmem>>, vector<384x128xf32>
    %cst_114 = arith.constant dense<0.000000e+00> : vector<24x128xf32>
    %142 = tpu.matmul %140, %141, %cst_114 {dimension_numbers = #tpu.dot_dimension_numbers<[1], [0], [0], [1], [0, 0, 1, 1], [], []>} : vector<24x384xf32>, vector<384x128xf32>, vector<24x128xf32> -> vector<24x128xf32>
    %c6 = arith.constant 6 : index
    %c0_115 = arith.constant 0 : index
    %c0_116 = arith.constant 0 : index
    %143 = vector.load %arg11[%c6, %c0_115, %c0_116] : memref<9x4x128xf32, #tpu.memory_space<vmem>>, vector<1x1x128xf32>
    %144 = vector.shape_cast %143 : vector<1x1x128xf32> to vector<1x128xf32>
    %145 = vector.broadcast %144 : vector<1x128xf32> to vector<24x128xf32>
    %146 = arith.mulf %142, %145 : vector<24x128xf32>
    %c6_117 = arith.constant 6 : index
    %c1_118 = arith.constant 1 : index
    %c0_119 = arith.constant 0 : index
    %147 = vector.load %arg11[%c6_117, %c1_118, %c0_119] : memref<9x4x128xf32, #tpu.memory_space<vmem>>, vector<1x1x128xf32>
    %148 = vector.shape_cast %147 : vector<1x1x128xf32> to vector<1x128xf32>
    %149 = vector.broadcast %148 : vector<1x128xf32> to vector<24x128xf32>
    %150 = arith.addf %146, %149 : vector<24x128xf32>
    %cst_120 = arith.constant 0.000000e+00 : f32
    %151 = vector.broadcast %cst_120 : f32 to vector<24x128xf32>
    %152 = arith.maximumf %150, %151 : vector<24x128xf32>
    %153 = vector.broadcast %24 : vector<24x1xf32> to vector<24x128xf32>
    %154 = arith.mulf %152, %153 : vector<24x128xf32>
    %c8_121 = arith.constant 8 : index
    %c0_122 = arith.constant 0 : index
    %155 = vector.load %arg13[%c8_121, %c0_122] : memref<40x128xf32, #tpu.memory_space<vmem>>, vector<24x128xf32>
    tpu.vector_store %arg13[%c8_121, %c0_122], %154 {strides = array<i32>} : memref<40x128xf32, #tpu.memory_space<vmem>>, vector<24x128xf32>,
    %c7_123 = arith.constant 7 : index
    %c0_124 = arith.constant 0 : index
    %156 = vector.load %arg13[%c7_123, %c0_124] : memref<40x128xf32, #tpu.memory_space<vmem>>, vector<24x128xf32>
    %c8_125 = arith.constant 8 : index
    %c0_126 = arith.constant 0 : index
    %157 = vector.load %arg13[%c8_125, %c0_126] : memref<40x128xf32, #tpu.memory_space<vmem>>, vector<24x128xf32>
    %c9_127 = arith.constant 9 : index
    %c0_128 = arith.constant 0 : index
    %158 = vector.load %arg13[%c9_127, %c0_128] : memref<40x128xf32, #tpu.memory_space<vmem>>, vector<24x128xf32>
    %159 = tpu.concatenate %156, %157, %158 in 1 : vector<24x128xf32>, vector<24x128xf32>, vector<24x128xf32> -> vector<24x384xf32>
    %c0_129 = arith.constant 0 : index
    %c0_130 = arith.constant 0 : index
    %160 = vector.load %arg9[%c0_129, %c0_130] : memref<384x128xf32, #tpu.memory_space<vmem>>, vector<384x128xf32>
    %cst_131 = arith.constant dense<0.000000e+00> : vector<24x128xf32>
    %161 = tpu.matmul %159, %160, %cst_131 {dimension_numbers = #tpu.dot_dimension_numbers<[1], [0], [0], [1], [0, 0, 1, 1], [], []>} : vector<24x384xf32>, vector<384x128xf32>, vector<24x128xf32> -> vector<24x128xf32>
    %c7_132 = arith.constant 7 : index
    %c0_133 = arith.constant 0 : index
    %c0_134 = arith.constant 0 : index
    %162 = vector.load %arg11[%c7_132, %c0_133, %c0_134] : memref<9x4x128xf32, #tpu.memory_space<vmem>>, vector<1x1x128xf32>
    %163 = vector.shape_cast %162 : vector<1x1x128xf32> to vector<1x128xf32>
    %164 = vector.broadcast %163 : vector<1x128xf32> to vector<24x128xf32>
    %165 = arith.mulf %161, %164 : vector<24x128xf32>
    %c7_135 = arith.constant 7 : index
    %c1_136 = arith.constant 1 : index
    %c0_137 = arith.constant 0 : index
    %166 = vector.load %arg11[%c7_135, %c1_136, %c0_137] : memref<9x4x128xf32, #tpu.memory_space<vmem>>, vector<1x1x128xf32>
    %167 = vector.shape_cast %166 : vector<1x1x128xf32> to vector<1x128xf32>
    %168 = vector.broadcast %167 : vector<1x128xf32> to vector<24x128xf32>
    %169 = arith.addf %165, %168 : vector<24x128xf32>
    %cst_138 = arith.constant 0.000000e+00 : f32
    %170 = vector.broadcast %cst_138 : f32 to vector<24x128xf32>
    %171 = arith.maximumf %169, %170 : vector<24x128xf32>
    %172 = vector.broadcast %24 : vector<24x1xf32> to vector<24x128xf32>
    %173 = arith.mulf %171, %172 : vector<24x128xf32>
    %c8_139 = arith.constant 8 : index
    %c0_140 = arith.constant 0 : index
    %174 = vector.load %arg13[%c8_139, %c0_140] : memref<40x128xf32, #tpu.memory_space<vmem>>, vector<24x128xf32>
    tpu.vector_store %arg13[%c8_139, %c0_140], %173 {strides = array<i32>} : memref<40x128xf32, #tpu.memory_space<vmem>>, vector<24x128xf32>,
    %c7_141 = arith.constant 7 : index
    %c0_142 = arith.constant 0 : index
    %175 = vector.load %arg13[%c7_141, %c0_142] : memref<40x128xf32, #tpu.memory_space<vmem>>, vector<24x128xf32>
    %c8_143 = arith.constant 8 : index
    %c0_144 = arith.constant 0 : index
    %176 = vector.load %arg13[%c8_143, %c0_144] : memref<40x128xf32, #tpu.memory_space<vmem>>, vector<24x128xf32>
    %c9_145 = arith.constant 9 : index
    %c0_146 = arith.constant 0 : index
    %177 = vector.load %arg13[%c9_145, %c0_146] : memref<40x128xf32, #tpu.memory_space<vmem>>, vector<24x128xf32>
    %178 = tpu.concatenate %175, %176, %177 in 1 : vector<24x128xf32>, vector<24x128xf32>, vector<24x128xf32> -> vector<24x384xf32>
    %c0_147 = arith.constant 0 : index
    %c0_148 = arith.constant 0 : index
    %179 = vector.load %arg10[%c0_147, %c0_148] : memref<384x128xf32, #tpu.memory_space<vmem>>, vector<384x128xf32>
    %cst_149 = arith.constant dense<0.000000e+00> : vector<24x128xf32>
    %180 = tpu.matmul %178, %179, %cst_149 {dimension_numbers = #tpu.dot_dimension_numbers<[1], [0], [0], [1], [0, 0, 1, 1], [], []>} : vector<24x384xf32>, vector<384x128xf32>, vector<24x128xf32> -> vector<24x128xf32>
    %c8_150 = arith.constant 8 : index
    %c0_151 = arith.constant 0 : index
    %c0_152 = arith.constant 0 : index
    %181 = vector.load %arg11[%c8_150, %c0_151, %c0_152] : memref<9x4x128xf32, #tpu.memory_space<vmem>>, vector<1x1x128xf32>
    %182 = vector.shape_cast %181 : vector<1x1x128xf32> to vector<1x128xf32>
    %183 = vector.broadcast %182 : vector<1x128xf32> to vector<24x128xf32>
    %184 = arith.mulf %180, %183 : vector<24x128xf32>
    %c8_153 = arith.constant 8 : index
    %c1_154 = arith.constant 1 : index
    %c0_155 = arith.constant 0 : index
    %185 = vector.load %arg11[%c8_153, %c1_154, %c0_155] : memref<9x4x128xf32, #tpu.memory_space<vmem>>, vector<1x1x128xf32>
    %186 = vector.shape_cast %185 : vector<1x1x128xf32> to vector<1x128xf32>
    %187 = vector.broadcast %186 : vector<1x128xf32> to vector<24x128xf32>
    %188 = arith.addf %184, %187 : vector<24x128xf32>
    %189 = math.tanh %188 : vector<24x128xf32>
    %190 = vector.broadcast %24 : vector<24x1xf32> to vector<24x128xf32>
    %191 = arith.mulf %189, %190 : vector<24x128xf32>
    %c0_156 = arith.constant 0 : index
    %c0_157 = arith.constant 0 : index
    %c0_158 = arith.constant 0 : index
    %192 = vector.load %arg12[%c0_156, %c0_157, %c0_158] : memref<1x24x128xf32, #tpu.memory_space<vmem>>, vector<1x24x128xf32>
    %193 = vector.shape_cast %192 : vector<1x24x128xf32> to vector<24x128xf32>
    %194 = vector.shape_cast %191 : vector<24x128xf32> to vector<1x24x128xf32>
    tpu.vector_store %arg12[%c0_156, %c0_157, %c0_158], %194 {strides = array<i32>} : memref<1x24x128xf32, #tpu.memory_space<vmem>>, vector<1x24x128xf32>,
    return
  }
  func.func @transform_0(%arg0: i32) -> (i32, i32, i32) {
    %c0_i32 = arith.constant 0 : i32
    %c0_i32_0 = arith.constant 0 : i32
    %c0_i32_1 = arith.constant 0 : i32
    return %arg0, %c0_i32, %c0_i32_0 : i32, i32, i32
  }
  func.func @transform_1(%arg0: i32) -> (i32, i32) {
    %c0_i32 = arith.constant 0 : i32
    %c0_i32_0 = arith.constant 0 : i32
    %c0_i32_1 = arith.constant 0 : i32
    return %c0_i32, %c0_i32_0 : i32, i32
  }
  func.func @transform_2(%arg0: i32) -> (i32, i32) {
    %c0_i32 = arith.constant 0 : i32
    %c0_i32_0 = arith.constant 0 : i32
    %c0_i32_1 = arith.constant 0 : i32
    return %c0_i32, %c0_i32_0 : i32, i32
  }
  func.func @transform_3(%arg0: i32) -> (i32, i32) {
    %c0_i32 = arith.constant 0 : i32
    %c0_i32_0 = arith.constant 0 : i32
    %c0_i32_1 = arith.constant 0 : i32
    return %c0_i32, %c0_i32_0 : i32, i32
  }
  func.func @transform_4(%arg0: i32) -> (i32, i32) {
    %c0_i32 = arith.constant 0 : i32
    %c0_i32_0 = arith.constant 0 : i32
    %c0_i32_1 = arith.constant 0 : i32
    return %c0_i32, %c0_i32_0 : i32, i32
  }
  func.func @transform_5(%arg0: i32) -> (i32, i32) {
    %c0_i32 = arith.constant 0 : i32
    %c0_i32_0 = arith.constant 0 : i32
    %c0_i32_1 = arith.constant 0 : i32
    return %c0_i32, %c0_i32_0 : i32, i32
  }
  func.func @transform_6(%arg0: i32) -> (i32, i32) {
    %c0_i32 = arith.constant 0 : i32
    %c0_i32_0 = arith.constant 0 : i32
    %c0_i32_1 = arith.constant 0 : i32
    return %c0_i32, %c0_i32_0 : i32, i32
  }
  func.func @transform_7(%arg0: i32) -> (i32, i32) {
    %c0_i32 = arith.constant 0 : i32
    %c0_i32_0 = arith.constant 0 : i32
    %c0_i32_1 = arith.constant 0 : i32
    return %c0_i32, %c0_i32_0 : i32, i32
  }
  func.func @transform_8(%arg0: i32) -> (i32, i32) {
    %c0_i32 = arith.constant 0 : i32
    %c0_i32_0 = arith.constant 0 : i32
    %c0_i32_1 = arith.constant 0 : i32
    return %c0_i32, %c0_i32_0 : i32, i32
  }
  func.func @transform_9(%arg0: i32) -> (i32, i32) {
    %c0_i32 = arith.constant 0 : i32
    %c0_i32_0 = arith.constant 0 : i32
    %c0_i32_1 = arith.constant 0 : i32
    return %c0_i32, %c0_i32_0 : i32, i32
  }
  func.func @transform_10(%arg0: i32) -> (i32, i32, i32) {
    %c0_i32 = arith.constant 0 : i32
    %c0_i32_0 = arith.constant 0 : i32
    %c0_i32_1 = arith.constant 0 : i32
    %c0_i32_2 = arith.constant 0 : i32
    return %c0_i32, %c0_i32_0, %c0_i32_1 : i32, i32, i32
  }
  func.func @transform_11(%arg0: i32) -> (i32, i32, i32) {
    %c0_i32 = arith.constant 0 : i32
    %c0_i32_0 = arith.constant 0 : i32
    %c0_i32_1 = arith.constant 0 : i32
    return %arg0, %c0_i32, %c0_i32_0 : i32, i32, i32
  }
}

</mosaic_0001>

<bundles_post_ra>
// kernel: tpu_custom_call.1
= control target key start
LH: loop header
LB: loop body
LE: loop exit
PB: predicated region body
PF: predicated region fallthrough
CT: control target
= control target key end

     0   :  { %s4778_s0 = inlined_call_operand.vmem [shape: f32[2,40,8], index: 0, kind: input, shape index: {}]   ;;  %s4779_s1 = inlined_call_operand.hbm [shape: f32[24,128], index: 1, kind: input, shape index: {}]   ;;  %s4780_s2 = inlined_call_operand.vmem [shape: f32[96,128], index: 2, kind: input, shape index: {}]   ;;  %s4781_s3 = inlined_call_operand.hbm [shape: f32[192,128], index: 3, kind: input, shape index: {}]   ;;  %s4782_s4 = inlined_call_operand.hbm [shape: f32[192,128], index: 4, kind: input, shape index: {}]   ;;  %s4783_s5 = inlined_call_operand.hbm [shape: f32[320,128], index: 5, kind: input, shape index: {}]   ;;  %s4784_s6 = inlined_call_operand.hbm [shape: f32[384,128], index: 6, kind: input, shape index: {}]   ;;  %s4785_s7 = inlined_call_operand.hbm [shape: f32[384,128], index: 7, kind: input, shape index: {}]   ;;  %s4786_s8 = inlined_call_operand.hbm [shape: f32[384,128], index: 8, kind: input, shape index: {}]   ;;  %s4787_s9 = inlined_call_operand.hbm [shape: f32[384,128], index: 9, kind: input, shape index: {}]   ;;  %s4788_s10 = inlined_call_operand.vmem [shape: f32[9,4,128], index: 10, kind: input, shape index: {}]   ;;  %s4789_s11 = inlined_call_operand.hbm [shape: f32[2,24,128], index: 11, kind: output, shape index: {}]  }
   0x1   :  { %4800 = sst [smem:[#allocation30_spill]] %s4781_s3 }
   0x2   :  { %4801 = sst [smem:[#allocation31_spill]] %s4789_s11 }
   0x3   :  { %16 = vsyncpa [#allocation4], 0 }
   0x4   :  { %17 = vsyncpa [#allocation7], 0 }
   0x5   :  { %18 = vsyncpa [#allocation10], 0 }
   0x6   :  { %19 = vsyncpa [#allocation13], 0 }
   0x7   :  { %20 = vsyncpa [#allocation16], 0 }
   0x8   :  { %21 = vsyncpa [#allocation5], 0 }
   0x9   :  { %23 = vsyncpa [#allocation5 + $0x1], 0  ;;  %s4162_s17 = smov 0   ;;  %s4164_s18 = smov 0  }
   0xa   :  { %s4166_s19 = smov 0   ;;  %s4168_s20 = smov 0  }
   0xb LB: > { %4802 = sst [smem:[#allocation24_spill]] %s4069_s17  ;;  %s4183_s21 = sadd.s32 4294967295, %s4081_s20   ;;  %s4081_s20 = sphi %s4168_s20, %s4832_s20   ;;  %s4077_s19 = sphi %s4166_s19, %s4834_s19   ;;  %s4073_s18 = sphi %s4164_s18, %s4836_s18   ;;  %s4069_s17 = sphi %s4162_s17, %s4835_s17  }
   0xc   : > { %4803 = sst [smem:[#allocation25_spill]] %s4077_s19  ;;  %s2631_s22 = sadd.s32 4294967294, %s4081_s20  }
   0xd   : > { %4804 = sst [smem:[#allocation26_spill]] %s4081_s20  ;;  %s4187_s23 = sadd.s32 1, %s4081_s20  }
   0xe   : > { %4805 = sst [smem:[#allocation27_spill]] %s4187_s23  ;;  %s272_s24 = sadd.s32 1, %s4077_s19 }
   0xf   : > { %s269_s25 = ssub.s32 %s4081_s20, %s4187_s23  ;;  %p282_p0 = scmp.ne.s32.totalorder %s4077_s19, %s4073_s18 }
  0x10   : > { %p270_p1 = scmp.eq.s32.totalorder %s269_s25, 0  ;;  %p283_p2 = scmp.eq.s32.totalorder %s4183_s21, 1 }
  0x11   : > { %p288_p3 = scmp.ne.s32.totalorder %s4073_s18, %s4069_s17  ;;  %p289_p4 = scmp.eq.s32.totalorder %s2631_s22, 1 }
  0x12   : > { %s4198_s26 = scalar_select %p270_p1, %s4077_s19, %s272_s24  }
  0x13   : > { %p4200_p5 = por %p283_p2, %p282_p0  ;;  %p4204_p6 = por %p289_p4, %p288_p3 }
  0x14   : > { %4806 = sst [smem:[#allocation28_spill]] %s4198_s26  ;;  %p2632_p7 = scmp.ge.s32.totalorder %s4081_s20, 1 }
  0x15   : > { %s4807_s27 = scalar_select %p4200_p5, 1, 0 }
  0x16   : > { %s4808_s28 = scalar_select %p4204_p6, 1, 0 }
  0x17   : > { %p296_p8 = scmp.lt.s32.totalorder %s4081_s20, 3  ;;  %p4793_p9 = scmp.eq.s32.totalorder %s4183_s21, 0 }
  0x18   : > { %4809 = sst [smem:[#allocation29_spill]] %s4808_s28  ;;  %s4083_s30 = smov [#allocation6]  }
  0x19   : > { %p4211_p10 = pnand %p2632_p7, %p296_p8  ;;  %s324_s12 = sshll.u32 %s4083_s30, 4  ;;  %s4217_s12 = int_to_ptr.vmem [resolvable:$true] %s324_s12 }
  0x1a   : > { %s4084_s14 = smov [#allocation9]   ;;  %s4085_s16 = smov [#allocation12]  }
  0x1b   : > { %s4810_s29 = scalar_select %p4211_p10, 1, 0 }
  0x1c   : > { %p3657_p11 = pneg %p4211_p10  ;;  %s350_s15 = sshll.u32 %s4084_s14, 4  ;;  %s4225_s15 = int_to_ptr.vmem [resolvable:$true] %s350_s15 }
  0x1d   : > { %s4227_s22 = sshll.u32 %s4085_s16, 4  ;;  %s4812_s3 = sld [smem:[#allocation30_spill]]  ;;  %s377_s22 = int_to_ptr.vmem [resolvable:$true] %s4227_s22 }
  0x1e   : > { %p4221_p12 = pnand %p4793_p9, %p3657_p11 }
  0x20   : > { %p4237_p0 = pneg %p4221_p12 }
  0x23   : > { %s3775_s26 = scalar_lea.hbm %s4812_s3, 3072 }
  0x24   : > { %p3776_p13 = scmp.ne.s32.totalorder %s4812_s3, %s3775_s26  ;;  %p3782_p3 = scmp.lt.u32.totalorder %s3775_s26, %s4812_s3 }
  0x26   : > { %p3778_p1 = pnand %p4237_p0, %p3776_p13 }
  0x28   : > { %p3779_p2 = pneg %p3778_p1 }
  0x2a   : > { %p3784_p4 = pnand %p3782_p3, %p3779_p2 }
  0x2c   : > { %3787 = shalt.err (!%p3784_p4)
}
  0x2d   : > { %s3788_s19 = scalar_lea.vmem %s4217_s12, 3072  ;;  %p3796_p9 = scmp.lt.s32.totalorder %s4217_s12, %s4217_s12 }
  0x2e   : > { %p3789_p7 = scmp.ne.s32.totalorder %s4217_s12, %s3788_s19  ;;  %p3797_p6 = scmp.lt.s32.totalorder %s3788_s19, %s3788_s19 }
  0x30   : > { %p3791_p8 = pnand %p3789_p7, %p4237_p0  ;;  %p3798_p13 = por %p3797_p6, %p3796_p9 }
  0x32   : > { %p3792_p11 = pneg %p3791_p8 }
  0x34   : > { %p3799_p1 = pnand %p3798_p13, %p3792_p11 }
  0x36   : > { %3802 = shalt.err (!%p3799_p1)
}
  0x37   : > { %s4086_s24 = smov 128   ;;  %s4087_s26 = smov 8  }
  0x38   : > { %3663 = dma.hbm_to_vmem [thread:$0]  (!%p4221_p12), %s4812_s3, 3072, %s4217_s12, [#allocation7], %s4086_s24, %s4086_s24, %s4087_s26  }
  0x39   : > { %s3803_s19 = scalar_lea.hbm %s4783_s5, 5120 }
  0x3a   : > { %p3804_p6 = scmp.ne.s32.totalorder %s4783_s5, %s3803_s19  ;;  %p3810_p3 = scmp.lt.u32.totalorder %s3803_s19, %s4783_s5 }
  0x3c   : > { %p3806_p9 = pnand %p3804_p6, %p4237_p0 }
  0x3e   : > { %p3807_p2 = pneg %p3806_p9 }
  0x40   : > { %p3812_p4 = pnand %p3810_p3, %p3807_p2 }
  0x42   : > { %3815 = shalt.err (!%p3812_p4)
}
  0x43   : > { %s3816_s12 = scalar_lea.vmem %s4225_s15, 5120  ;;  %p3824_p13 = scmp.lt.s32.totalorder %s4225_s15, %s4225_s15 }
  0x44   : > { %p3817_p7 = scmp.ne.s32.totalorder %s4225_s15, %s3816_s12  ;;  %p3825_p1 = scmp.lt.s32.totalorder %s3816_s12, %s3816_s12 }
  0x46   : > { %p3819_p8 = pnand %p3817_p7, %p4237_p0  ;;  %p3826_p6 = por %p3825_p1, %p3824_p13 }
  0x48   : > { %p3820_p11 = pneg %p3819_p8 }
  0x4a   : > { %p3827_p9 = pnand %p3826_p6, %p3820_p11 }
  0x4c   : > { %3830 = shalt.err (!%p3827_p9)
}
  0x4d   : > { %3669 = dma.hbm_to_vmem [thread:$0]  (!%p4221_p12), %s4783_s5, 5120, %s4225_s15, [#allocation10], %s4086_s24, %s4086_s24, %s4087_s26  }
  0x4e   : > { %s3831_s25 = scalar_lea.hbm %s4785_s7, 6144 }
  0x4f   : > { %p3832_p2 = scmp.ne.s32.totalorder %s4785_s7, %s3831_s25  ;;  %p3838_p7 = scmp.lt.u32.totalorder %s3831_s25, %s4785_s7 }
  0x51   : > { %p3834_p3 = pnand %p3832_p2, %p4237_p0 }
  0x53   : > { %p3835_p4 = pneg %p3834_p3 }
  0x55   : > { %p3840_p8 = pnand %p3838_p7, %p3835_p4 }
  0x57   : > { %3843 = shalt.err (!%p3840_p8)
}
  0x58   : > { %s3844_s12 = scalar_lea.vmem %s377_s22, 6144  ;;  %p3852_p6 = scmp.lt.s32.totalorder %s377_s22, %s377_s22 }
  0x59   : > { %p3845_p11 = scmp.ne.s32.totalorder %s377_s22, %s3844_s12  ;;  %p3853_p9 = scmp.lt.s32.totalorder %s3844_s12, %s3844_s12 }
  0x5b   : > { %p3847_p13 = pnand %p3845_p11, %p4237_p0  ;;  %p3854_p5 = por %p3853_p9, %p3852_p6 }
  0x5d   : > { %p3848_p1 = pneg %p3847_p13 }
  0x5f   : > { %p3855_p10 = pnand %p3854_p5, %p3848_p1 }
  0x61   : > { %3858 = shalt.err (!%p3855_p10)
}
  0x62   : > { %3675 = dma.hbm_to_vmem [thread:$0]  (!%p4221_p12), %s4785_s7, 6144, %s377_s22, [#allocation13], %s4086_s24, %s4086_s24, %s4087_s26  }
  0x63   : > { %s4088_s17 = smov [#allocation3]   ;;  %s4089_s28 = smov [#allocation8]  }
  0x64   : > { %s308_s20 = sshll.u32 %s4088_s17, 4  ;;  %s337_s25 = sshll.u32 %s4089_s28, 4  ;;  %s309_s20 = int_to_ptr.vmem [resolvable:$true] %s308_s20  ;;  %s338_s25 = int_to_ptr.vmem [resolvable:$true] %s337_s25 }
  0x65   : > { %s3859_s16 = scalar_lea.hbm %s4779_s1, 384 }
  0x66   : > { %p3860_p5 = scmp.ne.s32.totalorder %s4779_s1, %s3859_s16  ;;  %p3866_p3 = scmp.lt.u32.totalorder %s3859_s16, %s4779_s1 }
  0x68   : > { %p3862_p10 = pnand %p3860_p5, %p4237_p0 }
  0x6a   : > { %p3863_p2 = pneg %p3862_p10 }
  0x6c   : > { %p3868_p4 = pnand %p3866_p3, %p3863_p2 }
  0x6e   : > { %3871 = shalt.err (!%p3868_p4)
}
  0x6f   : > { %s3872_s22 = scalar_lea.vmem %s309_s20, 384  ;;  %p3880_p13 = scmp.lt.s32.totalorder %s309_s20, %s309_s20 }
  0x70   : > { %p3873_p7 = scmp.ne.s32.totalorder %s309_s20, %s3872_s22  ;;  %p3881_p1 = scmp.lt.s32.totalorder %s3872_s22, %s3872_s22 }
  0x72   : > { %p3875_p8 = pnand %p3873_p7, %p4237_p0  ;;  %p3882_p6 = por %p3881_p1, %p3880_p13 }
  0x74   : > { %p3876_p11 = pneg %p3875_p8 }
  0x76   : > { %p3883_p9 = pnand %p3882_p6, %p3876_p11 }
  0x78   : > { %3886 = shalt.err (!%p3883_p9)
}
  0x79   : > { %3660 = dma.hbm_to_vmem [thread:$0]  (!%p4221_p12), %s4779_s1, 384, %s309_s20, [#allocation4], %s4086_s24, %s4086_s24, %s4087_s26  }
  0x7a   : > { %s3887_s30 = scalar_lea.hbm %s4782_s4, 3072 }
  0x7b   : > { %p3888_p5 = scmp.ne.s32.totalorder %s4782_s4, %s3887_s30  ;;  %p3894_p3 = scmp.lt.u32.totalorder %s3887_s30, %s4782_s4 }
  0x7d   : > { %p3890_p10 = pnand %p3888_p5, %p4237_p0 }
  0x7f   : > { %p3891_p2 = pneg %p3890_p10 }
  0x81   : > { %p3896_p4 = pnand %p3894_p3, %p3891_p2 }
  0x83   : > { %3899 = shalt.err (!%p3896_p4)
}
  0x84   : > { %s3900_s15 = scalar_lea.vmem %s338_s25, 3072  ;;  %p3908_p13 = scmp.lt.s32.totalorder %s338_s25, %s338_s25 }
  0x85   : > { %p3901_p7 = scmp.ne.s32.totalorder %s338_s25, %s3900_s15  ;;  %p3909_p1 = scmp.lt.s32.totalorder %s3900_s15, %s3900_s15 }
  0x87   : > { %p3903_p8 = pnand %p3901_p7, %p4237_p0  ;;  %p3910_p6 = por %p3909_p1, %p3908_p13 }
  0x89   : > { %p3904_p11 = pneg %p3903_p8 }
  0x8b   : > { %p3911_p9 = pnand %p3910_p6, %p3904_p11 }
  0x8d   : > { %3914 = shalt.err (!%p3911_p9)
}
  0x8e   : > { %3666 = dma.hbm_to_vmem [thread:$0]  (!%p4221_p12), %s4782_s4, 3072, %s338_s25, [#allocation7], %s4086_s24, %s4086_s24, %s4087_s26  }
  0x8f   : > { %s4090_s3 = smov [#allocation11]   ;;  %s4091_s17 = smov [#allocation14]  }
  0x90   : > { %s363_s11 = sshll.u32 %s4090_s3, 4  ;;  %s389_s28 = sshll.u32 %s4091_s17, 4  ;;  %s364_s11 = int_to_ptr.vmem [resolvable:$true] %s363_s11  ;;  %s390_s28 = int_to_ptr.vmem [resolvable:$true] %s389_s28 }
  0x91   : > { %s3915_s16 = scalar_lea.hbm %s4784_s6, 6144 }
  0x92   : > { %p3916_p5 = scmp.ne.s32.totalorder %s4784_s6, %s3915_s16  ;;  %p3922_p3 = scmp.lt.u32.totalorder %s3915_s16, %s4784_s6 }
  0x94   : > { %p3918_p10 = pnand %p3916_p5, %p4237_p0 }
  0x96   : > { %p3919_p2 = pneg %p3918_p10 }
  0x98   : > { %p3924_p4 = pnand %p3922_p3, %p3919_p2 }
  0x9a   : > { %3927 = shalt.err (!%p3924_p4)
}
  0x9b   : > { %s3928_s25 = scalar_lea.vmem %s364_s11, 6144  ;;  %p3936_p13 = scmp.lt.s32.totalorder %s364_s11, %s364_s11 }
  0x9c   : > { %p3929_p7 = scmp.ne.s32.totalorder %s364_s11, %s3928_s25  ;;  %p3937_p1 = scmp.lt.s32.totalorder %s3928_s25, %s3928_s25 }
  0x9e   : > { %p3931_p8 = pnand %p3929_p7, %p4237_p0  ;;  %p3938_p6 = por %p3937_p1, %p3936_p13 }
  0xa0   : > { %p3932_p11 = pneg %p3931_p8 }
  0xa2   : > { %p3939_p9 = pnand %p3938_p6, %p3932_p11 }
  0xa4   : > { %3942 = shalt.err (!%p3939_p9)
}
  0xa5   : > { %3672 = dma.hbm_to_vmem [thread:$0]  (!%p4221_p12), %s4784_s6, 6144, %s364_s11, [#allocation10], %s4086_s24, %s4086_s24, %s4087_s26  }
  0xa6   : > { %s3943_s14 = scalar_lea.hbm %s4786_s8, 6144 }
  0xa7   : > { %p3944_p5 = scmp.ne.s32.totalorder %s4786_s8, %s3943_s14  ;;  %p3950_p3 = scmp.lt.u32.totalorder %s3943_s14, %s4786_s8 }
  0xa9   : > { %p3946_p10 = pnand %p3944_p5, %p4237_p0 }
  0xab   : > { %p3947_p2 = pneg %p3946_p10 }
  0xad   : > { %p3952_p4 = pnand %p3950_p3, %p3947_p2 }
  0xaf   : > { %3955 = shalt.err (!%p3952_p4)
}
  0xb0   : > { %s3956_s20 = scalar_lea.vmem %s390_s28, 6144  ;;  %p3964_p13 = scmp.lt.s32.totalorder %s390_s28, %s390_s28 }
  0xb1   : > { %p3957_p7 = scmp.ne.s32.totalorder %s390_s28, %s3956_s20  ;;  %p3965_p1 = scmp.lt.s32.totalorder %s3956_s20, %s3956_s20 }
  0xb3   : > { %p3959_p8 = pnand %p3957_p7, %p4237_p0  ;;  %p3966_p6 = por %p3965_p1, %p3964_p13 }
  0xb5   : > { %p3960_p11 = pneg %p3959_p8 }
  0xb7   : > { %p3967_p9 = pnand %p3966_p6, %p3960_p11 }
  0xb9   : > { %3970 = shalt.err (!%p3967_p9)
}
  0xba   : > { %3678 = dma.hbm_to_vmem [thread:$0]  (!%p4221_p12), %s4786_s8, 6144, %s390_s28, [#allocation13], %s4086_s24, %s4086_s24, %s4087_s26  }
  0xbb   : > { %s4092_s22 = smov [#allocation15]   ;;  %s3971_s14 = scalar_lea.hbm %s4787_s9, 6144 }
  0xbc   : > { %s402_s3 = sshll.u32 %s4092_s22, 4  ;;  %p3972_p5 = scmp.ne.s32.totalorder %s4787_s9, %s3971_s14  ;;  %s403_s3 = int_to_ptr.vmem [resolvable:$true] %s402_s3 }
  0xbd   : > { %p3978_p3 = scmp.lt.u32.totalorder %s3971_s14, %s4787_s9 }
  0xbe   : > { %p3974_p10 = pnand %p3972_p5, %p4237_p0 }
  0xc0   : > { %p3975_p2 = pneg %p3974_p10 }
  0xc2   : > { %p3980_p4 = pnand %p3978_p3, %p3975_p2 }
  0xc4   : > { %3983 = shalt.err (!%p3980_p4)
}
  0xc5   : > { %s3984_s28 = scalar_lea.vmem %s403_s3, 6144  ;;  %p3992_p13 = scmp.lt.s32.totalorder %s403_s3, %s403_s3 }
  0xc6   : > { %p3985_p7 = scmp.ne.s32.totalorder %s403_s3, %s3984_s28  ;;  %p3993_p1 = scmp.lt.s32.totalorder %s3984_s28, %s3984_s28 }
  0xc8   : > { %p3987_p8 = pnand %p3985_p7, %p4237_p0  ;;  %p3994_p6 = por %p3993_p1, %p3992_p13 }
  0xca   : > { %p3988_p11 = pneg %p3987_p8 }
  0xcc   : > { %p3995_p9 = pnand %p3994_p6, %p3988_p11 }
  0xce   : > { %3998 = shalt.err (!%p3995_p9)
}
  0xcf   : > { %3681 = dma.hbm_to_vmem [thread:$0]  (!%p4221_p12), %s4787_s9, 6144, %s403_s3, [#allocation16], %s4086_s24, %s4086_s24, %s4087_s26  }
  0xd0   : > { %p4814_p5 = scmp.ne.s32.totalorder %s4810_s29, 0 }
  0xd1   : > { %p4815_p0 = scmp.eq.s32.totalorder (!%p4814_p5), %s4183_s21, 0 }
  0xd2   : > { %429 = sbr.rel (%p4814_p5) target bundleno = 2944 (0xb80), region = 64 }
  0xd9   : > { %4044 = dma.done.wait (%p4815_p0), [#allocation4], 384   ;;  %p4816_p10 = pmov %p4815_p0 }
  0xda   : > { %p4817_p2 = pmov %p4815_p0 }
  0xdb   : > { %4046 = vsyncadd (%p4816_p10), [#allocation4], 4294966912 }
  0xdc   : > { %4048 = dma.done.wait (%p4817_p2), [#allocation7], 6144   ;;  %p4818_p3 = pmov %p4815_p0 }
  0xdd   : > { %p4819_p4 = pmov %p4815_p0 }
  0xde   : > { %4050 = vsyncadd (%p4818_p3), [#allocation7], 4294961152 }
  0xdf   : > { %4052 = dma.done.wait (%p4819_p4), [#allocation10], 11264   ;;  %p4820_p12 = pmov %p4815_p0 }
  0xe0   : > { %p4821_p7 = pmov %p4815_p0 }
  0xe1   : > { %4054 = vsyncadd (%p4820_p12), [#allocation10], 4294956032 }
  0xe2   : > { %4056 = dma.done.wait (%p4821_p7), [#allocation13], 12288   ;;  %p4822_p8 = pmov %p4815_p0 }
  0xe3   : > { %p4823_p11 = pmov %p4815_p0 }
  0xe4   : > { %4058 = vsyncadd (%p4822_p8), [#allocation13], 4294955008 }
  0xe5   : > { %4060 = dma.done.wait (%p4823_p11), [#allocation16], 6144   ;;  %p4824_p13 = pmov %p4815_p0 }
  0xe6   : > { %p497_p1 = scmp.lt.s32.totalorder %s4183_s21, 1  ;;  %v4093_v0 = vmov 0.0|0.0   ;;  %v4094_v1 = vmov 0.0   ;;  %vm4095_vm0 = vmmov 0   ;;  %vm519_vm1 = vcmask 1046528   ;;  %v568_v9 = vld [vmem:[#allocation3] sm:$0xff] }
  0xe7   : > { %4062 = vsyncadd (%p4824_p13), [#allocation16], 4294961152  ;;  %3259 = vmatprep.subr.bf16.mxu0 %v4093_v0  ;;  %3262 = vmatprep.subr.bf16.mxu1 %v4093_v0  ;;  %502 = vst [vmem:[#allocation2] sm:$0xff] %v4094_v1  ;;  %vm538_vm2 = vcmask 1045504   ;;  %v569_v10 = vld [vmem:[#allocation3 + $0x8] sm:$0xff]  ;;  %s4096_s25 = smov 8  }
  0xe8   : > { %s498_s23 = scalar_select %p497_p1, %s4183_s21, 1  ;;  %506 = vst [vmem:[#allocation2 + $0x20] sm:$0xff] %v4094_v1  ;;  %3028 = vmatprep.mubr.msk.f32.mxu0 %vm4095_vm0, %v4094_v1  ;;  %3061 = vmatprep.mubr.msk.f32.mxu1 %vm4095_vm0, %v4094_v1  ;;  %v3260_v11 = vpack.c.bf16 %v569_v10, %v568_v9  ;;  %v570_v17 = vld [vmem:[#allocation3 + $0x10] sm:$0xff]  ;;  %vm558_vm3 = vcmask 64512   ;;  %vm563_vm4 = vcmask 130048   ;;  %vm575_vm5 = vcmask 1040384  }
  0xe9   : > { %s4097_s22 = smov 16   ;;  %vm583_vm6 = vcmask 195584   ;;  %v745_v46 = vld [vmem:[%s4780_s2] sm:$0xff]  ;;  %v746_v47 = vld [vmem:[%s4780_s2 + $0x8] sm:$0xff]  ;;  %v747_v48 = vld [vmem:[%s4780_s2 + $0x10] sm:$0xff]  ;;  %vm737_vm7 = vcmask 261120  }
  0xea   : > { %s3621_s29 = smul.u32 40, %s498_s23  ;;  %3261 = vmatpush3.bf16.msra.mxu0 %v3260_v11  ;;  %v3263_v49 = vpack.c.bf16 %v746_v47, %v745_v46  ;;  %v748_v50 = vld [vmem:[%s4780_s2 + $0x18] sm:$0xff]  ;;  %v749_v52 = vld [vmem:[%s4780_s2 + $0x20] sm:$0xff]  ;;  %v750_v53 = vld [vmem:[%s4780_s2 + $0x28] sm:$0xff]  ;;  %s4098_s23 = smov 32   ;;  %vm741_vm8 = vcmask 523264  }
  0xeb   : > { %3026 = vmatprep.subr.mxu0 %v4094_v1  ;;  %v3266_v51 = vpack.c.bf16 %v748_v50, %v747_v48  ;;  %v3269_v54 = vpack.c.bf16 %v750_v53, %v749_v52  ;;  %v751_v55 = vld [vmem:[%s4780_s2 + $0x30] sm:$0xff]  ;;  %v752_v56 = vld [vmem:[%s4780_s2 + $0x38] sm:$0xff]  ;;  %v753_v58 = vld [vmem:[%s4780_s2 + $0x40] sm:$0xff]  ;;  %vm757_vm9 = vcmask 785408   ;;  %s3622_s17 = smul.u32 384, %s4183_s21  ;;  %s4825_s19 = sld [smem:[#allocation31_spill]] }
  0xec   : > { %s4449_s26 = scalar_lea.vmem %s4778_s0, %s3621_s29  ;;  %3264 = vmatpush3.bf16.msra.mxu1 %v3263_v49  ;;  %v3272_v57 = vpack.c.bf16 %v752_v56, %v751_v55  ;;  %v754_v59 = vld [vmem:[%s4780_s2 + $0x48] sm:$0xff]  ;;  %v755_v61 = vld [vmem:[%s4780_s2 + $0x50] sm:$0xff]  ;;  %v756_v62 = vld [vmem:[%s4780_s2 + $0x58] sm:$0xff]  ;;  %s4099_s29 = smov 64  }
  0xed   : > { %v512_v2 = vld [vmem:[%s4449_s26 + $0x8] sm:$0xff]  ;;  %v513_v3 = vld [vmem:[%s4449_s26 + $0x10] sm:$0xff]  ;;  %v514_v8 = vld [vmem:[%s4449_s26 + $0x18] sm:$0xff]  ;;  %3265 = vmatprep.subr.bf16.mxu1 %v4093_v0  ;;  %v3275_v60 = vpack.c.bf16 %v754_v59, %v753_v58  ;;  %v3278_v63 = vpack.c.bf16 %v756_v62, %v755_v61  ;;  %p4827_p9 = scmp.ne.s32.totalorder %s4807_s27, 0  ;;  %s4100_s21 = smov [#allocation17]  }
  0xee   : > { %v520_v4 = vrot.slane %v512_v2, 1  ;;  %v539_v5 = vrot.slane %v512_v2, 2  ;;  %v521_v6 = vrot.slane %v513_v3, 1  ;;  %v540_v7 = vrot.slane %v513_v3, 2  ;;  %v515_v16 = vld [vmem:[%s4449_s26 + $0x20] sm:$0xff]  ;;  %3027 = vmatpush3.msra.mxu0 %v570_v17  ;;  %v903_v47 = vld [vmem:[#allocation6 + $0x30] sm:$0xff] }
  0xef   : > { %v523_v14 = vrot.slane %v514_v8, 1  ;;  %v542_v15 = vrot.slane %v514_v8, 2  ;;  %v544_v20 = vrot.slane %v515_v16, 2  ;;  %3280 = vmatprep.subr.bf16.mxu0 %v4093_v0  ;;  %v511_v22 = vld [vmem:[%s4449_s26] sm:$0xff]  ;;  %v904_v48 = vld [vmem:[#allocation6 + $0x38] sm:$0xff]  ;;  %v905_v50 = vld [vmem:[#allocation6 + $0x40] sm:$0xff] }
  0xf0   : > { %525 = vrot.lane.b32.xlu0 %v520_v4, %s4096_s25  ;;  %546 = vrot.lane.b32.xlu1 %v539_v5, %s4097_s22  ;;  %v522_v12 = vsel %vm519_vm1, %v520_v4, %v521_v6  ;;  %v541_v13 = vsel %vm538_vm2, %v539_v5, %v540_v7  ;;  %v2656_v4 = vld [vmem:[%s4788_s10 + $0x1] ss:$0 sm:$0xff]  ;;  %v3290_v49 = vpack.c.bf16 %v904_v48, %v903_v47  ;;  %v907_v53 = vld [vmem:[#allocation6 + $0x50] sm:$0xff]  ;;  %v909_v56 = vld [vmem:[#allocation6 + $0x60] sm:$0xff]  ;;  %s494_s26 = sand.u32 1, %s4073_s18   ;;  %s4003_s11 = sshll.u32 %s4100_s21, 4  ;;  %s4004_s11 = int_to_ptr.vmem [resolvable:$false] %s4003_s11 }
  0xf1   : > { %v524_v18 = vsel %vm519_vm1, %v521_v6, %v523_v14  ;;  %v543_v19 = vsel %vm538_vm2, %v540_v7, %v542_v15  ;;  %v545_v21 = vsel %vm538_vm2, %v542_v15, %v544_v20  ;;  %3267 = vmatpush3.bf16.msra.mxu1 %v3266_v51  ;;  %v906_v51 = vld [vmem:[#allocation6 + $0x48] sm:$0xff]  ;;  %v911_v59 = vld [vmem:[#allocation6 + $0x70] sm:$0xff]  ;;  %v913_v62 = vld [vmem:[#allocation6 + $0x80] sm:$0xff]  ;;  %s4826_s12 = smov %s4825_s19  ;;  %s4732_s15 = scalar_lea.hbm %s4825_s19, %s3622_s17 }
  0xf2   : > { %3268 = vmatprep.subr.bf16.mxu1 %v4093_v0  ;;  %v3293_v52 = vpack.c.bf16 %v906_v51, %v905_v50  ;;  %v1080_v48 = vld [vmem:[#allocation8 + $0x20] sm:$0xff]  ;;  %v1082_v51 = vld [vmem:[#allocation8 + $0x30] sm:$0xff]  ;;  %s4736_s28 = scalar_lea.sflag [#allocation5], %s494_s26 }
  0xf4   : > { %527 = vrot.lane.b32.xlu0 %v522_v12, %s4096_s25  ;;  %548 = vrot.lane.b32.xlu1 %v541_v13, %s4097_s22 }
  0xf5   : > { %3270 = vmatpush3.bf16.msra.mxu1 %v3269_v54  ;;  %v908_v54 = vld [vmem:[#allocation6 + $0x58] sm:$0xff] }
  0xf6   : > { %3271 = vmatprep.subr.bf16.mxu1 %v4093_v0  ;;  %v3296_v55 = vpack.c.bf16 %v908_v54, %v907_v53  ;;  %v1084_v54 = vld [vmem:[#allocation8 + $0x40] sm:$0xff] }
  0xf8   : > { %529 = vrot.lane.b32.xlu0 %v524_v18, %s4096_s25  ;;  %550 = vrot.lane.b32.xlu1 %v543_v19, %s4097_s22 }
  0xf9   : > { %3273 = vmatpush3.bf16.msra.mxu1 %v3272_v57  ;;  %v910_v57 = vld [vmem:[#allocation6 + $0x68] sm:$0xff] }
  0xfa   : > { %3274 = vmatprep.subr.bf16.mxu1 %v4093_v0  ;;  %v3299_v58 = vpack.c.bf16 %v910_v57, %v909_v56  ;;  %v1086_v57 = vld [vmem:[#allocation8 + $0x50] sm:$0xff] }
  0xfc   : > { %531 = vrot.lane.b32.xlu0 %v523_v14, %s4096_s25  ;;  %552 = vrot.lane.b32.xlu1 %v545_v21, %s4097_s22  ;;  %s3620_s22 = smul.u32 24, %s494_s26 }
  0xfd   : > { %3276 = vmatpush3.bf16.msra.mxu1 %v3275_v60  ;;  %v912_v60 = vld [vmem:[#allocation6 + $0x78] sm:$0xff] }
  0xfe   : > { %3277 = vmatprep.subr.bf16.mxu1 %v4093_v0  ;;  %v3302_v61 = vpack.c.bf16 %v912_v60, %v911_v59  ;;  %v1088_v60 = vld [vmem:[#allocation8 + $0x60] sm:$0xff]  ;;  %s496_s3 = scalar_lea.vmem [#allocation17], %s3620_s22 }
  0xff   : > { %s2490_s30 = sshll.u32 %s496_s3, 4  ;;  %s4734_s30 = int_to_ptr.vmem [resolvable:$true] %s2490_s30 }
 0x100   : > { %s3999_s20 = scalar_lea.vmem %s4734_s30, 384  ;;  %p4006_p10 = scmp.lt.s32.totalorder %s4734_s30, %s4004_s11 }
 0x101   : > { %3279 = vmatpush3.bf16.msra.mxu1 %v3278_v63  ;;  %v914_v63 = vld [vmem:[#allocation6 + $0x88] sm:$0xff]  ;;  %p4000_p6 = scmp.ne.s32.totalorder %s4734_s30, %s3999_s20 }
 0x102   : > { %3316 = vmatprep.subr.bf16.mxu1 %v4093_v0 }
 0x103   : > { %p4001_p5 = pnand %p4000_p6, %p4827_p9 }
 0x105   : > { %p4002_p0 = pneg %p4001_p5 }
 0x162   : > { %v526_v23 = vpop.permute.xlu0 %525  ;;  %v547_v24 = vpop.permute.xlu1 %546 }
 0x163   : > { %v559_v25 = vsel %vm558_vm3, %v511_v22, %v526_v23 }
 0x164   : > { %v564_v26 = vsel %vm563_vm4, %v559_v25, %v547_v24 }
 0x165   : > { %v576_v31 = vrot.slane %v564_v26, 7 }
 0x166   : > { %v528_v27 = vpop.permute.xlu0 %527  ;;  %v549_v28 = vpop.permute.xlu1 %548 }
 0x167   : > { %v560_v29 = vsel %vm558_vm3, %v512_v2, %v528_v27  ;;  %v2655_v2 = vld [vmem:[%s4788_s10] ss:$0 sm:$0xff] }
 0x168   : > { %v565_v30 = vsel %vm563_vm4, %v560_v29, %v549_v28 }
 0x169   : > { %v577_v32 = vrot.slane %v565_v30, 7 }
 0x16a   : > { %v530_v33 = vpop.permute.xlu0 %529  ;;  %v551_v34 = vpop.permute.xlu1 %550 }
 0x16b   : > { %v561_v35 = vsel %vm558_vm3, %v513_v3, %v530_v33  ;;  %v578_v36 = vsel %vm575_vm5, %v576_v31, %v577_v32 }
 0x16c   : > { %v566_v37 = vsel %vm563_vm4, %v561_v35, %v551_v34  ;;  %3029 = vmatmul.mubr.msk.f32.vlgmr.msra.gmra.mrb[0].mxu0 %vm583_vm6, %v578_v36 }
 0x16d   : > { %v579_v38 = vrot.slane %v566_v37, 7  ;;  %3031 = vmatprep.mubr.msk.f32.mxu0 %vm4095_vm0, %v4094_v1 }
 0x16e   : > { %v532_v39 = vpop.permute.xlu0 %531  ;;  %v553_v40 = vpop.permute.xlu1 %552 }
 0x16f   : > { %v562_v41 = vsel %vm558_vm3, %v514_v8, %v532_v39  ;;  %v580_v42 = vsel %vm575_vm5, %v577_v32, %v579_v38  ;;  %v898_v39 = vld [vmem:[#allocation6 + $0x8] sm:$0xff] }
 0x170   : > { %v567_v43 = vsel %vm563_vm4, %v562_v41, %v553_v40  ;;  %3032 = vmatmul.mubr.msk.f32.gmra.mrb[2].mxu0 %vm583_vm6, %v580_v42  ;;  %v899_v40 = vld [vmem:[#allocation6 + $0x10] sm:$0xff]  ;;  %v900_v42 = vld [vmem:[#allocation6 + $0x18] sm:$0xff] }
 0x171   : > { %v581_v44 = vrot.slane %v567_v43, 7  ;;  %3034 = vmatprep.mubr.msk.f32.mxu0 %vm4095_vm0, %v4094_v1  ;;  %v3284_v43 = vpack.c.bf16 %v900_v42, %v899_v40  ;;  %v1076_v42 = vld [vmem:[#allocation8] sm:$0xff] }
 0x173   : > { %v582_v45 = vsel %vm575_vm5, %v579_v38, %v581_v44  ;;  %v897_v38 = vld [vmem:[#allocation6] sm:$0xff] }
 0x174   : > { %3035 = vmatmul.mubr.msk.f32.gmra.mrb[4].mxu0 %vm583_vm6, %v582_v45  ;;  %v3281_v41 = vpack.c.bf16 %v898_v39, %v897_v38  ;;  %v901_v44 = vld [vmem:[#allocation6 + $0x20] sm:$0xff]  ;;  %v902_v45 = vld [vmem:[#allocation6 + $0x28] sm:$0xff] }
 0x175   : > { %v3287_v46 = vpack.c.bf16 %v902_v45, %v901_v44  ;;  %v1078_v44 = vld [vmem:[#allocation8 + $0x10] sm:$0xff] }
 0x176   : > { %3282 = vmatpush1.bf16.msra.mxu0 %v3281_v41 }
 0x177   : > { %3283 = vmatprep.subr.bf16.mxu0 %v4093_v0 }
 0x17a   : > { %3285 = vmatpush1.bf16.msra.mxu0 %v3284_v43  ;;  %v1077_v43 = vld [vmem:[#allocation8 + $0x8] sm:$0xff] }
 0x17b   : > { %3286 = vmatprep.subr.bf16.mxu0 %v4093_v0  ;;  %v3317_v45 = vpack.c.bf16 %v1077_v43, %v1076_v42 }
 0x17e   : > { %3288 = vmatpush1.bf16.msra.mxu0 %v3287_v46  ;;  %v1079_v46 = vld [vmem:[#allocation8 + $0x18] sm:$0xff] }
 0x17f   : > { %3289 = vmatprep.subr.bf16.mxu0 %v4093_v0  ;;  %v3320_v47 = vpack.c.bf16 %v1079_v46, %v1078_v44 }
 0x182   : > { %3291 = vmatpush1.bf16.msra.mxu0 %v3290_v49  ;;  %v1081_v49 = vld [vmem:[#allocation8 + $0x28] sm:$0xff] }
 0x183   : > { %3292 = vmatprep.subr.bf16.mxu0 %v4093_v0  ;;  %v3323_v50 = vpack.c.bf16 %v1081_v49, %v1080_v48 }
 0x186   : > { %3294 = vmatpush1.bf16.msra.mxu0 %v3293_v52  ;;  %v1083_v52 = vld [vmem:[#allocation8 + $0x38] sm:$0xff] }
 0x187   : > { %3295 = vmatprep.subr.bf16.mxu0 %v4093_v0  ;;  %v3326_v53 = vpack.c.bf16 %v1083_v52, %v1082_v51 }
 0x18a   : > { %3297 = vmatpush1.bf16.msra.mxu0 %v3296_v55  ;;  %v1085_v55 = vld [vmem:[#allocation8 + $0x48] sm:$0xff] }
 0x18b   : > { %3298 = vmatprep.subr.bf16.mxu0 %v4093_v0  ;;  %v3329_v56 = vpack.c.bf16 %v1085_v55, %v1084_v54 }
 0x18e   : > { %3300 = vmatpush1.bf16.msra.mxu0 %v3299_v58  ;;  %v1087_v58 = vld [vmem:[#allocation8 + $0x58] sm:$0xff] }
 0x18f   : > { %3301 = vmatprep.subr.bf16.mxu0 %v4093_v0  ;;  %v3332_v59 = vpack.c.bf16 %v1087_v58, %v1086_v57  ;;  %v1301_v57 = vld [vmem:[#allocation9 + $0x100] sm:$0xff]  ;;  %v1302_v58 = vld [vmem:[#allocation9 + $0x108] sm:$0xff] }
 0x192   : > { %3303 = vmatpush1.bf16.msra.mxu0 %v3302_v61  ;;  %v1089_v61 = vld [vmem:[#allocation8 + $0x68] sm:$0xff] }
 0x193   : > { %3304 = vmatprep.subr.bf16.mxu0 %v4093_v0 }
 0x23f   : > { %v656_v3 = vpop.f32.mrb[0].mxu0 }
 0x240   : > { %v675_v5 = vmul.f32 %v2655_v2, %v656_v3  ;;  %v3030_v6 = vpop.f32.mrb[1].mxu0  ;;  %v915_v3 = vld [vmem:[#allocation6 + $0x90] sm:$0xff] }
 0x241   : > { %v917_v6 = vld [vmem:[#allocation6 + $0xa0] sm:$0xff] }
 0x242   : > { %v683_v7 = vadd.f32 %v2656_v4, %v675_v5 }
 0x243   : > { %v661_v8 = vpop.f32.mrb[2].mxu0 }
 0x244   : > { %v686_v9 = vmax.f32 %v683_v7, 0.0  ;;  %v676_v10 = vmul.f32 %v2655_v2, %v661_v8  ;;  %v3033_v11 = vpop.f32.mrb[3].mxu0  ;;  %v918_v7 = vld [vmem:[#allocation6 + $0xa8] sm:$0xff] }
 0x245   : > { %v3311_v8 = vpack.c.bf16 %v918_v7, %v917_v6  ;;  %v1094_v7 = vld [vmem:[#allocation8 + $0x90] sm:$0xff] }
 0x246   : > { %701 = vst [vmem:[#allocation2 + $0x8] sm:$0xff] %v686_v9  ;;  %v684_v12 = vadd.f32 %v2656_v4, %v676_v10  ;;  %716 = vrot.lane.b32.xlu0 %v686_v9, %s4098_s23  ;;  %v919_v9 = vld [vmem:[#allocation6 + $0xb0] sm:$0xff]  ;;  %v920_v10 = vld [vmem:[#allocation6 + $0xb8] sm:$0xff] }
 0x247   : > { %v666_v13 = vpop.f32.mrb[4].mxu0  ;;  %v3314_v11 = vpack.c.bf16 %v920_v10, %v919_v9  ;;  %v1096_v10 = vld [vmem:[#allocation8 + $0xa0] sm:$0xff] }
 0x248   : > { %v687_v14 = vmax.f32 %v684_v12, 0.0  ;;  %v677_v15 = vmul.f32 %v2655_v2, %v666_v13  ;;  %v3036_v16 = vpop.f32.mrb[5].mxu0  ;;  %v3305_v2 = vpack.c.bf16 %v914_v63, %v913_v62  ;;  %v2661_v12 = vld [vmem:[%s4788_s10 + $0x4] ss:$0 sm:$0xff]  ;;  %v3335_v62 = vpack.c.bf16 %v1089_v61, %v1088_v60  ;;  %v1090_v63 = vld [vmem:[#allocation8 + $0x70] sm:$0xff]  ;;  %v1304_v61 = vld [vmem:[#allocation9 + $0x118] sm:$0xff] }
 0x249   : > { %v1303_v60 = vld [vmem:[#allocation9 + $0x110] sm:$0xff] }
 0x24a   : > { %702 = vst [vmem:[#allocation2 + $0x10] sm:$0xff] %v687_v14  ;;  %v685_v17 = vadd.f32 %v2656_v4, %v677_v15  ;;  %718 = vrot.lane.b32.xlu0 %v687_v14, %s4098_s23  ;;  %v916_v4 = vld [vmem:[#allocation6 + $0x98] sm:$0xff]  ;;  %3306 = vmatpush1.bf16.msra.mxu0 %v3305_v2  ;;  %v2663_v14 = vld [vmem:[%s4788_s10 + $0x5] ss:$0 sm:$0xff] }
 0x24b   : > { %v3308_v5 = vpack.c.bf16 %v916_v4, %v915_v3  ;;  %3307 = vmatprep.subr.bf16.mxu0 %v4093_v0  ;;  %v1091_v2 = vld [vmem:[#allocation8 + $0x78] sm:$0xff]  ;;  %v1092_v4 = vld [vmem:[#allocation8 + $0x80] sm:$0xff] }
 0x24c   : > { %v688_v18 = vmax.f32 %v685_v17, 0.0  ;;  %v3338_v3 = vpack.c.bf16 %v1091_v2, %v1090_v63  ;;  %v1305_v63 = vld [vmem:[#allocation9 + $0x120] sm:$0xff]  ;;  %v1306_v2 = vld [vmem:[#allocation9 + $0x128] sm:$0xff] }
 0x24d   : > { %v704_v24 = vld [vmem:[#allocation2 + $0x7] sm:$0xff] }
 0x24e   : > { %v700_v19 = vmul.f32 0.0, %v688_v18  ;;  %3309 = vmatpush1.bf16.msra.mxu0 %v3308_v5  ;;  %v1093_v5 = vld [vmem:[#allocation8 + $0x88] sm:$0xff] }
 0x24f   : > { %3310 = vmatprep.subr.bf16.mxu0 %v4093_v0  ;;  %v3341_v6 = vpack.c.bf16 %v1093_v5, %v1092_v4  ;;  %v1307_v4 = vld [vmem:[#allocation9 + $0x130] sm:$0xff]  ;;  %v1308_v5 = vld [vmem:[#allocation9 + $0x138] sm:$0xff] }
 0x250   : > { %703 = vst [vmem:[#allocation2 + $0x18] sm:$0xff] %v700_v19  ;;  %720 = vrot.lane.b32.xlu0 %v700_v19, %s4098_s23  ;;  %s4005_s23 = scalar_lea.vmem %s4004_s11, 768 }
 0x251   : > { %v710_v20 = vld [vmem:[#allocation2 + $0x9] sm:$0xff]  ;;  %p4007_p2 = scmp.lt.s32.totalorder %s4005_s23, %s3999_s20 }
 0x252   : > { %728 = vrot.lane.b32.xlu1 %v710_v20, %s4099_s29  ;;  %v705_v29 = vld [vmem:[#allocation2 + $0xf] sm:$0xff]  ;;  %3312 = vmatpush1.bf16.msra.mxu0 %v3311_v8  ;;  %v1095_v8 = vld [vmem:[#allocation8 + $0x98] sm:$0xff] }
 0x253   : > { %3313 = vmatprep.subr.bf16.mxu0 %v4093_v0  ;;  %v3344_v9 = vpack.c.bf16 %v1095_v8, %v1094_v7  ;;  %v1285_v7 = vld [vmem:[#allocation9 + $0x80] sm:$0xff]  ;;  %v1286_v8 = vld [vmem:[#allocation9 + $0x88] sm:$0xff]  ;;  %p4008_p3 = por %p4007_p2, %p4006_p10 }
 0x255   : > { %p4009_p4 = pnand %p4008_p3, %p4002_p0 }
 0x256   : > { %3315 = vmatpush1.bf16.msra.mxu0 %v3314_v11  ;;  %v1097_v11 = vld [vmem:[#allocation8 + $0xa8] sm:$0xff] }
 0x257   : > { %v711_v21 = vld [vmem:[#allocation2 + $0x11] sm:$0xff]  ;;  %v712_v22 = vld [vmem:[#allocation2 + $0x19] sm:$0xff] }
 0x258   : > { %730 = vrot.lane.b32.xlu1 %v711_v21, %s4099_s29  ;;  %v706_v34 = vld [vmem:[#allocation2 + $0x17] sm:$0xff] }
 0x25c   : > { %732 = vrot.lane.b32.xlu1 %v712_v22, %s4099_s29 }
 0x2b8   : > { %v717_v23 = vpop.permute.xlu0 %716 }
 0x2b9   : > { %v738_v25 = vsel %vm737_vm7, %v704_v24, %v717_v23 }
 0x2bc   : > { %v719_v28 = vpop.permute.xlu0 %718 }
 0x2bd   : > { %v739_v30 = vsel %vm737_vm7, %v705_v29, %v719_v28 }
 0x2c2   : > { %v721_v33 = vpop.permute.xlu0 %720 }
 0x2c3   : > { %v740_v35 = vsel %vm737_vm7, %v706_v34, %v721_v33 }
 0x2c4   : > { %v729_v26 = vpop.permute.xlu1 %728 }
 0x2c5   : > { %v742_v27 = vsel %vm741_vm8, %v738_v25, %v729_v26 }
 0x2c6   : > { %3062 = vmatmul.mubr.msk.f32.vlgmr.msra.gmra.mrb[0].mxu1 %vm757_vm9, %v742_v27 }
 0x2c7   : > { %3064 = vmatprep.mubr.msk.f32.mxu1 %vm4095_vm0, %v4094_v1  ;;  %3318 = vmatpush1.bf16.msra.mxu1 %v3317_v45 }
 0x2c8   : > { %3319 = vmatprep.subr.bf16.mxu1 %v4093_v0 }
 0x2ca   : > { %v731_v31 = vpop.permute.xlu1 %730 }
 0x2cb   : > { %v743_v32 = vsel %vm741_vm8, %v739_v30, %v731_v31  ;;  %3321 = vmatpush1.bf16.msra.mxu1 %v3320_v47 }
 0x2cc   : > { %3065 = vmatmul.mubr.msk.f32.gmra.mrb[2].mxu1 %vm757_vm9, %v743_v32  ;;  %3322 = vmatprep.subr.bf16.mxu1 %v4093_v0 }
 0x2cd   : > { %3067 = vmatprep.mubr.msk.f32.mxu1 %vm4095_vm0, %v4094_v1 }
 0x2ce   : > { %v733_v36 = vpop.permute.xlu1 %732 }
 0x2cf   : > { %v744_v37 = vsel %vm741_vm8, %v740_v35, %v733_v36  ;;  %3324 = vmatpush1.bf16.msra.mxu1 %v3323_v50 }
 0x2d0   : > { %3068 = vmatmul.mubr.msk.f32.gmra.mrb[4].mxu1 %vm757_vm9, %v744_v37  ;;  %3325 = vmatprep.subr.bf16.mxu1 %v4093_v0 }
 0x2d3   : > { %3327 = vmatpush1.bf16.msra.mxu1 %v3326_v53 }
 0x2d4   : > { %3328 = vmatprep.subr.bf16.mxu1 %v4093_v0 }
 0x2d7   : > { %3330 = vmatpush1.bf16.msra.mxu1 %v3329_v56 }
 0x2d8   : > { %3331 = vmatprep.subr.bf16.mxu1 %v4093_v0 }
 0x2db   : > { %3333 = vmatpush1.bf16.msra.mxu1 %v3332_v59  ;;  %v3385_v59 = vpack.c.bf16 %v1302_v58, %v1301_v57 }
 0x2dc   : > { %3334 = vmatprep.subr.bf16.mxu1 %v4093_v0 }
 0x2df   : > { %3336 = vmatpush1.bf16.msra.mxu1 %v3335_v62  ;;  %v3388_v62 = vpack.c.bf16 %v1304_v61, %v1303_v60  ;;  %v1299_v61 = vld [vmem:[#allocation9 + $0xf0] sm:$0xff] }
 0x2e0   : > { %3337 = vmatprep.subr.bf16.mxu1 %v4093_v0 }
 0x2e3   : > { %3339 = vmatpush1.bf16.msra.mxu1 %v3338_v3  ;;  %v3391_v3 = vpack.c.bf16 %v1306_v2, %v1305_v63 }
 0x2e4   : > { %3340 = vmatprep.subr.bf16.mxu1 %v4093_v0 }
 0x2e7   : > { %3342 = vmatpush1.bf16.msra.mxu1 %v3341_v6  ;;  %v3394_v6 = vpack.c.bf16 %v1308_v5, %v1307_v4  ;;  %v1284_v4 = vld [vmem:[#allocation9 + $0x78] sm:$0xff] }
 0x2e8   : > { %3343 = vmatprep.subr.bf16.mxu1 %v4093_v0 }
 0x2eb   : > { %3345 = vmatpush1.bf16.msra.mxu1 %v3344_v9  ;;  %v1269_v9 = vld [vmem:[#allocation9] sm:$0xff] }
 0x2ec   : > { %3346 = vmatprep.subr.bf16.mxu1 %v4093_v0 }
 0x399   : > { %v833_v13 = vpop.f32.mrb[0].mxu1 }
 0x39a   : > { %v853_v15 = vmul.f32 %v2661_v12, %v833_v13  ;;  %v3063_v16 = vpop.f32.mrb[1].mxu1  ;;  %v1098_v13 = vld [vmem:[#allocation8 + $0xb0] sm:$0xff] }
 0x39b   : > { %v2668_v16 = vld [vmem:[%s4788_s10 + $0x8] ss:$0 sm:$0xff] }
 0x39c   : > { %v861_v17 = vadd.f32 %v2663_v14, %v853_v15 }
 0x39e   : > { %v864_v18 = vmax.f32 %v861_v17, 0.0 }
 0x39f   : > { %v838_v19 = vpop.f32.mrb[2].mxu1 }
 0x3a0   : > { %870 = vst [vmem:[#allocation2 + $0x8] sm:$0xff] %v864_v18  ;;  %v854_v20 = vmul.f32 %v2661_v12, %v838_v19  ;;  %v3066_v21 = vpop.f32.mrb[3].mxu1  ;;  %885 = vrot.lane.b32.xlu0 %v864_v18, %s4099_s29  ;;  %v2670_v18 = vld [vmem:[%s4788_s10 + $0x9] ss:$0 sm:$0xff] }
 0x3a2   : > { %v862_v22 = vadd.f32 %v2663_v14, %v854_v20 }
 0x3a3   : > { %v843_v23 = vpop.f32.mrb[4].mxu1 }
 0x3a4   : > { %v865_v24 = vmax.f32 %v862_v22, 0.0  ;;  %v855_v25 = vmul.f32 %v2661_v12, %v843_v23  ;;  %v3069_v26 = vpop.f32.mrb[5].mxu1  ;;  %v3347_v12 = vpack.c.bf16 %v1097_v11, %v1096_v10  ;;  %v2672_v22 = vld [vmem:[%s4788_s10 + $0xa] ss:$0 sm:$0xff]  ;;  %v3352_v10 = vpack.c.bf16 %v1286_v8, %v1285_v7  ;;  %v1270_v11 = vld [vmem:[#allocation9 + $0x8] sm:$0xff] }
 0x3a6   : > { %871 = vst [vmem:[#allocation2 + $0x10] sm:$0xff] %v865_v24  ;;  %v863_v27 = vadd.f32 %v2663_v14, %v855_v25  ;;  %887 = vrot.lane.b32.xlu1 %v865_v24, %s4099_s29  ;;  %v1099_v14 = vld [vmem:[#allocation8 + $0xb8] sm:$0xff]  ;;  %3348 = vmatpush1.bf16.msra.mxu1 %v3347_v12  ;;  %v2674_v24 = vld [vmem:[%s4788_s10 + $0xb] ss:$0 sm:$0xff] }
 0x3a7   : > { %v873_v32 = vld [vmem:[#allocation2 + $0x7] sm:$0xff]  ;;  %v3350_v15 = vpack.c.bf16 %v1099_v14, %v1098_v13  ;;  %3349 = vmatprep.subr.bf16.mxu1 %v4093_v0  ;;  %v1287_v12 = vld [vmem:[#allocation9 + $0x90] sm:$0xff]  ;;  %v1288_v13 = vld [vmem:[#allocation9 + $0x98] sm:$0xff]  ;;  %v3354_v14 = vpack.c.bf16 %v1270_v11, %v1269_v9  ;;  %3353 = vmatprep.subr.bf16.mxu0 %v3352_v10 }
 0x3a8   : > { %v866_v28 = vmax.f32 %v863_v27, 0.0 }
 0x3aa   : > { %v869_v29 = vmul.f32 0.0, %v866_v28  ;;  %3351 = vmatpush1.bf16.msra.mxu1 %v3350_v15  ;;  %v3356_v15 = vpack.c.bf16 %v1288_v13, %v1287_v12 }
 0x3ab   : > { %3384 = vmatprep.subr.bf16.mxu1 %v4093_v0 }
 0x3ac   : > { %872 = vst [vmem:[#allocation2 + $0x18] sm:$0xff] %v869_v29  ;;  %889 = vrot.lane.b32.xlu0 %v869_v29, %s4099_s29 }
 0x3ad   : > { %v879_v30 = vld [vmem:[#allocation2 + $0x9] sm:$0xff] }
 0x3ae   : > { %2664 = vmatprep.mubr.msk.f32.mxu0 %vm741_vm8, %v879_v30  ;;  %v874_v36 = vld [vmem:[#allocation2 + $0xf] sm:$0xff] }
 0x3b3   : > { %v880_v34 = vld [vmem:[#allocation2 + $0x11] sm:$0xff]  ;;  %v881_v38 = vld [vmem:[#allocation2 + $0x19] sm:$0xff] }
 0x3b4   : > { %v875_v40 = vld [vmem:[#allocation2 + $0x17] sm:$0xff] }
 0x412   : > { %v886_v31 = vpop.permute.xlu0 %885 }
 0x413   : > { %v894_v33 = vsel %vm741_vm8, %v873_v32, %v886_v31 }
 0x414   : > { %995 = vmatmul.mubr.f32.vlgmr.msra.gmra.mrb[6].mxu0 %v894_v33 }
 0x415   : > { %2665 = vmatprep.mubr.msk.f32.mxu0 %vm741_vm8, %v880_v34  ;;  %3355 = vmatpush3.bf16.msra.mxu0 %v3354_v14 }
 0x416   : > { %3357 = vmatprep.subr.bf16.mxu0 %v3356_v15 }
 0x418   : > { %v888_v35 = vpop.permute.xlu1 %887 }
 0x419   : > { %v895_v37 = vsel %vm741_vm8, %v874_v36, %v888_v35 }
 0x41a   : > { %1000 = vmatmul.mubr.f32.gmra.mrb[8].mxu0 %v895_v37 }
 0x41b   : > { %2666 = vmatprep.mubr.msk.f32.mxu0 %vm741_vm8, %v881_v38 }
 0x41e   : > { %v890_v39 = vpop.permute.xlu0 %889 }
 0x41f   : > { %v896_v41 = vsel %vm741_vm8, %v875_v40, %v890_v39 }
 0x420   : > { %1005 = vmatmul.mubr.f32.gmra.mrb[10].mxu0 %v896_v41 }
 0x4e7   : > { %v996_v17 = vpop.f32.mrb[6].mxu0 }
 0x4e8   : > { %v1016_v19 = vmul.f32 %v2668_v16, %v996_v17  ;;  %v998_v20 = vpop.f32.mrb[7].mxu0  ;;  %v1272_v17 = vld [vmem:[#allocation9 + $0x18] sm:$0xff] }
 0x4ea   : > { %v1024_v21 = vadd.f32 %v2670_v18, %v1016_v19  ;;  %v1290_v19 = vld [vmem:[#allocation9 + $0xa8] sm:$0xff] }
 0x4ec   : > { %v1027_v23 = vmax.f32 %v1024_v21, 0.0 }
 0x4ed   : > { %v1001_v25 = vpop.f32.mrb[8].mxu0 }
 0x4ee   : > { %v1035_v26 = vmul.f32 %v2672_v22, %v1027_v23  ;;  %v1017_v27 = vmul.f32 %v2668_v16, %v1001_v25  ;;  %v1003_v28 = vpop.f32.mrb[9].mxu0  ;;  %v1274_v23 = vld [vmem:[#allocation9 + $0x28] sm:$0xff]  ;;  %v1292_v25 = vld [vmem:[#allocation9 + $0xb8] sm:$0xff] }
 0x4ef   : > { %v1275_v28 = vld [vmem:[#allocation9 + $0x30] sm:$0xff] }
 0x4f0   : > { %v1043_v29 = vadd.f32 %v2674_v24, %v1035_v26  ;;  %v1025_v30 = vadd.f32 %v2670_v18, %v1017_v27 }
 0x4f2   : > { %1049 = vst [vmem:[#allocation2 + $0x8] sm:$0xff] %v1043_v29  ;;  %v1028_v31 = vmax.f32 %v1025_v30, 0.0  ;;  %v1276_v29 = vld [vmem:[#allocation9 + $0x38] sm:$0xff]  ;;  %v1293_v30 = vld [vmem:[#allocation9 + $0xc0] sm:$0xff] }
 0x4f3   : > { %v1006_v32 = vpop.f32.mrb[10].mxu0 }
 0x4f4   : > { %v1036_v33 = vmul.f32 %v2672_v22, %v1028_v31  ;;  %v1018_v34 = vmul.f32 %v2668_v16, %v1006_v32  ;;  %v1008_v35 = vpop.f32.mrb[11].mxu0  ;;  %v1271_v16 = vld [vmem:[#allocation9 + $0x10] sm:$0xff]  ;;  %v1294_v31 = vld [vmem:[#allocation9 + $0xc8] sm:$0xff]  ;;  %v3366_v32 = vpack.c.bf16 %v1276_v29, %v1275_v28 }
 0x4f5   : > { %v3358_v20 = vpack.c.bf16 %v1272_v17, %v1271_v16  ;;  %v1278_v35 = vld [vmem:[#allocation9 + $0x48] sm:$0xff] }
 0x4f6   : > { %v1044_v36 = vadd.f32 %v2674_v24, %v1036_v33  ;;  %v1026_v37 = vadd.f32 %v2670_v18, %v1018_v34  ;;  %v1289_v18 = vld [vmem:[#allocation9 + $0xa0] sm:$0xff]  ;;  %v3368_v33 = vpack.c.bf16 %v1294_v31, %v1293_v30  ;;  %v1546_v28 = vld [vmem:[#allocation11 + $0x108] sm:$0xff] }
 0x4f7   : > { %v3360_v21 = vpack.c.bf16 %v1290_v19, %v1289_v18  ;;  %3359 = vmatpush3.bf16.msra.mxu0 %v3358_v20  ;;  %v1277_v34 = vld [vmem:[#allocation9 + $0x40] sm:$0xff]  ;;  %v1514_v31 = vld [vmem:[#allocation11 + $0x8] sm:$0xff] }
 0x4f8   : > { %1050 = vst [vmem:[#allocation2 + $0x10] sm:$0xff] %v1044_v36  ;;  %v1029_v38 = vmax.f32 %v1026_v37, 0.0  ;;  %v1295_v36 = vld [vmem:[#allocation9 + $0xd0] sm:$0xff]  ;;  %v1296_v37 = vld [vmem:[#allocation9 + $0xd8] sm:$0xff]  ;;  %v1513_v30 = vld [vmem:[#allocation11] sm:$0xff] }
 0x4f9   : > { %v1055_v39 = vld [vmem:[#allocation2 + $0x7] sm:$0xff]  ;;  %3361 = vmatprep.subr.bf16.mxu0 %v3360_v21 }
 0x4fa   : > { %v1037_v40 = vmul.f32 %v2672_v22, %v1029_v38  ;;  %1064 = vrot.lane.b32.xlu1 %v1055_v39, %s4099_s29  ;;  %v1052_v47 = vld [vmem:[#allocation2 + $0x5] sm:$0xff]  ;;  %v3370_v38 = vpack.c.bf16 %v1278_v35, %v1277_v34  ;;  %v3372_v39 = vpack.c.bf16 %v1296_v37, %v1295_v36  ;;  %v1532_v34 = vld [vmem:[#allocation11 + $0x98] sm:$0xff] }
 0x4fb   : > { %v1273_v22 = vld [vmem:[#allocation9 + $0x20] sm:$0xff] }
 0x4fc   : > { %v1045_v41 = vadd.f32 %v2674_v24, %v1037_v40  ;;  %v1291_v24 = vld [vmem:[#allocation9 + $0xb0] sm:$0xff]  ;;  %v3362_v26 = vpack.c.bf16 %v1274_v23, %v1273_v22 }
 0x4fd   : > { %v3364_v27 = vpack.c.bf16 %v1292_v25, %v1291_v24  ;;  %v1279_v40 = vld [vmem:[#allocation9 + $0x50] sm:$0xff]  ;;  %v1529_v24 = vld [vmem:[#allocation11 + $0x80] sm:$0xff]  ;;  %v1530_v25 = vld [vmem:[#allocation11 + $0x88] sm:$0xff] }
 0x4fe   : > { %v1048_v42 = vmul.f32 0.0, %v1045_v41  ;;  %3363 = vmatpush3.bf16.msra.mxu0 %v3362_v26  ;;  %v1280_v41 = vld [vmem:[#allocation9 + $0x58] sm:$0xff]  ;;  %v3396_v26 = vpack.c.bf16 %v1530_v25, %v1529_v24 }
 0x4ff   : > { %v1058_v43 = vld [vmem:[#allocation2 + $0x9] sm:$0xff]  ;;  %3365 = vmatprep.subr.bf16.mxu0 %v3364_v27  ;;  %v1545_v27 = vld [vmem:[#allocation11 + $0x100] sm:$0xff] }
 0x500   : > { %v1056_v44 = vld [vmem:[#allocation2 + $0xf] sm:$0xff]  ;;  %1051 = vst [vmem:[#allocation2 + $0x18] sm:$0xff] %v1048_v42  ;;  %2675 = vmatprep.mubr.msk.f32.mxu1 %vm741_vm8, %v1058_v43  ;;  %v1297_v42 = vld [vmem:[#allocation9 + $0xe0] sm:$0xff]  ;;  %v3429_v29 = vpack.c.bf16 %v1546_v28, %v1545_v27  ;;  %v1524_v27 = vld [vmem:[#allocation11 + $0x58] sm:$0xff] }
 0x501   : > { %1066 = vrot.lane.b32.xlu0 %v1056_v44, %s4099_s29  ;;  %v1053_v51 = vld [vmem:[#allocation2 + $0xd] sm:$0xff]  ;;  %v3374_v44 = vpack.c.bf16 %v1280_v41, %v1279_v40 }
 0x502   : > { %3367 = vmatpush3.bf16.msra.mxu0 %v3366_v32  ;;  %v1298_v43 = vld [vmem:[#allocation9 + $0xe8] sm:$0xff] }
 0x503   : > { %3369 = vmatprep.subr.bf16.mxu0 %v3368_v33  ;;  %v1531_v33 = vld [vmem:[#allocation11 + $0x90] sm:$0xff] }
 0x504   : > { %v3400_v41 = vpack.c.bf16 %v1532_v34, %v1531_v33  ;;  %v1542_v33 = vld [vmem:[#allocation11 + $0xe8] sm:$0xff] }
 0x506   : > { %3371 = vmatpush3.bf16.msra.mxu0 %v3370_v38 }
 0x507   : > { %v1057_v45 = vld [vmem:[#allocation2 + $0x17] sm:$0xff]  ;;  %3373 = vmatprep.subr.bf16.mxu0 %v3372_v39 }
 0x508   : > { %1068 = vrot.lane.b32.xlu1 %v1057_v45, %s4099_s29  ;;  %v1059_v49 = vld [vmem:[#allocation2 + $0x11] sm:$0xff]  ;;  %v1060_v53 = vld [vmem:[#allocation2 + $0x19] sm:$0xff]  ;;  %v3376_v45 = vpack.c.bf16 %v1298_v43, %v1297_v42 }
 0x509   : > { %v1054_v55 = vld [vmem:[#allocation2 + $0x15] sm:$0xff] }
 0x50a   : > { %3375 = vmatpush3.bf16.msra.mxu0 %v3374_v44  ;;  %v1515_v42 = vld [vmem:[#allocation11 + $0x10] sm:$0xff]  ;;  %v1516_v43 = vld [vmem:[#allocation11 + $0x18] sm:$0xff]  ;;  %v1533_v44 = vld [vmem:[#allocation11 + $0xa0] sm:$0xff] }
 0x50b   : > { %3377 = vmatprep.subr.bf16.mxu0 %v3376_v45  ;;  %v1534_v45 = vld [vmem:[#allocation11 + $0xa8] sm:$0xff] }
 0x56c   : > { %v1065_v46 = vpop.permute.xlu1 %1064 }
 0x56d   : > { %v1073_v48 = vsel %vm741_vm8, %v1052_v47, %v1065_v46  ;;  %v1281_v46 = vld [vmem:[#allocation9 + $0x60] sm:$0xff]  ;;  %v1282_v47 = vld [vmem:[#allocation9 + $0x68] sm:$0xff] }
 0x56e   : > { %1174 = vmatmul.mubr.f32.vlgmr.msra.gmra.mrb[6].mxu1 %v1073_v48  ;;  %v3378_v48 = vpack.c.bf16 %v1282_v47, %v1281_v46  ;;  %v3402_v46 = vpack.c.bf16 %v1516_v43, %v1515_v42  ;;  %v3404_v47 = vpack.c.bf16 %v1534_v45, %v1533_v44  ;;  %v1527_v43 = vld [vmem:[#allocation11 + $0x70] sm:$0xff]  ;;  %v1528_v44 = vld [vmem:[#allocation11 + $0x78] sm:$0xff] }
 0x56f   : > { %2676 = vmatprep.mubr.msk.f32.mxu1 %vm741_vm8, %v1059_v49  ;;  %3386 = vmatpush3.bf16.msra.mxu1 %v3385_v59  ;;  %v2679_v49 = vld [vmem:[%s4788_s10 + $0xc] ss:$0 sm:$0xff] }
 0x570   : > { %3387 = vmatprep.subr.bf16.mxu1 %v4093_v0  ;;  %3379 = vmatpush3.bf16.msra.mxu0 %v3378_v48  ;;  %v1517_v48 = vld [vmem:[#allocation11 + $0x20] sm:$0xff] }
 0x573   : > { %v1067_v50 = vpop.permute.xlu0 %1066  ;;  %3389 = vmatpush3.bf16.msra.mxu1 %v3388_v62  ;;  %v1300_v62 = vld [vmem:[#allocation9 + $0xf8] sm:$0xff] }
 0x574   : > { %v1074_v52 = vsel %vm741_vm8, %v1053_v51, %v1067_v50  ;;  %3390 = vmatprep.subr.bf16.mxu1 %v4093_v0  ;;  %v2681_v51 = vld [vmem:[%s4788_s10 + $0xd] ss:$0 sm:$0xff]  ;;  %v3380_v2 = vpack.c.bf16 %v1300_v62, %v1299_v61 }
 0x575   : > { %1179 = vmatmul.mubr.f32.gmra.mrb[8].mxu1 %v1074_v52 }
 0x576   : > { %2677 = vmatprep.mubr.msk.f32.mxu1 %vm741_vm8, %v1060_v53  ;;  %3381 = vmatprep.subr.bf16.mxu0 %v3380_v2 }
 0x577   : > { %3392 = vmatpush3.bf16.msra.mxu1 %v3391_v3  ;;  %v1283_v3 = vld [vmem:[#allocation9 + $0x70] sm:$0xff] }
 0x578   : > { %3393 = vmatprep.subr.bf16.mxu1 %v4093_v0  ;;  %v3382_v5 = vpack.c.bf16 %v1284_v4, %v1283_v3  ;;  %v1535_v3 = vld [vmem:[#allocation11 + $0xb0] sm:$0xff]  ;;  %v1536_v4 = vld [vmem:[#allocation11 + $0xb8] sm:$0xff] }
 0x57a   : > { %v1069_v54 = vpop.permute.xlu1 %1068  ;;  %3383 = vmatpush3.bf16.msra.mxu0 %v3382_v5  ;;  %v3408_v5 = vpack.c.bf16 %v1536_v4, %v1535_v3  ;;  %v2687_v3 = vld [vmem:[%s4788_s10 + $0x10] ss:$0 sm:$0xff] }
 0x57b   : > { %v1075_v56 = vsel %vm741_vm8, %v1054_v55, %v1069_v54  ;;  %3395 = vmatpush3.bf16.msra.mxu1 %v3394_v6  ;;  %v507_v55 = vlaneseq  ;;  %3397 = vmatprep.subr.bf16.mxu0 %v3396_v26  ;;  %v1523_v26 = vld [vmem:[#allocation11 + $0x50] sm:$0xff] }
 0x57c   : > { %1184 = vmatmul.mubr.f32.gmra.mrb[10].mxu1 %v1075_v56  ;;  %3428 = vmatprep.subr.bf16.mxu1 %v4093_v0  ;;  %v3418_v28 = vpack.c.bf16 %v1524_v27, %v1523_v26 }
 0x57d   : > { %3086 = vmatprep.mubr.msk.f32.mxu1 %vm4095_vm0, %v4094_v1  ;;  %v508_v60 = vshrl.u32 %v507_v55, 7 }
 0x57f   : > { %v510_v7 = vadd.s32 16, %v508_v60 }
 0x581   : > { %vm1211_vm10 = vcmp.lt.s32.totalorder %v510_v7, 18  ;;  %v1520_v7 = vld [vmem:[#allocation11 + $0x38] sm:$0xff] }
 0x582   : > { %v2682_v12 = vsel %vm1211_vm10, 1.0, %v4094_v1 }
 0x641   : > { %v1175_v50 = vpop.f32.mrb[6].mxu1 }
 0x642   : > { %v1195_v52 = vmul.f32 %v2679_v49, %v1175_v50  ;;  %v1177_v53 = vpop.f32.mrb[7].mxu1 }
 0x644   : > { %v1203_v54 = vadd.f32 %v2681_v51, %v1195_v52 }
 0x646   : > { %v1206_v56 = vmax.f32 %v1203_v54, 0.0 }
 0x648   : > { %v1180_v57 = vpop.f32.mrb[8].mxu1  ;;  %1221 = vst [vmem:[#allocation2 + $0x8] sm:$0xff] %v1206_v56 }
 0x649   : > { %v1196_v58 = vmul.f32 %v2679_v49, %v1180_v57  ;;  %v1182_v59 = vpop.f32.mrb[9].mxu1 }
 0x64b   : > { %v1204_v63 = vadd.f32 %v2681_v51, %v1196_v58 }
 0x64d   : > { %v1207_v6 = vmax.f32 %v1204_v63, 0.0 }
 0x64f   : > { %1222 = vst [vmem:[#allocation2 + $0x10] sm:$0xff] %v1207_v6  ;;  %v1185_v8 = vpop.f32.mrb[10].mxu1  ;;  %v1224_v38 = vld [vmem:[#allocation2 + $0x7] sm:$0xff] }
 0x650   : > { %v1197_v9 = vmul.f32 %v2679_v49, %v1185_v8  ;;  %v1187_v10 = vpop.f32.mrb[11].mxu1  ;;  %v1518_v49 = vld [vmem:[#allocation11 + $0x28] sm:$0xff] }
 0x651   : > { %v3406_v52 = vpack.c.bf16 %v1518_v49, %v1517_v48  ;;  %v1548_v10 = vld [vmem:[#allocation11 + $0x118] sm:$0xff]  ;;  %v1555_v48 = vld [vmem:[#allocation11 + $0x150] sm:$0xff] }
 0x652   : > { %v1205_v11 = vadd.f32 %v2681_v51, %v1197_v9  ;;  %v1547_v9 = vld [vmem:[#allocation11 + $0x110] sm:$0xff]  ;;  %v1556_v49 = vld [vmem:[#allocation11 + $0x158] sm:$0xff] }
 0x654   : > { %v1208_v13 = vmax.f32 %v1205_v11, 0.0  ;;  %v3432_v11 = vpack.c.bf16 %v1548_v10, %v1547_v9 }
 0x656   : > { %v1236_v14 = vld [vmem:[#allocation2 + $0xb] sm:$0xff]  ;;  %v1220_v16 = vmul.f32 %v2682_v12, %v1208_v13  ;;  %v1537_v12 = vld [vmem:[#allocation11 + $0xc0] sm:$0xff] }
 0x657   : > { %v1233_v15 = vld [vmem:[#allocation2 + $0xa] sm:$0xff]  ;;  %3087 = vmatmul.mubr.msk.f32.vlgmr.msra.gmra.mrb[12].mxu1 %vm741_vm8, %v1236_v14 }
 0x658   : > { %v3753_v17 = vpack.i.bf16 %v1206_v56, %v1233_v15  ;;  %3089 = vmatprep.mubr.msk.f32.mxu1 %vm4095_vm0, %v4094_v1  ;;  %1223 = vst [vmem:[#allocation2 + $0x18] sm:$0xff] %v1220_v16  ;;  %3430 = vmatpush3.bf16.msra.mxu1 %v3429_v29  ;;  %v1230_v37 = vld [vmem:[#allocation2 + $0x9] sm:$0xff]  ;;  %v1521_v15 = vld [vmem:[#allocation11 + $0x40] sm:$0xff] }
 0x659   : > { %3431 = vmatprep.subr.bf16.mxu1 %v4093_v0  ;;  %v1225_v57 = vld [vmem:[#allocation2 + $0xf] sm:$0xff] }
 0x65a   : > { %3754 = vrot.lane.b32.xlu0 %v3753_v17, %s4099_s29  ;;  %v1538_v13 = vld [vmem:[#allocation11 + $0xc8] sm:$0xff]  ;;  %v1551_v29 = vld [vmem:[#allocation11 + $0x130] sm:$0xff] }
 0x65b   : > { %v3412_v14 = vpack.c.bf16 %v1538_v13, %v1537_v12 }
 0x65c   : > { %3433 = vmatpush3.bf16.msra.mxu1 %v3432_v11 }
 0x65d   : > { %3434 = vmatprep.subr.bf16.mxu1 %v4093_v0 }
 0x65f   : > { %v1237_v18 = vld [vmem:[#allocation2 + $0x13] sm:$0xff]  ;;  %v1238_v23 = vld [vmem:[#allocation2 + $0x1b] sm:$0xff] }
 0x660   : > { %v1234_v19 = vld [vmem:[#allocation2 + $0x12] sm:$0xff]  ;;  %v1235_v20 = vld [vmem:[#allocation2 + $0x1a] sm:$0xff]  ;;  %3090 = vmatmul.mubr.msk.f32.gmra.mrb[14].mxu1 %vm741_vm8, %v1237_v18 }
 0x661   : > { %v3758_v21 = vpack.i.bf16 %v1207_v6, %v1234_v19  ;;  %v3763_v22 = vpack.i.bf16 %v1220_v16, %v1235_v20  ;;  %3092 = vmatprep.mubr.msk.f32.mxu1 %vm4095_vm0, %v4094_v1  ;;  %v1231_v56 = vld [vmem:[#allocation2 + $0x11] sm:$0xff]  ;;  %v1232_v61 = vld [vmem:[#allocation2 + $0x19] sm:$0xff]  ;;  %v1522_v16 = vld [vmem:[#allocation11 + $0x48] sm:$0xff] }
 0x662   : > { %v1226_v63 = vld [vmem:[#allocation2 + $0x17] sm:$0xff]  ;;  %v3414_v17 = vpack.c.bf16 %v1522_v16, %v1521_v15  ;;  %v1549_v18 = vld [vmem:[#allocation11 + $0x120] sm:$0xff]  ;;  %v1550_v19 = vld [vmem:[#allocation11 + $0x128] sm:$0xff] }
 0x663   : > { %3759 = vrot.lane.b32.xlu1 %v3758_v21, %s4099_s29  ;;  %3764 = vrot.lane.b32.xlu0 %v3763_v22, %s4099_s29  ;;  %v1519_v6 = vld [vmem:[#allocation11 + $0x30] sm:$0xff]  ;;  %v3435_v21 = vpack.c.bf16 %v1550_v19, %v1549_v18  ;;  %v1757_v15 = vld [vmem:[#allocation12 + $0x8] sm:$0xff]  ;;  %v1775_v18 = vld [vmem:[#allocation12 + $0x98] sm:$0xff] }
 0x664   : > { %3093 = vmatmul.mubr.msk.f32.gmra.mrb[16].mxu1 %vm741_vm8, %v1238_v23  ;;  %v3410_v8 = vpack.c.bf16 %v1520_v7, %v1519_v6  ;;  %v1539_v22 = vld [vmem:[#allocation11 + $0xd0] sm:$0xff]  ;;  %v1540_v23 = vld [vmem:[#allocation11 + $0xd8] sm:$0xff] }
 0x665   : > { %3127 = vmatprep.mubr.msk.f32.mxu1 %vm4095_vm0, %v4094_v1  ;;  %v3398_v1 = vpack.c.bf16 %v1514_v31, %v1513_v30  ;;  %v3416_v25 = vpack.c.bf16 %v1540_v23, %v1539_v22  ;;  %3436 = vmatpush3.bf16.msra.mxu1 %v3435_v21  ;;  %v1552_v30 = vld [vmem:[#allocation11 + $0x138] sm:$0xff] }
 0x666   : > { %3437 = vmatprep.subr.bf16.mxu1 %v4093_v0  ;;  %v3438_v31 = vpack.c.bf16 %v1552_v30, %v1551_v29 }
 0x669   : > { %3439 = vmatpush3.bf16.msra.mxu1 %v3438_v31 }
 0x66a   : > { %3440 = vmatprep.subr.bf16.mxu1 %v4093_v0 }
 0x6cc   : > { %v3755_v32 = vpop.permute.xlu0 %3754 }
 0x6cd   : > { %v3757_v35 = vunpack.i.h.bf16 %v3755_v32  ;;  %v3756_v36 = vunpack.i.l.bf16 %v3755_v32  ;;  %v1541_v32 = vld [vmem:[#allocation11 + $0xe0] sm:$0xff] }
 0x6ce   : > { %v3420_v34 = vpack.c.bf16 %v1542_v33, %v1541_v32  ;;  %v4656_v33 = vld [vmem:[#allocation2] sm:$0xff] }
 0x6cf   : > { %v1266_v39 = vsel %vm741_vm8, %v1230_v37, %v3756_v36  ;;  %v1263_v40 = vsel %vm741_vm8, %v1224_v38, %v3757_v35  ;;  %v1525_v35 = vld [vmem:[#allocation11 + $0x60] sm:$0xff]  ;;  %v1526_v36 = vld [vmem:[#allocation11 + $0x68] sm:$0xff] }
 0x6d0   : > { %1382 = vmatprep.mubr.f32.mxu0 %v1266_v39  ;;  %v3422_v37 = vpack.c.bf16 %v1526_v36, %v1525_v35  ;;  %v1553_v38 = vld [vmem:[#allocation11 + $0x140] sm:$0xff] }
 0x6d1   : > { %1383 = vmatmul.mubr.f32.vlgmr.msra.gmra.mrb[12].mxu0 %v1263_v40  ;;  %v1543_v40 = vld [vmem:[#allocation11 + $0xf0] sm:$0xff] }
 0x6d2   : > { %3399 = vmatpush3.bf16.msra.mxu0 %v3398_v1  ;;  %v1554_v1 = vld [vmem:[#allocation11 + $0x148] sm:$0xff] }
 0x6d3   : > { %3401 = vmatprep.subr.bf16.mxu0 %v3400_v41  ;;  %v3441_v39 = vpack.c.bf16 %v1554_v1, %v1553_v38  ;;  %v1544_v41 = vld [vmem:[#allocation11 + $0xf8] sm:$0xff] }
 0x6d4   : > { %v3424_v42 = vpack.c.bf16 %v1544_v41, %v1543_v40  ;;  %v1759_v38 = vld [vmem:[#allocation12 + $0x18] sm:$0xff]  ;;  %v1789_v40 = vld [vmem:[#allocation12 + $0x108] sm:$0xff] }
 0x6d5   : > { %v3760_v50 = vpop.permute.xlu1 %3759  ;;  %v3765_v51 = vpop.permute.xlu0 %3764  ;;  %3442 = vmatpush3.bf16.msra.mxu1 %v3441_v39  ;;  %v1788_v39 = vld [vmem:[#allocation12 + $0x100] sm:$0xff] }
 0x6d6   : > { %3403 = vmatpush3.bf16.msra.mxu0 %v3402_v46  ;;  %v3762_v53 = vunpack.i.h.bf16 %v3760_v50  ;;  %v3761_v54 = vunpack.i.l.bf16 %v3760_v50  ;;  %v3766_v55 = vunpack.i.l.bf16 %v3765_v51  ;;  %v3767_v60 = vunpack.i.h.bf16 %v3765_v51  ;;  %3443 = vmatprep.subr.bf16.mxu1 %v4093_v0 }
 0x6d7   : > { %3405 = vmatprep.subr.bf16.mxu0 %v3404_v47  ;;  %v3426_v46 = vpack.c.bf16 %v1528_v44, %v1527_v43  ;;  %v3444_v50 = vpack.c.bf16 %v1556_v49, %v1555_v48  ;;  %v3485_v41 = vpack.c.bf16 %v1789_v40, %v1788_v39  ;;  %v1777_v43 = vld [vmem:[#allocation12 + $0xa8] sm:$0xff]  ;;  %v1760_v44 = vld [vmem:[#allocation12 + $0x20] sm:$0xff]  ;;  %v1791_v48 = vld [vmem:[#allocation12 + $0x118] sm:$0xff] }
 0x6d8   : > { %v1267_v58 = vsel %vm741_vm8, %v1231_v56, %v3761_v54  ;;  %v1264_v59 = vsel %vm741_vm8, %v1225_v57, %v3762_v53  ;;  %v1268_v62 = vsel %vm741_vm8, %v1232_v61, %v3766_v55  ;;  %v1265_v2 = vsel %vm741_vm8, %v1226_v63, %v3767_v60  ;;  %v1557_v53 = vld [vmem:[#allocation11 + $0x160] sm:$0xff]  ;;  %v1558_v54 = vld [vmem:[#allocation11 + $0x168] sm:$0xff]  ;;  %v1559_v56 = vld [vmem:[#allocation11 + $0x170] sm:$0xff] }
 0x6d9   : > { %1387 = vmatprep.mubr.f32.mxu0 %v1267_v58  ;;  %3445 = vmatpush3.bf16.msra.mxu1 %v3444_v50  ;;  %v3447_v55 = vpack.c.bf16 %v1558_v54, %v1557_v53  ;;  %v1560_v57 = vld [vmem:[#allocation11 + $0x178] sm:$0xff]  ;;  %v1773_v60 = vld [vmem:[#allocation12 + $0x88] sm:$0xff]  ;;  %v1762_v53 = vld [vmem:[#allocation12 + $0x30] sm:$0xff] }
 0x6da   : > { %3407 = vmatpush3.bf16.msra.mxu0 %v3406_v52  ;;  %3446 = vmatprep.subr.bf16.mxu1 %v4093_v0  ;;  %v3450_v58 = vpack.c.bf16 %v1560_v57, %v1559_v56  ;;  %v1792_v57 = vld [vmem:[#allocation12 + $0x120] sm:$0xff] }
 0x6db   : > { %1388 = vmatmul.mubr.f32.gmra.mrb[14].mxu0 %v1264_v59  ;;  %3409 = vmatprep.subr.bf16.mxu0 %v3408_v5  ;;  %v1772_v59 = vld [vmem:[#allocation12 + $0x80] sm:$0xff]  ;;  %v2689_v5 = vld [vmem:[%s4788_s10 + $0x11] ss:$0 sm:$0xff] }
 0x6dc   : > { %1392 = vmatprep.mubr.f32.mxu0 %v1268_v62  ;;  %v3452_v61 = vpack.c.bf16 %v1773_v60, %v1772_v59  ;;  %v1780_v60 = vld [vmem:[#allocation12 + $0xc0] sm:$0xff] }
 0x6dd   : > { %3448 = vmatpush3.bf16.msra.mxu1 %v3447_v55  ;;  %v1763_v55 = vld [vmem:[#allocation12 + $0x38] sm:$0xff] }
 0x6de   : > { %3411 = vmatpush3.bf16.msra.mxu0 %v3410_v8  ;;  %3449 = vmatprep.subr.bf16.mxu1 %v4093_v0  ;;  %v3466_v56 = vpack.c.bf16 %v1763_v55, %v1762_v53 }
 0x6df   : > { %1393 = vmatmul.mubr.f32.gmra.mrb[16].mxu0 %v1265_v2  ;;  %3413 = vmatprep.subr.bf16.mxu0 %v3412_v14  ;;  %v1756_v14 = vld [vmem:[#allocation12] sm:$0xff] }
 0x6e0   : > { %v3454_v21 = vpack.c.bf16 %v1757_v15, %v1756_v14  ;;  %v1797_v14 = vld [vmem:[#allocation12 + $0x148] sm:$0xff] }
 0x6e1   : > { %3451 = vmatpush3.bf16.msra.mxu1 %v3450_v58  ;;  %v1793_v58 = vld [vmem:[#allocation12 + $0x128] sm:$0xff] }
 0x6e2   : > { %3415 = vmatpush3.bf16.msra.mxu0 %v3414_v17  ;;  %3484 = vmatprep.subr.bf16.mxu1 %v4093_v0  ;;  %v1774_v17 = vld [vmem:[#allocation12 + $0x90] sm:$0xff]  ;;  %v3491_v59 = vpack.c.bf16 %v1793_v58, %v1792_v57 }
 0x6e3   : > { %3417 = vmatprep.subr.bf16.mxu0 %v3416_v25 }
 0x6e6   : > { %3419 = vmatpush3.bf16.msra.mxu0 %v3418_v28 }
 0x6e7   : > { %3421 = vmatprep.subr.bf16.mxu0 %v3420_v34 }
 0x6ea   : > { %3423 = vmatpush3.bf16.msra.mxu0 %v3422_v37  ;;  %v1758_v37 = vld [vmem:[#allocation12 + $0x10] sm:$0xff] }
 0x6eb   : > { %3425 = vmatprep.subr.bf16.mxu0 %v3424_v42  ;;  %v3458_v1 = vpack.c.bf16 %v1759_v38, %v1758_v37  ;;  %v1776_v42 = vld [vmem:[#allocation12 + $0xa0] sm:$0xff] }
 0x6ec   : > { %v2015_v38 = vld [vmem:[#allocation14 + $0x80] sm:$0xff] }
 0x6ee   : > { %3427 = vmatpush3.bf16.msra.mxu0 %v3426_v46  ;;  %v1761_v46 = vld [vmem:[#allocation12 + $0x28] sm:$0xff] }
 0x6ef   : > { %3453 = vmatprep.subr.bf16.mxu0 %v3452_v61  ;;  %v3462_v49 = vpack.c.bf16 %v1761_v46, %v1760_v44  ;;  %v1781_v61 = vld [vmem:[#allocation12 + $0xc8] sm:$0xff]  ;;  %v2691_v44 = vld [vmem:[%s4788_s10 + $0x14] ss:$0 sm:$0xff] }
 0x72a   : > { %v4641_v20 = vpop.f32.mrb[12].mxu1 }
 0x72b   : > { %v3088_v24 = vpop.f32.mrb[13].mxu1 }
 0x72c   : > { %v3456_v24 = vpack.c.bf16 %v1775_v18, %v1774_v17  ;;  %v1785_v17 = vld [vmem:[#allocation12 + $0xe8] sm:$0xff] }
 0x733   : > { %v1469_v45 = vpop.f32.mrb[14].mxu1 }
 0x734   : > { %v3091_v47 = vpop.f32.mrb[15].mxu1 }
 0x735   : > { %v1790_v47 = vld [vmem:[#allocation12 + $0x110] sm:$0xff] }
 0x736   : > { %v3488_v50 = vpack.c.bf16 %v1791_v48, %v1790_v47 }
 0x737   : > { %v1474_v51 = vpop.f32.mrb[16].mxu1 }
 0x738   : > { %v3094_v52 = vpop.f32.mrb[17].mxu1 }
 0x739   : > { %v1779_v52 = vld [vmem:[#allocation12 + $0xb8] sm:$0xff] }
 0x7a4   : > { %v2762_v62 = vpop.f32.mrb[12].mxu0 }
 0x7a5   : > { %v2763_v63 = vpop.f32.mrb[13].mxu0 }
 0x7a6   : > { %v2764_v2 = vadd.f32 %v2763_v63, %v2762_v62  ;;  %v3468_v62 = vpack.c.bf16 %v1781_v61, %v1780_v60  ;;  %v1764_v63 = vld [vmem:[#allocation12 + $0x40] sm:$0xff] }
 0x7a8   : > { %v1465_v4 = vadd.f32 %v2764_v2, %v4641_v20  ;;  %v1765_v2 = vld [vmem:[#allocation12 + $0x48] sm:$0xff] }
 0x7aa   : > { %v1484_v6 = vmul.f32 %v2687_v3, %v1465_v4  ;;  %v1794_v4 = vld [vmem:[#allocation12 + $0x130] sm:$0xff] }
 0x7ac   : > { %v1492_v7 = vadd.f32 %v2689_v5, %v1484_v6 }
 0x7ae   : > { %v1495_v8 = vmax.f32 %v1492_v7, 0.0  ;;  %v2765_v9 = vpop.f32.mrb[14].mxu0  ;;  %v1782_v7 = vld [vmem:[#allocation12 + $0xd0] sm:$0xff] }
 0x7af   : > { %v2766_v10 = vpop.f32.mrb[15].mxu0 }
 0x7b0   : > { %1501 = vst [vmem:[#allocation2 + $0x8] sm:$0xff] %v1495_v8  ;;  %v2767_v11 = vadd.f32 %v2766_v10, %v2765_v9  ;;  %1625 = vmatprep.mubr.f32.mxu0 %v1495_v8  ;;  %v1783_v8 = vld [vmem:[#allocation12 + $0xd8] sm:$0xff]  ;;  %v1766_v10 = vld [vmem:[#allocation12 + $0x50] sm:$0xff] }
 0x7b1   : > { %v3472_v9 = vpack.c.bf16 %v1783_v8, %v1782_v7 }
 0x7b2   : > { %v1470_v12 = vadd.f32 %v2767_v11, %v1469_v45  ;;  %v2768_v13 = vpop.f32.mrb[16].mxu0  ;;  %v3460_v45 = vpack.c.bf16 %v1777_v43, %v1776_v42  ;;  %v1767_v11 = vld [vmem:[#allocation12 + $0x58] sm:$0xff] }
 0x7b3   : > { %v2769_v16 = vpop.f32.mrb[17].mxu0 }
 0x7b4   : > { %v1485_v19 = vmul.f32 %v2687_v3, %v1470_v12  ;;  %v2770_v20 = vadd.f32 %v2769_v16, %v2768_v13  ;;  %v3474_v12 = vpack.c.bf16 %v1767_v11, %v1766_v10  ;;  %v1796_v13 = vld [vmem:[#allocation12 + $0x140] sm:$0xff] }
 0x7b5   : > { %v3497_v15 = vpack.c.bf16 %v1797_v14, %v1796_v13  ;;  %v1784_v16 = vld [vmem:[#allocation12 + $0xe0] sm:$0xff]  ;;  %v2002_v13 = vld [vmem:[#allocation14 + $0x18] sm:$0xff] }
 0x7b6   : > { %v1493_v22 = vadd.f32 %v2689_v5, %v1485_v19  ;;  %v1475_v23 = vadd.f32 %v2770_v20, %v1474_v51  ;;  %v1778_v51 = vld [vmem:[#allocation12 + $0xb0] sm:$0xff]  ;;  %v3476_v18 = vpack.c.bf16 %v1785_v17, %v1784_v16  ;;  %v1768_v19 = vld [vmem:[#allocation12 + $0x60] sm:$0xff]  ;;  %v1769_v20 = vld [vmem:[#allocation12 + $0x68] sm:$0xff] }
 0x7b7   : > { %v1504_v25 = vld [vmem:[#allocation2 + $0x7] sm:$0xff]  ;;  %v3464_v54 = vpack.c.bf16 %v1779_v52, %v1778_v51 }
 0x7b8   : > { %v1496_v26 = vmax.f32 %v1493_v22, 0.0  ;;  %v1486_v27 = vmul.f32 %v2687_v3, %v1475_v23  ;;  %1626 = vmatmul.mubr.f32.vlgmr.msra.gmra.mrb[18].mxu0 %v1504_v25  ;;  %v3470_v3 = vpack.c.bf16 %v1765_v2, %v1764_v63  ;;  %v1798_v22 = vld [vmem:[#allocation12 + $0x150] sm:$0xff]  ;;  %v1799_v23 = vld [vmem:[#allocation12 + $0x158] sm:$0xff]  ;;  %v2031_v16 = vld [vmem:[#allocation14 + $0x100] sm:$0xff] }
 0x7b9   : > { %3455 = vmatpush3.bf16.msra.mxu0 %v3454_v21  ;;  %v3478_v21 = vpack.c.bf16 %v1769_v20, %v1768_v19  ;;  %v1786_v25 = vld [vmem:[#allocation12 + $0xf0] sm:$0xff]  ;;  %v2019_v19 = vld [vmem:[#allocation14 + $0xa0] sm:$0xff]  ;;  %v2020_v20 = vld [vmem:[#allocation14 + $0xa8] sm:$0xff] }
 0x7ba   : > { %1502 = vst [vmem:[#allocation2 + $0x10] sm:$0xff] %v1496_v26  ;;  %v1494_v28 = vadd.f32 %v2689_v5, %v1486_v27  ;;  %1630 = vmatprep.mubr.f32.mxu0 %v1496_v26  ;;  %3457 = vmatprep.subr.bf16.mxu0 %v3456_v24  ;;  %v1795_v5 = vld [vmem:[#allocation12 + $0x138] sm:$0xff]  ;;  %v3500_v24 = vpack.c.bf16 %v1799_v23, %v1798_v22 }
 0x7bb   : > { %v3494_v6 = vpack.c.bf16 %v1795_v5, %v1794_v4  ;;  %v1787_v26 = vld [vmem:[#allocation12 + $0xf8] sm:$0xff]  ;;  %v2000_v4 = vld [vmem:[#allocation14 + $0x8] sm:$0xff]  ;;  %v2017_v5 = vld [vmem:[#allocation14 + $0x90] sm:$0xff]  ;;  %v3516_v23 = vpack.c.bf16 %v2020_v20, %v2019_v19 }
 0x7bc   : > { %v1497_v29 = vmax.f32 %v1494_v28, 0.0  ;;  %v3480_v27 = vpack.c.bf16 %v1787_v26, %v1786_v25  ;;  %v1770_v28 = vld [vmem:[#allocation12 + $0x70] sm:$0xff]  ;;  %v2046_v19 = vld [vmem:[#allocation14 + $0x178] sm:$0xff] }
 0x7bd   : > { %3459 = vmatpush3.bf16.msra.mxu0 %v3458_v1  ;;  %v2016_v1 = vld [vmem:[#allocation14 + $0x88] sm:$0xff] }
 0x7be   : > { %v1500_v30 = vmul.f32 0.0, %v1497_v29  ;;  %3461 = vmatprep.subr.bf16.mxu0 %v3460_v45  ;;  %v1771_v29 = vld [vmem:[#allocation12 + $0x78] sm:$0xff]  ;;  %v3508_v39 = vpack.c.bf16 %v2016_v1, %v2015_v38  ;;  %v2005_v38 = vld [vmem:[#allocation14 + $0x30] sm:$0xff] }
 0x7c0   : > { %1503 = vst [vmem:[#allocation2 + $0x18] sm:$0xff] %v1500_v30 }
 0x7c1   : > { %v1510_v31 = vld [vmem:[#allocation2 + $0x9] sm:$0xff]  ;;  %3463 = vmatpush3.bf16.msra.mxu0 %v3462_v49  ;;  %v2693_v49 = vld [vmem:[%s4788_s10 + $0x15] ss:$0 sm:$0xff] }
 0x7c2   : > { %v1505_v32 = vld [vmem:[#allocation2 + $0xf] sm:$0xff]  ;;  %3128 = vmatmul.mubr.f32.vlgmr.msra.gmra.mrb[18].mxu1 %v1510_v31  ;;  %3465 = vmatprep.subr.bf16.mxu0 %v3464_v54  ;;  %v1800_v31 = vld [vmem:[#allocation12 + $0x160] sm:$0xff] }
 0x7c3   : > { %1631 = vmatmul.mubr.f32.gmra.mrb[20].mxu0 %v1505_v32  ;;  %3130 = vmatprep.mubr.msk.f32.mxu1 %vm4095_vm0, %v4656_v33  ;;  %v1801_v32 = vld [vmem:[#allocation12 + $0x168] sm:$0xff] }
 0x7c4   : > { %1635 = vmatprep.mubr.f32.mxu0 %v1500_v30  ;;  %3486 = vmatpush3.bf16.msra.mxu1 %v3485_v41  ;;  %v3482_v30 = vpack.c.bf16 %v1771_v29, %v1770_v28  ;;  %v2003_v29 = vld [vmem:[#allocation14 + $0x20] sm:$0xff] }
 0x7c5   : > { %3487 = vmatprep.subr.bf16.mxu1 %v4093_v0  ;;  %3467 = vmatpush3.bf16.msra.mxu0 %v3466_v56 }
 0x7c6   : > { %3469 = vmatprep.subr.bf16.mxu0 %v3468_v62 }
 0x7c7   : > { %v1511_v34 = vld [vmem:[#allocation2 + $0x11] sm:$0xff]  ;;  %v1512_v36 = vld [vmem:[#allocation2 + $0x19] sm:$0xff] }
 0x7c8   : > { %v1506_v35 = vld [vmem:[#allocation2 + $0x17] sm:$0xff]  ;;  %3131 = vmatmul.mubr.f32.gmra.mrb[20].mxu1 %v1511_v34  ;;  %v3503_v34 = vpack.c.bf16 %v1801_v32, %v1800_v31 }
 0x7c9   : > { %1636 = vmatmul.mubr.f32.gmra.mrb[22].mxu0 %v1506_v35  ;;  %3133 = vmatprep.mubr.msk.f32.mxu1 %vm4095_vm0, %v4656_v33  ;;  %v1802_v35 = vld [vmem:[#allocation12 + $0x170] sm:$0xff] }
 0x7ca   : > { %3489 = vmatpush3.bf16.msra.mxu1 %v3488_v50  ;;  %3471 = vmatpush3.bf16.msra.mxu0 %v3470_v3  ;;  %v1999_v3 = vld [vmem:[#allocation14] sm:$0xff]  ;;  %v2033_v32 = vld [vmem:[#allocation14 + $0x110] sm:$0xff] }
 0x7cb   : > { %3490 = vmatprep.subr.bf16.mxu1 %v4093_v0  ;;  %3473 = vmatprep.subr.bf16.mxu0 %v3472_v9  ;;  %v3510_v9 = vpack.c.bf16 %v2000_v4, %v1999_v3  ;;  %v2011_v3 = vld [vmem:[#allocation14 + $0x60] sm:$0xff]  ;;  %v2012_v4 = vld [vmem:[#allocation14 + $0x68] sm:$0xff] }
 0x7cc   : > { %3134 = vmatmul.mubr.f32.gmra.mrb[22].mxu1 %v1512_v36  ;;  %v1803_v36 = vld [vmem:[#allocation12 + $0x178] sm:$0xff] }
 0x7cd   : > { %3168 = vmatprep.mubr.msk.f32.mxu1 %vm4095_vm0, %v4656_v33  ;;  %v3506_v37 = vpack.c.bf16 %v1803_v36, %v1802_v35  ;;  %v2021_v36 = vld [vmem:[#allocation14 + $0xb0] sm:$0xff] }
 0x7ce   : > { %3492 = vmatpush3.bf16.msra.mxu1 %v3491_v59  ;;  %3475 = vmatpush3.bf16.msra.mxu0 %v3474_v12  ;;  %v2001_v12 = vld [vmem:[#allocation14 + $0x10] sm:$0xff] }
 0x7cf   : > { %3493 = vmatprep.subr.bf16.mxu1 %v4093_v0  ;;  %3477 = vmatprep.subr.bf16.mxu0 %v3476_v18  ;;  %v3514_v17 = vpack.c.bf16 %v2002_v13, %v2001_v12  ;;  %v2032_v18 = vld [vmem:[#allocation14 + $0x108] sm:$0xff]  ;;  %v2013_v12 = vld [vmem:[#allocation14 + $0x70] sm:$0xff]  ;;  %v2014_v13 = vld [vmem:[#allocation14 + $0x78] sm:$0xff] }
 0x7d0   : > { %v3541_v22 = vpack.c.bf16 %v2032_v18, %v2031_v16  ;;  %v2044_v16 = vld [vmem:[#allocation14 + $0x168] sm:$0xff]  ;;  %v2045_v18 = vld [vmem:[#allocation14 + $0x170] sm:$0xff] }
 0x7d1   : > { %v3562_v20 = vpack.c.bf16 %v2046_v19, %v2045_v18  ;;  %v2264_v19 = vld [vmem:[#allocation15 + $0xb0] sm:$0xff] }
 0x7d2   : > { %3495 = vmatpush3.bf16.msra.mxu1 %v3494_v6  ;;  %3479 = vmatpush3.bf16.msra.mxu0 %v3478_v21  ;;  %v2018_v6 = vld [vmem:[#allocation14 + $0x98] sm:$0xff] }
 0x7d3   : > { %3496 = vmatprep.subr.bf16.mxu1 %v4093_v0  ;;  %3481 = vmatprep.subr.bf16.mxu0 %v3480_v27  ;;  %v3512_v11 = vpack.c.bf16 %v2018_v6, %v2017_v5  ;;  %v3534_v5 = vpack.c.bf16 %v2012_v4, %v2011_v3  ;;  %v2041_v6 = vld [vmem:[#allocation14 + $0x150] sm:$0xff]  ;;  %v2262_v3 = vld [vmem:[#allocation15 + $0xa0] sm:$0xff]  ;;  %v2263_v4 = vld [vmem:[#allocation15 + $0xa8] sm:$0xff] }
 0x7d6   : > { %3498 = vmatpush3.bf16.msra.mxu1 %v3497_v15  ;;  %3483 = vmatpush3.bf16.msra.mxu0 %v3482_v30  ;;  %v2004_v30 = vld [vmem:[#allocation14 + $0x28] sm:$0xff] }
 0x7d7   : > { %3499 = vmatprep.subr.bf16.mxu1 %v4093_v0  ;;  %3509 = vmatprep.subr.bf16.mxu0 %v3508_v39  ;;  %v3518_v31 = vpack.c.bf16 %v2004_v30, %v2003_v29  ;;  %v2006_v39 = vld [vmem:[#allocation14 + $0x38] sm:$0xff] }
 0x7da   : > { %3501 = vmatpush3.bf16.msra.mxu1 %v3500_v24 }
 0x7db   : > { %3502 = vmatprep.subr.bf16.mxu1 %v4093_v0 }
 0x7de   : > { %3504 = vmatpush3.bf16.msra.mxu1 %v3503_v34  ;;  %v2034_v34 = vld [vmem:[#allocation14 + $0x118] sm:$0xff] }
 0x7df   : > { %3505 = vmatprep.subr.bf16.mxu1 %v4093_v0  ;;  %v3544_v35 = vpack.c.bf16 %v2034_v34, %v2033_v32  ;;  %v2697_v34 = vld [vmem:[%s4788_s10 + $0x19] ss:$0 sm:$0xff] }
 0x7e2   : > { %3507 = vmatpush3.bf16.msra.mxu1 %v3506_v37  ;;  %v2022_v37 = vld [vmem:[#allocation14 + $0xb8] sm:$0xff] }
 0x7e3   : > { %3540 = vmatprep.subr.bf16.mxu1 %v4093_v0  ;;  %v3520_v1 = vpack.c.bf16 %v2022_v37, %v2021_v36 }
 0x88b   : > { %v2814_v40 = vpop.f32.mrb[18].mxu0 }
 0x88c   : > { %v2815_v41 = vpop.f32.mrb[19].mxu0 }
 0x88d   : > { %v2816_v42 = vadd.f32 %v2815_v41, %v2814_v40  ;;  %v3522_v40 = vpack.c.bf16 %v2006_v39, %v2005_v38  ;;  %v2035_v41 = vld [vmem:[#allocation14 + $0x120] sm:$0xff] }
 0x895   : > { %v1707_v43 = vpop.f32.mrb[18].mxu1 }
 0x896   : > { %v2817_v45 = vpop.f32.mrb[20].mxu0  ;;  %v1708_v46 = vadd.f32 %v2816_v42, %v1707_v43  ;;  %v3129_v47 = vpop.f32.mrb[19].mxu1  ;;  %v2036_v42 = vld [vmem:[#allocation14 + $0x128] sm:$0xff] }
 0x897   : > { %v2818_v48 = vpop.f32.mrb[21].mxu0  ;;  %v3547_v43 = vpack.c.bf16 %v2036_v42, %v2035_v41  ;;  %v2007_v47 = vld [vmem:[#allocation14 + $0x40] sm:$0xff] }
 0x898   : > { %v2819_v50 = vadd.f32 %v2818_v48, %v2817_v45  ;;  %v1727_v51 = vmul.f32 %v2691_v44, %v1708_v46  ;;  %v2024_v45 = vld [vmem:[#allocation14 + $0xc8] sm:$0xff] }
 0x899   : > { %v2008_v48 = vld [vmem:[#allocation14 + $0x48] sm:$0xff] }
 0x89a   : > { %v1735_v52 = vadd.f32 %v2693_v49, %v1727_v51  ;;  %v2038_v51 = vld [vmem:[#allocation14 + $0x138] sm:$0xff] }
 0x89b   : > { %v1712_v53 = vpop.f32.mrb[20].mxu1 }
 0x89c   : > { %v2820_v54 = vpop.f32.mrb[22].mxu0  ;;  %v1738_v55 = vmax.f32 %v1735_v52, 0.0  ;;  %v1713_v56 = vadd.f32 %v2819_v50, %v1712_v53  ;;  %v3132_v57 = vpop.f32.mrb[21].mxu1  ;;  %v2037_v50 = vld [vmem:[#allocation14 + $0x130] sm:$0xff] }
 0x89d   : > { %v2821_v58 = vpop.f32.mrb[23].mxu0  ;;  %v3550_v52 = vpack.c.bf16 %v2038_v51, %v2037_v50  ;;  %v2025_v53 = vld [vmem:[#allocation14 + $0xd0] sm:$0xff]  ;;  %v2010_v57 = vld [vmem:[#allocation14 + $0x58] sm:$0xff]  ;;  %v2243_v50 = vld [vmem:[#allocation15 + $0x8] sm:$0xff] }
 0x89e   : > { %v2822_v59 = vadd.f32 %v2821_v58, %v2820_v54  ;;  %1744 = vst [vmem:[#allocation2 + $0x8] sm:$0xff] %v1738_v55  ;;  %v1728_v60 = vmul.f32 %v2691_v44, %v1713_v56  ;;  %1868 = vmatprep.mubr.f32.mxu0 %v1738_v55  ;;  %v2026_v54 = vld [vmem:[#allocation14 + $0xd8] sm:$0xff]  ;;  %v2009_v56 = vld [vmem:[#allocation14 + $0x50] sm:$0xff] }
 0x89f   : > { %v1717_v61 = vpop.f32.mrb[22].mxu1  ;;  %v3528_v55 = vpack.c.bf16 %v2026_v54, %v2025_v53  ;;  %v3530_v58 = vpack.c.bf16 %v2010_v57, %v2009_v56  ;;  %v2260_v51 = vld [vmem:[#allocation15 + $0x90] sm:$0xff] }
 0x8a0   : > { %v1736_v62 = vadd.f32 %v2693_v49, %v1728_v60  ;;  %v1718_v63 = vadd.f32 %v2822_v59, %v1717_v61  ;;  %v3135_v2 = vpop.f32.mrb[23].mxu1  ;;  %v2039_v59 = vld [vmem:[#allocation14 + $0x140] sm:$0xff]  ;;  %v2040_v60 = vld [vmem:[#allocation14 + $0x148] sm:$0xff] }
 0x8a1   : > { %v3553_v61 = vpack.c.bf16 %v2040_v60, %v2039_v59  ;;  %v2245_v59 = vld [vmem:[#allocation15 + $0x18] sm:$0xff] }
 0x8a2   : > { %v1739_v7 = vmax.f32 %v1736_v62, 0.0  ;;  %v1729_v8 = vmul.f32 %v2691_v44, %v1718_v63  ;;  %v2023_v44 = vld [vmem:[#allocation14 + $0xc0] sm:$0xff]  ;;  %v2028_v63 = vld [vmem:[#allocation14 + $0xe8] sm:$0xff] }
 0x8a3   : > { %v3524_v46 = vpack.c.bf16 %v2024_v45, %v2023_v44  ;;  %v2027_v62 = vld [vmem:[#allocation14 + $0xe0] sm:$0xff] }
 0x8a4   : > { %1745 = vst [vmem:[#allocation2 + $0x10] sm:$0xff] %v1739_v7  ;;  %v1737_v10 = vadd.f32 %v2693_v49, %v1729_v8  ;;  %v3526_v49 = vpack.c.bf16 %v2008_v48, %v2007_v47  ;;  %v3532_v2 = vpack.c.bf16 %v2028_v63, %v2027_v62  ;;  %v2274_v62 = vld [vmem:[#allocation15 + $0x100] sm:$0xff] }
 0x8a5   : > { %v1747_v14 = vld [vmem:[#allocation2 + $0x7] sm:$0xff] }
 0x8a6   : > { %v1740_v15 = vmax.f32 %v1737_v10, 0.0  ;;  %1869 = vmatmul.mubr.f32.vlgmr.msra.gmra.mrb[24].mxu0 %v1747_v14  ;;  %v2030_v10 = vld [vmem:[#allocation14 + $0xf8] sm:$0xff]  ;;  %v3538_v14 = vpack.c.bf16 %v2014_v13, %v2013_v12  ;;  %v2246_v13 = vld [vmem:[#allocation15 + $0x20] sm:$0xff] }
 0x8a7   : > { %1873 = vmatprep.mubr.f32.mxu0 %v1739_v7  ;;  %3511 = vmatpush3.bf16.msra.mxu0 %v3510_v9  ;;  %v2042_v7 = vld [vmem:[#allocation14 + $0x158] sm:$0xff]  ;;  %v2029_v9 = vld [vmem:[#allocation14 + $0xf0] sm:$0xff] }
 0x8a8   : > { %v1743_v21 = vmul.f32 0.0, %v1740_v15  ;;  %3513 = vmatprep.subr.bf16.mxu0 %v3512_v11  ;;  %v3556_v8 = vpack.c.bf16 %v2042_v7, %v2041_v6  ;;  %v3536_v11 = vpack.c.bf16 %v2030_v10, %v2029_v9  ;;  %v2043_v15 = vld [vmem:[#allocation14 + $0x160] sm:$0xff]  ;;  %v3572_v7 = vpack.c.bf16 %v2263_v4, %v2262_v3  ;;  %v2289_v3 = vld [vmem:[#allocation15 + $0x178] sm:$0xff] }
 0x8aa   : > { %1746 = vst [vmem:[#allocation2 + $0x18] sm:$0xff] %v1743_v21 }
 0x8ab   : > { %v1753_v24 = vld [vmem:[#allocation2 + $0x9] sm:$0xff]  ;;  %3515 = vmatpush3.bf16.msra.mxu0 %v3514_v17  ;;  %v3559_v17 = vpack.c.bf16 %v2044_v16, %v2043_v15 }
 0x8ac   : > { %v1748_v25 = vld [vmem:[#allocation2 + $0xf] sm:$0xff]  ;;  %3169 = vmatmul.mubr.f32.vlgmr.msra.gmra.mrb[24].mxu1 %v1753_v24  ;;  %3517 = vmatprep.subr.bf16.mxu0 %v3516_v23 }
 0x8ad   : > { %1874 = vmatmul.mubr.f32.gmra.mrb[26].mxu0 %v1748_v25  ;;  %3171 = vmatprep.mubr.msk.f32.mxu1 %vm4095_vm0, %v4656_v33  ;;  %v2276_v16 = vld [vmem:[#allocation15 + $0x110] sm:$0xff] }
 0x8ae   : > { %1878 = vmatprep.mubr.f32.mxu0 %v1743_v21  ;;  %3542 = vmatpush3.bf16.msra.mxu1 %v3541_v22  ;;  %v2258_v21 = vld [vmem:[#allocation15 + $0x80] sm:$0xff]  ;;  %v2259_v22 = vld [vmem:[#allocation15 + $0x88] sm:$0xff] }
 0x8af   : > { %3543 = vmatprep.subr.bf16.mxu1 %v4093_v0  ;;  %3519 = vmatpush3.bf16.msra.mxu0 %v3518_v31  ;;  %v3564_v23 = vpack.c.bf16 %v2259_v22, %v2258_v21  ;;  %v2248_v21 = vld [vmem:[#allocation15 + $0x30] sm:$0xff] }
 0x8b0   : > { %3521 = vmatprep.subr.bf16.mxu0 %v3520_v1 }
 0x8b1   : > { %v1754_v26 = vld [vmem:[#allocation2 + $0x11] sm:$0xff]  ;;  %v1755_v28 = vld [vmem:[#allocation2 + $0x19] sm:$0xff] }
 0x8b2   : > { %v1749_v27 = vld [vmem:[#allocation2 + $0x17] sm:$0xff]  ;;  %3172 = vmatmul.mubr.f32.gmra.mrb[26].mxu1 %v1754_v26 }
 0x8b3   : > { %1879 = vmatmul.mubr.f32.gmra.mrb[28].mxu0 %v1749_v27  ;;  %3174 = vmatprep.mubr.msk.f32.mxu1 %vm4095_vm0, %v4656_v33 }
 0x8b4   : > { %3545 = vmatpush3.bf16.msra.mxu1 %v3544_v35  ;;  %3523 = vmatpush3.bf16.msra.mxu0 %v3522_v40 }
 0x8b5   : > { %3546 = vmatprep.subr.bf16.mxu1 %v4093_v0  ;;  %3525 = vmatprep.subr.bf16.mxu0 %v3524_v46 }
 0x8b6   : > { %3175 = vmatmul.mubr.f32.gmra.mrb[28].mxu1 %v1755_v28  ;;  %v2695_v28 = vld [vmem:[%s4788_s10 + $0x18] ss:$0 sm:$0xff] }
 0x8b7   : > { %3209 = vmatprep.mubr.msk.f32.mxu1 %vm4095_vm0, %v4656_v33 }
 0x8b8   : > { %3548 = vmatpush3.bf16.msra.mxu1 %v3547_v43  ;;  %3527 = vmatpush3.bf16.msra.mxu0 %v3526_v49  ;;  %v2242_v49 = vld [vmem:[#allocation15] sm:$0xff] }
 0x8b9   : > { %3549 = vmatprep.subr.bf16.mxu1 %v4093_v0  ;;  %3529 = vmatprep.subr.bf16.mxu0 %v3528_v55  ;;  %v3566_v55 = vpack.c.bf16 %v2243_v50, %v2242_v49  ;;  %v2254_v49 = vld [vmem:[#allocation15 + $0x60] sm:$0xff]  ;;  %v2255_v50 = vld [vmem:[#allocation15 + $0x68] sm:$0xff] }
 0x8bc   : > { %3551 = vmatpush3.bf16.msra.mxu1 %v3550_v52  ;;  %3531 = vmatpush3.bf16.msra.mxu0 %v3530_v58  ;;  %v2261_v52 = vld [vmem:[#allocation15 + $0x98] sm:$0xff]  ;;  %v2244_v58 = vld [vmem:[#allocation15 + $0x10] sm:$0xff] }
 0x8bd   : > { %3552 = vmatprep.subr.bf16.mxu1 %v4093_v0  ;;  %3533 = vmatprep.subr.bf16.mxu0 %v3532_v2  ;;  %v3568_v57 = vpack.c.bf16 %v2261_v52, %v2260_v51  ;;  %v3570_v63 = vpack.c.bf16 %v2245_v59, %v2244_v58  ;;  %v2275_v2 = vld [vmem:[#allocation15 + $0x108] sm:$0xff]  ;;  %v3590_v51 = vpack.c.bf16 %v2255_v50, %v2254_v49  ;;  %v2284_v52 = vld [vmem:[#allocation15 + $0x150] sm:$0xff]  ;;  %v2257_v59 = vld [vmem:[#allocation15 + $0x78] sm:$0xff] }
 0x8be   : > { %v3597_v6 = vpack.c.bf16 %v2275_v2, %v2274_v62  ;;  %v2256_v58 = vld [vmem:[#allocation15 + $0x70] sm:$0xff]  ;;  %v2287_v62 = vld [vmem:[#allocation15 + $0x168] sm:$0xff] }
 0x8bf   : > { %v2288_v2 = vld [vmem:[#allocation15 + $0x170] sm:$0xff]  ;;  %v2705_v49 = vld [vmem:[%s4788_s10 + $0x21] ss:$0 sm:$0xff] }
 0x8c0   : > { %3554 = vmatpush3.bf16.msra.mxu1 %v3553_v61  ;;  %3535 = vmatpush3.bf16.msra.mxu0 %v3534_v5  ;;  %v3618_v4 = vpack.c.bf16 %v2289_v3, %v2288_v2 }
 0x8c1   : > { %3555 = vmatprep.subr.bf16.mxu1 %v4093_v0  ;;  %3537 = vmatprep.subr.bf16.mxu0 %v3536_v11 }
 0x8c4   : > { %3557 = vmatpush3.bf16.msra.mxu1 %v3556_v8  ;;  %3539 = vmatpush3.bf16.msra.mxu0 %v3538_v14  ;;  %v2247_v14 = vld [vmem:[#allocation15 + $0x28] sm:$0xff] }
 0x8c5   : > { %3558 = vmatprep.subr.bf16.mxu1 %v4093_v0  ;;  %3565 = vmatprep.subr.bf16.mxu0 %v3564_v23  ;;  %v3574_v15 = vpack.c.bf16 %v2247_v14, %v2246_v13  ;;  %v2249_v23 = vld [vmem:[#allocation15 + $0x38] sm:$0xff] }
 0x8c8   : > { %3560 = vmatpush3.bf16.msra.mxu1 %v3559_v17  ;;  %v2277_v17 = vld [vmem:[#allocation15 + $0x118] sm:$0xff] }
 0x8c9   : > { %3561 = vmatprep.subr.bf16.mxu1 %v4093_v0  ;;  %v3600_v18 = vpack.c.bf16 %v2277_v17, %v2276_v16 }
 0x8cc   : > { %3563 = vmatpush3.bf16.msra.mxu1 %v3562_v20  ;;  %v2265_v20 = vld [vmem:[#allocation15 + $0xb8] sm:$0xff] }
 0x8cd   : > { %3596 = vmatprep.subr.bf16.mxu1 %v4093_v0  ;;  %v3576_v22 = vpack.c.bf16 %v2265_v20, %v2264_v19 }
 0x979   : > { %v2874_v24 = vpop.f32.mrb[24].mxu0 }
 0x97a   : > { %v2875_v25 = vpop.f32.mrb[25].mxu0 }
 0x97b   : > { %v2876_v26 = vadd.f32 %v2875_v25, %v2874_v24  ;;  %v3578_v24 = vpack.c.bf16 %v2249_v23, %v2248_v21  ;;  %v2278_v25 = vld [vmem:[#allocation15 + $0x120] sm:$0xff] }
 0x97f   : > { %v1950_v27 = vpop.f32.mrb[24].mxu1 }
 0x980   : > { %v2877_v29 = vpop.f32.mrb[26].mxu0  ;;  %v1951_v30 = vadd.f32 %v2876_v26, %v1950_v27  ;;  %v3170_v31 = vpop.f32.mrb[25].mxu1  ;;  %v2279_v26 = vld [vmem:[#allocation15 + $0x128] sm:$0xff] }
 0x981   : > { %v2878_v32 = vpop.f32.mrb[27].mxu0  ;;  %v3603_v27 = vpack.c.bf16 %v2279_v26, %v2278_v25  ;;  %v2250_v31 = vld [vmem:[#allocation15 + $0x40] sm:$0xff] }
 0x982   : > { %v2879_v35 = vadd.f32 %v2878_v32, %v2877_v29  ;;  %v1970_v36 = vmul.f32 %v2695_v28, %v1951_v30  ;;  %v2267_v29 = vld [vmem:[#allocation15 + $0xc8] sm:$0xff] }
 0x983   : > { %v2251_v32 = vld [vmem:[#allocation15 + $0x48] sm:$0xff] }
 0x984   : > { %v1978_v37 = vadd.f32 %v2697_v34, %v1970_v36  ;;  %v2281_v36 = vld [vmem:[#allocation15 + $0x138] sm:$0xff] }
 0x985   : > { %v1955_v38 = vpop.f32.mrb[26].mxu1 }
 0x986   : > { %v2880_v1 = vpop.f32.mrb[28].mxu0  ;;  %v1981_v39 = vmax.f32 %v1978_v37, 0.0  ;;  %v1956_v40 = vadd.f32 %v2879_v35, %v1955_v38  ;;  %v3173_v41 = vpop.f32.mrb[27].mxu1  ;;  %v2280_v35 = vld [vmem:[#allocation15 + $0x130] sm:$0xff] }
 0x987   : > { %v2881_v42 = vpop.f32.mrb[29].mxu0  ;;  %v3606_v37 = vpack.c.bf16 %v2281_v36, %v2280_v35  ;;  %v2268_v38 = vld [vmem:[#allocation15 + $0xd0] sm:$0xff]  ;;  %v2253_v41 = vld [vmem:[#allocation15 + $0x58] sm:$0xff] }
 0x988   : > { %v2882_v43 = vadd.f32 %v2881_v42, %v2880_v1  ;;  %1987 = vst [vmem:[#allocation2 + $0x8] sm:$0xff] %v1981_v39  ;;  %v1971_v44 = vmul.f32 %v2695_v28, %v1956_v40  ;;  %2111 = vmatprep.mubr.f32.mxu0 %v1981_v39  ;;  %v2269_v1 = vld [vmem:[#allocation15 + $0xd8] sm:$0xff]  ;;  %v2252_v40 = vld [vmem:[#allocation15 + $0x50] sm:$0xff] }
 0x989   : > { %v1960_v45 = vpop.f32.mrb[28].mxu1  ;;  %v3584_v39 = vpack.c.bf16 %v2269_v1, %v2268_v38  ;;  %v3586_v42 = vpack.c.bf16 %v2253_v41, %v2252_v40 }
 0x98a   : > { %v1979_v46 = vadd.f32 %v2697_v34, %v1971_v44  ;;  %v1961_v47 = vadd.f32 %v2882_v43, %v1960_v45  ;;  %v3176_v48 = vpop.f32.mrb[29].mxu1  ;;  %v2282_v43 = vld [vmem:[#allocation15 + $0x140] sm:$0xff]  ;;  %v2283_v44 = vld [vmem:[#allocation15 + $0x148] sm:$0xff] }
 0x98b   : > { %v3609_v45 = vpack.c.bf16 %v2283_v44, %v2282_v43  ;;  %v2703_v44 = vld [vmem:[%s4788_s10 + $0x20] ss:$0 sm:$0xff] }
 0x98c   : > { %v1982_v53 = vmax.f32 %v1979_v46, 0.0  ;;  %v1972_v54 = vmul.f32 %v2695_v28, %v1961_v47  ;;  %v2266_v28 = vld [vmem:[#allocation15 + $0xc0] sm:$0xff]  ;;  %v2271_v47 = vld [vmem:[#allocation15 + $0xe8] sm:$0xff] }
 0x98d   : > { %v3580_v30 = vpack.c.bf16 %v2267_v29, %v2266_v28  ;;  %v2270_v46 = vld [vmem:[#allocation15 + $0xe0] sm:$0xff] }
 0x98e   : > { %1988 = vst [vmem:[#allocation2 + $0x10] sm:$0xff] %v1982_v53  ;;  %v1980_v56 = vadd.f32 %v2697_v34, %v1972_v54  ;;  %v3582_v34 = vpack.c.bf16 %v2251_v32, %v2250_v31  ;;  %v3588_v48 = vpack.c.bf16 %v2271_v47, %v2270_v46 }
 0x98f   : > { %v1990_v60 = vld [vmem:[#allocation2 + $0x7] sm:$0xff] }
 0x990   : > { %v1983_v61 = vmax.f32 %v1980_v56, 0.0  ;;  %2112 = vmatmul.mubr.f32.vlgmr.msra.gmra.mrb[30].mxu0 %v1990_v60  ;;  %v2273_v56 = vld [vmem:[#allocation15 + $0xf8] sm:$0xff]  ;;  %v3594_v60 = vpack.c.bf16 %v2257_v59, %v2256_v58 }
 0x991   : > { %2116 = vmatprep.mubr.f32.mxu0 %v1982_v53  ;;  %3567 = vmatpush3.bf16.msra.mxu0 %v3566_v55  ;;  %v2285_v53 = vld [vmem:[#allocation15 + $0x158] sm:$0xff]  ;;  %v2272_v55 = vld [vmem:[#allocation15 + $0xf0] sm:$0xff] }
 0x992   : > { %v1986_v5 = vmul.f32 0.0, %v1983_v61  ;;  %3569 = vmatprep.subr.bf16.mxu0 %v3568_v57  ;;  %v3612_v54 = vpack.c.bf16 %v2285_v53, %v2284_v52  ;;  %v3592_v57 = vpack.c.bf16 %v2273_v56, %v2272_v55  ;;  %v2286_v61 = vld [vmem:[#allocation15 + $0x160] sm:$0xff] }
 0x994   : > { %1989 = vst [vmem:[#allocation2 + $0x18] sm:$0xff] %v1986_v5 }
 0x995   : > { %v1996_v8 = vld [vmem:[#allocation2 + $0x9] sm:$0xff]  ;;  %3571 = vmatpush3.bf16.msra.mxu0 %v3570_v63  ;;  %v3615_v63 = vpack.c.bf16 %v2287_v62, %v2286_v61 }
 0x996   : > { %v1991_v9 = vld [vmem:[#allocation2 + $0xf] sm:$0xff]  ;;  %3210 = vmatmul.mubr.f32.vlgmr.msra.gmra.mrb[30].mxu1 %v1996_v8  ;;  %3573 = vmatprep.subr.bf16.mxu0 %v3572_v7 }
 0x997   : > { %2117 = vmatmul.mubr.f32.gmra.mrb[32].mxu0 %v1991_v9  ;;  %3212 = vmatprep.mubr.msk.f32.mxu1 %vm4095_vm0, %v4656_v33  ;;  %v2699_v9 = vld [vmem:[%s4788_s10 + $0x1c] ss:$0 sm:$0xff] }
 0x998   : > { %2121 = vmatprep.mubr.f32.mxu0 %v1986_v5  ;;  %3598 = vmatpush3.bf16.msra.mxu1 %v3597_v6 }
 0x999   : > { %3599 = vmatprep.subr.bf16.mxu1 %v4093_v0  ;;  %3575 = vmatpush3.bf16.msra.mxu0 %v3574_v15 }
 0x99a   : > { %3577 = vmatprep.subr.bf16.mxu0 %v3576_v22 }
 0x99b   : > { %v1997_v10 = vld [vmem:[#allocation2 + $0x11] sm:$0xff]  ;;  %v1998_v12 = vld [vmem:[#allocation2 + $0x19] sm:$0xff] }
 0x99c   : > { %v1992_v11 = vld [vmem:[#allocation2 + $0x17] sm:$0xff]  ;;  %3213 = vmatmul.mubr.f32.gmra.mrb[32].mxu1 %v1997_v10 }
 0x99d   : > { %2122 = vmatmul.mubr.f32.gmra.mrb[34].mxu0 %v1992_v11  ;;  %3215 = vmatprep.mubr.msk.f32.mxu1 %vm4095_vm0, %v4656_v33 }
 0x99e   : > { %3601 = vmatpush3.bf16.msra.mxu1 %v3600_v18  ;;  %3579 = vmatpush3.bf16.msra.mxu0 %v3578_v24 }
 0x99f   : > { %3602 = vmatprep.subr.bf16.mxu1 %v4093_v0  ;;  %3581 = vmatprep.subr.bf16.mxu0 %v3580_v30 }
 0x9a0   : > { %3216 = vmatmul.mubr.f32.gmra.mrb[34].mxu1 %v1998_v12 }
 0x9a1   : > { %3250 = vmatprep.mubr.msk.f32.mxu1 %vm4095_vm0, %v4656_v33 }
 0x9a2   : > { %3604 = vmatpush3.bf16.msra.mxu1 %v3603_v27  ;;  %3583 = vmatpush3.bf16.msra.mxu0 %v3582_v34 }
 0x9a3   : > { %3605 = vmatprep.subr.bf16.mxu1 %v4093_v0  ;;  %3585 = vmatprep.subr.bf16.mxu0 %v3584_v39 }
 0x9a6   : > { %3607 = vmatpush3.bf16.msra.mxu1 %v3606_v37  ;;  %3587 = vmatpush3.bf16.msra.mxu0 %v3586_v42 }
 0x9a7   : > { %3608 = vmatprep.subr.bf16.mxu1 %v4093_v0  ;;  %3589 = vmatprep.subr.bf16.mxu0 %v3588_v48 }
 0x9aa   : > { %3610 = vmatpush3.bf16.msra.mxu1 %v3609_v45  ;;  %3591 = vmatpush3.bf16.msra.mxu0 %v3590_v51 }
 0x9ab   : > { %3611 = vmatprep.subr.bf16.mxu1 %v4093_v0  ;;  %3593 = vmatprep.subr.bf16.mxu0 %v3592_v57 }
 0x9ae   : > { %3613 = vmatpush3.bf16.msra.mxu1 %v3612_v54  ;;  %3595 = vmatpush3.bf16.msra.mxu0 %v3594_v60 }
 0x9af   : > { %3614 = vmatprep.subr.bf16.mxu1 %v4093_v0 }
 0x9b2   : > { %3616 = vmatpush3.bf16.msra.mxu1 %v3615_v63 }
 0x9b3   : > { %3617 = vmatprep.subr.bf16.mxu1 %v4093_v0  ;;  %v2701_v0 = vld [vmem:[%s4788_s10 + $0x1d] ss:$0 sm:$0xff] }
 0x9b6   : > { %3619 = vmatpush3.bf16.msra.mxu1 %v3618_v4 }
 0xa63   : > { %v2934_v5 = vpop.f32.mrb[30].mxu0 }
 0xa64   : > { %v2935_v6 = vpop.f32.mrb[31].mxu0 }
 0xa65   : > { %v2936_v7 = vadd.f32 %v2935_v6, %v2934_v5 }
 0xa69   : > { %v2193_v8 = vpop.f32.mrb[30].mxu1 }
 0xa6a   : > { %v2937_v10 = vpop.f32.mrb[32].mxu0  ;;  %v2194_v11 = vadd.f32 %v2936_v7, %v2193_v8  ;;  %v3211_v12 = vpop.f32.mrb[31].mxu1 }
 0xa6b   : > { %v2938_v13 = vpop.f32.mrb[33].mxu0 }
 0xa6c   : > { %v2939_v14 = vadd.f32 %v2938_v13, %v2937_v10  ;;  %v2213_v15 = vmul.f32 %v2699_v9, %v2194_v11 }
 0xa6e   : > { %v2221_v16 = vadd.f32 %v2701_v0, %v2213_v15 }
 0xa6f   : > { %v2198_v17 = vpop.f32.mrb[32].mxu1 }
 0xa70   : > { %v2940_v18 = vpop.f32.mrb[34].mxu0  ;;  %v2224_v19 = vmax.f32 %v2221_v16, 0.0  ;;  %v2199_v20 = vadd.f32 %v2939_v14, %v2198_v17  ;;  %v3214_v21 = vpop.f32.mrb[33].mxu1 }
 0xa71   : > { %v2941_v22 = vpop.f32.mrb[35].mxu0 }
 0xa72   : > { %v2942_v23 = vadd.f32 %v2941_v22, %v2940_v18  ;;  %2230 = vst [vmem:[#allocation2 + $0x8] sm:$0xff] %v2224_v19  ;;  %v2214_v24 = vmul.f32 %v2699_v9, %v2199_v20  ;;  %2354 = vmatprep.mubr.f32.mxu0 %v2224_v19 }
 0xa73   : > { %v2203_v25 = vpop.f32.mrb[34].mxu1 }
 0xa74   : > { %v2222_v26 = vadd.f32 %v2701_v0, %v2214_v24  ;;  %v2204_v27 = vadd.f32 %v2942_v23, %v2203_v25  ;;  %v3217_v28 = vpop.f32.mrb[35].mxu1 }
 0xa76   : > { %v2225_v29 = vmax.f32 %v2222_v26, 0.0  ;;  %v2215_v30 = vmul.f32 %v2699_v9, %v2204_v27 }
 0xa78   : > { %2231 = vst [vmem:[#allocation2 + $0x10] sm:$0xff] %v2225_v29  ;;  %v2223_v31 = vadd.f32 %v2701_v0, %v2215_v30 }
 0xa79   : > { %v2233_v32 = vld [vmem:[#allocation2 + $0x7] sm:$0xff] }
 0xa7a   : > { %v2226_v34 = vmax.f32 %v2223_v31, 0.0  ;;  %2355 = vmatmul.mubr.f32.vlgmr.msra.gmra.mrb[36].mxu0 %v2233_v32 }
 0xa7b   : > { %2359 = vmatprep.mubr.f32.mxu0 %v2225_v29 }
 0xa7c   : > { %v2229_v35 = vmul.f32 0.0, %v2226_v34 }
 0xa7e   : > { %2232 = vst [vmem:[#allocation2 + $0x18] sm:$0xff] %v2229_v35 }
 0xa7f   : > { %v2239_v36 = vld [vmem:[#allocation2 + $0x9] sm:$0xff] }
 0xa80   : > { %v2234_v37 = vld [vmem:[#allocation2 + $0xf] sm:$0xff]  ;;  %3251 = vmatmul.mubr.f32.vlgmr.msra.gmra.mrb[36].mxu1 %v2239_v36 }
 0xa81   : > { %2360 = vmatmul.mubr.f32.gmra.mrb[38].mxu0 %v2234_v37  ;;  %3253 = vmatprep.mubr.msk.f32.mxu1 %vm4095_vm0, %v4656_v33 }
 0xa82   : > { %2364 = vmatprep.mubr.f32.mxu0 %v2229_v35 }
 0xa85   : > { %v2240_v38 = vld [vmem:[#allocation2 + $0x11] sm:$0xff]  ;;  %v2241_v39 = vld [vmem:[#allocation2 + $0x19] sm:$0xff] }
 0xa86   : > { %v2235_v1 = vld [vmem:[#allocation2 + $0x17] sm:$0xff]  ;;  %3254 = vmatmul.mubr.f32.gmra.mrb[38].mxu1 %v2240_v38 }
 0xa87   : > { %2365 = vmatmul.mubr.f32.gmra.mrb[40].mxu0 %v2235_v1  ;;  %3256 = vmatprep.mubr.msk.f32.mxu1 %vm4095_vm0, %v4656_v33 }
 0xa8a   : > { %3257 = vmatmul.mubr.f32.gmra.mrb[40].mxu1 %v2241_v39 }
 0xb4d   : > { %v2994_v40 = vpop.f32.mrb[36].mxu0 }
 0xb4e   : > { %v2995_v41 = vpop.f32.mrb[37].mxu0 }
 0xb4f   : > { %v2996_v42 = vadd.f32 %v2995_v41, %v2994_v40 }
 0xb53   : > { %v2436_v43 = vpop.f32.mrb[36].mxu1 }
 0xb54   : > { %v2997_v45 = vpop.f32.mrb[38].mxu0  ;;  %v2437_v46 = vadd.f32 %v2996_v42, %v2436_v43  ;;  %v3252_v47 = vpop.f32.mrb[37].mxu1 }
 0xb55   : > { %v2998_v48 = vpop.f32.mrb[39].mxu0 }
 0xb56   : > { %v2999_v33 = vadd.f32 %v2998_v48, %v2997_v45  ;;  %v2456_v50 = vmul.f32 %v2703_v44, %v2437_v46 }
 0xb58   : > { %v2464_v51 = vadd.f32 %v2705_v49, %v2456_v50 }
 0xb59   : > { %v2441_v52 = vpop.f32.mrb[38].mxu1 }
 0xb5a   : > { %v3000_v53 = vpop.f32.mrb[40].mxu0  ;;  %3768 = vtanh.f32 %v2464_v51  ;;  %v2442_v54 = vadd.f32 %v2999_v33, %v2441_v52  ;;  %v3255_v55 = vpop.f32.mrb[39].mxu1 }
 0xb5b   : > { %v3001_v56 = vpop.f32.mrb[41].mxu0 }
 0xb5c   : > { %v3002_v57 = vadd.f32 %v3001_v56, %v3000_v53  ;;  %v2457_v58 = vmul.f32 %v2703_v44, %v2442_v54 }
 0xb5d   : > { %v2446_v59 = vpop.f32.mrb[40].mxu1 }
 0xb5e   : > { %v2465_v60 = vadd.f32 %v2705_v49, %v2457_v58  ;;  %v2447_v61 = vadd.f32 %v3002_v57, %v2446_v59  ;;  %v3258_v62 = vpop.f32.mrb[41].mxu1 }
 0xb60   : > { %3770 = vtanh.f32 %v2465_v60  ;;  %v2458_v63 = vmul.f32 %v2703_v44, %v2447_v61 }
 0xb62   : > { %v2466_v2 = vadd.f32 %v2705_v49, %v2458_v63 }
 0xb64   : > { %v3769_v3 = vpop.eup %3768  ;;  %3772 = vtanh.f32 %v2466_v2 }
 0xb65   : > { %2473 = vst [vmem:[%s496_s3] sm:$0xff] %v3769_v3 }
 0xb6a   : > { %v3771_v4 = vpop.eup %3770 }
 0xb6b   : > { %2474 = vst [vmem:[%s496_s3 + $0x8] sm:$0xff] %v3771_v4 }
 0xb6e   : > { %v3773_v5 = vpop.eup %3772 }
 0xb6f   : > { %v2472_v6 = vmul.f32 0.0, %v3773_v5 }
 0xb71   : > { %2475 = vst [vmem:[%s496_s3 + $0x10] sm:$0xff] %v2472_v6 }
 0xb72   : > { %4012 = shalt.err (!%p4009_p4)
}
 0xb73   : > { %s4013_s29 = scalar_lea.hbm %s4732_s15, 384  ;;  %s4017_s26 = scalar_lea.hbm %s4826_s12, 768 }
 0xb74   : > { %p4014_p12 = scmp.ne.s32.totalorder %s4732_s15, %s4013_s29  ;;  %p4018_p11 = scmp.lt.u32.totalorder %s4732_s15, %s4826_s12 }
 0xb75   : > { %p4019_p13 = scmp.lt.u32.totalorder %s4017_s26, %s4013_s29  ;;  %p4021_p6 = scmp.lt.u32.totalorder %s4013_s29, %s4732_s15 }
 0xb76   : > { %p4015_p7 = pnand %p4014_p12, %p4827_p9 }
 0xb77   : > { %p4020_p1 = por %p4019_p13, %p4018_p11 }
 0xb78   : > { %p4016_p8 = pneg %p4015_p7 }
 0xb79   : > { %p4022_p5 = por %p4021_p6, %p4020_p1 }
 0xb7b   : > { %p4023_p0 = pnand %p4022_p5, %p4016_p8 }
 0xb7d   : > { %4026 = shalt.err (!%p4023_p0)
}
 0xb7e   : > { %s4101_s17 = smov 128  }
 0xb7f   : > { %3655 = dma.vmem_to_hbm [thread:$0]  (%p4827_p9), %s4734_s30, 384, %s4732_s15, %s4736_s28, %s4101_s17, %s4101_s17, %s4096_s25  }
 0xb80 PF: > { %s4828_s14 = sld [smem:[#allocation26_spill]]  ;;  %s4829_s16 = sld [smem:[#allocation24_spill]] }
 0xb81   : > { %s4830_s19 = sld [smem:[#allocation29_spill]] }
 0xb86   : > { %p3702_p10 = scmp.ge.s32.totalorder %s4828_s14, 2  ;;  %s2505_s20 = sand.u32 1, %s4829_s16  }
 0xb87   : > { %p4831_p2 = scmp.ne.s32.totalorder %s4830_s19, 0  ;;  %s2506_s21 = scalar_lea.sflag [#allocation5], %s2505_s20 }
 0xb89   : > { %p3683_p3 = pnand %p3702_p10, %p4831_p2 }
 0xb8b   : > { %4064 = dma.done.wait (!%p3683_p3), %s2506_s21, 384  }
 0xb8c   : > { %4066 = vsyncadd (!%p3683_p3), %s2506_s21, 4294966912  ;;  %s4832_s20 = sld [smem:[#allocation27_spill]]  ;;  %s4833_s11 = sld [smem:[#allocation25_spill]] }
 0xb8d   : > { %s4834_s19 = sld [smem:[#allocation28_spill]]  ;;  %s4835_s17 = smov %s4073_s18 }
 0xb92   : > { %p26_p4 = scmp.ge.s32.totalorder %s4832_s20, 4   ;;  %s4836_s18 = smov %s4833_s11 }
 0xb94   :  { %28 = sbr.rel (!%p26_p4) target bundleno = 11 (0xb), region = 140 }
 0xb9b   :  { %2511 = vsyncpa [#allocation4], 1 }
 0xb9c   :  { %2513 = vsyncpa [#allocation4 + $0x1], 1 }
 0xb9d   :  { %2514 = vsyncpa [#allocation7], 1 }
 0xb9e   :  { %2515 = vsyncpa [#allocation10], 1 }
 0xb9f   :  { %2516 = vsyncpa [#allocation13], 1 }
 0xba0   :  { %2517 = vsyncpa [#allocation16], 1 }
 0xba1   :  { %2518 = vsyncpa [#allocation5], 1 }
 0xba2   :  { %2520 = vsyncpa [#allocation5 + $0x1], 1 }

</bundles_post_ra>
